<compile_context>
chip_gen: v7x
topology: tpu7x:2x2x1
jax: 0.10.0
libtpu: 0.0.40
codegen_flags: <defaults>
</compile_context>

<pallas_src>
import jax
import jax.numpy as jnp
from jax import lax
from jax.experimental import pallas as pl
from jax.experimental.pallas import tpu as pltpu


# ----------------------------------------------------------------------------
# In-kernel helpers (value-space; channels-major layout (C, H, W)).
# ----------------------------------------------------------------------------
def _pad_hw(x):
    """Zero-pad a (C, H, W) value by 1 on both spatial axes -> (C, H+2, W+2)."""
    C, H, W = x.shape
    zc = jnp.zeros((C, H, 1), x.dtype)
    rows = jnp.concatenate([zc, x, zc], axis=2)          # (C, H, W+2)
    zr = jnp.zeros((C, 1, W + 2), x.dtype)
    return jnp.concatenate([zr, rows, zr], axis=1)       # (C, H+2, W+2)


def _conv3x3_relu(x, wmat, bias):
    """3x3 conv (pad=1) + bias + ReLU.

    x:    (Ci, H, W)      bf16 activations (channels-major)
    wmat: (Co, 9*Ci)      bf16, column index flattens (kh, kw, c)
    bias: (Co, 1)         f32
    returns (Co, H*W)     f32
    """
    Ci, H, W = x.shape
    xp = _pad_hw(x)                                      # (Ci, H+2, W+2)
    # im2col: one deep-K GEMM instead of nine shallow ones.
    taps = [xp[:, kh:kh + H, kw:kw + W].reshape(Ci, H * W)
            for kh in range(3) for kw in range(3)]
    patches = jnp.concatenate(taps, axis=0)              # (9*Ci, H*W)
    acc = jnp.dot(wmat, patches,
                  preferred_element_type=jnp.float32)    # (Co, H*W) f32 acc
    return jnp.maximum(acc + bias, 0.0)


# ----------------------------------------------------------------------------
# Pallas kernel: whole unetUp forward for one batch element.
# ----------------------------------------------------------------------------
def unet_up_kernel(x1_ref, x2_ref, uy_ref, uxt_ref,
                   w1_ref, b1_ref, w2_ref, b2_ref, o_ref):
    _, C1, H, W = x1_ref.shape
    _, C2, Hh, Wh = x2_ref.shape
    Cmid = w1_ref.shape[0]

    # ---- bilinear upsample x2 (align_corners=True, scale 2), kron-free ------
    x2 = x2_ref[0]                                       # (C2, Hh, Wh) f32
    # W-axis interpolation: plain GEMM, contraction over Wh only.
    r = jnp.dot(x2.reshape(C2 * Hh, Wh), uxt_ref[...],
                preferred_element_type=jnp.float32)      # (C2*Hh, W)
    r = r.reshape(C2, Hh, W)
    # H-axis interpolation: C2-batched (H, Hh) @ (Hh, W) matmul.
    uy_b = jnp.broadcast_to(uy_ref[...][None, :, :], (C2, H, Hh))
    up = lax.dot_general(uy_b, r, (((2,), (1,)), ((0,), (0,))),
                         preferred_element_type=jnp.float32)  # (C2, H, W)

    # ---- concat (channels-major) and conv1 + ReLU (single merged GEMM) ------
    x1 = x1_ref[0]                                       # (C1, H, W) f32
    cat = jnp.concatenate([x1, up], axis=0).astype(jnp.bfloat16)  # (C1+C2,H,W)
    h1 = _conv3x3_relu(cat, w1_ref[...], b1_ref[...])    # (Cmid, H*W) f32

    # ---- conv2 + ReLU --------------------------------------------------------
    h1 = h1.reshape(Cmid, H, W).astype(jnp.bfloat16)
    out = _conv3x3_relu(h1, w2_ref[...], b2_ref[...])    # (Cout, H*W) f32

    # Lane-dense store: minor dim is H*W, directly NCHW-compatible.
    o_ref[0] = out.astype(o_ref.dtype)


# ----------------------------------------------------------------------------
# Interpolation matrix for 1-D bilinear resize with align_corners=True.
# ----------------------------------------------------------------------------
def interp_matrix(in_size, out_size, dtype=jnp.float32):
    if out_size == 1:
        m = jnp.zeros((1, in_size), dtype)
        return m.at[0, 0].set(1.0)
    src = jnp.arange(out_size, dtype=jnp.float32) * (in_size - 1) / (out_size - 1)
    i0 = jnp.clip(jnp.floor(src).astype(jnp.int32), 0, in_size - 1)
    i1 = jnp.minimum(i0 + 1, in_size - 1)
    frac = src - i0.astype(jnp.float32)
    rows = jnp.arange(out_size)
    m = jnp.zeros((out_size, in_size), dtype)
    m = m.at[rows, i0].add((1.0 - frac).astype(dtype))
    m = m.at[rows, i1].add(frac.astype(dtype))
    return m


# ----------------------------------------------------------------------------
# Wrapper: NCHW in / NCHW out (PyTorch convention) -- no transposes needed.
# ----------------------------------------------------------------------------
@jax.jit
def unet_up_forward(inputs1_nchw, inputs2_nchw, w1, b1, w2, b2):
    x1 = inputs1_nchw.astype(jnp.float32)                # (N, C1, H, W)
    x2 = inputs2_nchw.astype(jnp.float32)                # (N, C2, Hh, Wh)
    N, C1, H, W = x1.shape
    _, C2, Hh, Wh = x2.shape
    Cin = C1 + C2
    Cmid = w1.shape[3]
    Cout = w2.shape[3]
    assert w1.shape == (3, 3, Cin, Cmid) and w2.shape == (3, 3, Cmid, Cout)

    uy = interp_matrix(Hh, H)                            # (H, Hh)
    uxt = interp_matrix(Wh, W).T                         # (Wh, W)

    # Conv weights as (Cout, 9*Cin) bf16 for the channels-major im2col GEMM.
    w1m = jnp.transpose(w1.reshape(9 * Cin, Cmid)).astype(jnp.bfloat16)
    w2m = jnp.transpose(w2.reshape(9 * Cmid, Cout)).astype(jnp.bfloat16)
    b1r = b1.reshape(Cmid, 1).astype(jnp.float32)
    b2r = b2.reshape(Cout, 1).astype(jnp.float32)

    # One batch element per grid step; whole image stays VMEM-resident at these
    # shapes.  For production sizes (e.g. H=W=256, C>=64) add an H-tiled grid
    # axis with a 1-row halo and size the tile per-generation VMEM.
    out = pl.pallas_call(
        unet_up_kernel,
        out_shape=jax.ShapeDtypeStruct((N, Cout, H * W), jnp.float32),
        grid=(N,),
        in_specs=[
            pl.BlockSpec((1, C1, H, W), lambda n: (n, 0, 0, 0)),
            pl.BlockSpec((1, C2, Hh, Wh), lambda n: (n, 0, 0, 0)),
            pl.BlockSpec((H, Hh), lambda n: (0, 0)),
            pl.BlockSpec((Wh, W), lambda n: (0, 0)),
            pl.BlockSpec((Cmid, 9 * Cin), lambda n: (0, 0)),
            pl.BlockSpec((Cmid, 1), lambda n: (0, 0)),
            pl.BlockSpec((Cout, 9 * Cmid), lambda n: (0, 0)),
            pl.BlockSpec((Cout, 1), lambda n: (0, 0)),
        ],
        out_specs=pl.BlockSpec((1, Cout, H * W), lambda n: (n, 0, 0)),
        compiler_params=pltpu.CompilerParams(
            dimension_semantics=("parallel",)),
    )(x1, x2, uy, uxt, w1m, b1r, w2m, b2r)

    return out.reshape(N, Cout, H, W)                    # NCHW, free reshape


# ----------------------------------------------------------------------------
# Pure-JAX f32 reference (faithful to the PyTorch module) for correctness.
# ----------------------------------------------------------------------------
def _bilinear_up_ref(x):  # NCHW, scale 2, align_corners=True
    N, C, H, W = x.shape
    Ho, Wo = 2 * H, 2 * W
    ys = jnp.arange(Ho, dtype=jnp.float32) * (H - 1) / (Ho - 1)
    xs = jnp.arange(Wo, dtype=jnp.float32) * (W - 1) / (Wo - 1)
    y0 = jnp.floor(ys).astype(jnp.int32)
    y1 = jnp.minimum(y0 + 1, H - 1)
    fy = (ys - y0.astype(jnp.float32))[None, None, :, None]
    x0 = jnp.floor(xs).astype(jnp.int32)
    x1 = jnp.minimum(x0 + 1, W - 1)
    fx = (xs - x0.astype(jnp.float32))[None, None, None, :]
    top = x[:, :, y0, :] * (1.0 - fy) + x[:, :, y1, :] * fy
    return top[:, :, :, x0] * (1.0 - fx) + top[:, :, :, x1] * fx


def _reference_forward(x1, x2, w1, b1, w2, b2):  # NCHW inputs, HWIO weights
    dn = ("NCHW", "HWIO", "NCHW")
    cat = jnp.concatenate([x1, _bilinear_up_ref(x2)], axis=1)
    y = lax.conv_general_dilated(cat, w1, (1, 1), "SAME", dimension_numbers=dn)
    y = jnp.maximum(y + b1[None, :, None, None], 0.0)
    y = lax.conv_general_dilated(y, w2, (1, 1), "SAME", dimension_numbers=dn)
    return jnp.maximum(y + b2[None, :, None, None], 0.0)


if __name__ == "__main__":
    # inputs1: full-res skip connection; inputs2: half-res map to be upsampled.
    N, C1, H, W = 2, 4, 16, 16
    C2 = 4
    in_size = C1 + C2          # channels after concat
    out_size = 8               # out channels of both convs

    key = jax.random.PRNGKey(0)
    k1, k2, k3, k4, k5, k6 = jax.random.split(key, 6)
    inputs1 = jax.random.normal(k1, (N, C1, H, W), jnp.float32)
    inputs2 = jax.random.normal(k2, (N, C2, H // 2, W // 2), jnp.float32)

    # Deterministic synthetic parameters (HWIO layout).
    w1 = 0.1 * jax.random.normal(k3, (3, 3, in_size, out_size), jnp.float32)
    b1 = 0.05 * jax.random.normal(k4, (out_size,), jnp.float32)
    w2 = 0.1 * jax.random.normal(k5, (3, 3, out_size, out_size), jnp.float32)
    b2 = 0.05 * jax.random.normal(k6, (out_size,), jnp.float32)

    out = jax.block_until_ready(unet_up_forward(inputs1, inputs2, w1, b1, w2, b2))
    ref = jax.block_until_ready(_reference_forward(inputs1, inputs2, w1, b1, w2, b2))

    if out.shape != (N, out_size, H, W):
        raise AssertionError(f"bad output shape {out.shape}")
    err = float(jnp.max(jnp.abs(out - ref)))
    # Tolerance sized for bf16 MXU operands with f32 accumulation vs. the f32
    # reference (two chained 3x3 convs): observed error is O(1e-2).
    if err > 5e-2:
        raise AssertionError(f"Pallas kernel mismatch vs reference, max err {err}")

    print("KERNEL_OK")
</pallas_src>

<mosaic_0001>
module attributes {stable_mosaic.version = 11 : i64} {
  func.func private @main(%arg0: i32) attributes {dimension_semantics = [#tpu.dimension_semantics<core_parallel>], iteration_bounds = array<i64: 2>, tpu.core_type = #tpu.core_type<sc_scalar_subcore>, window_params = []} {
    return
  }
}

module attributes {stable_mosaic.version = 11 : i64} {
  func.func private @main(%arg0: i32) attributes {dimension_semantics = [#tpu.dimension_semantics<core_parallel>], iteration_bounds = array<i64: 2>, tpu.core_type = #tpu.core_type<sc_scalar_subcore>, window_params = []} {
    return
  }
}

module attributes {stable_mosaic.version = 11 : i64} {
  func.func @unet_up_kernel(%arg0: i32, %arg1: memref<1x4x16x16xf32, #tpu.memory_space<vmem>>, %arg2: memref<1x4x8x8xf32, #tpu.memory_space<vmem>>, %arg3: memref<16x8xf32, #tpu.memory_space<vmem>>, %arg4: memref<8x16xf32, #tpu.memory_space<vmem>>, %arg5: memref<8x72xbf16, #tpu.memory_space<vmem>>, %arg6: memref<8x1xf32, #tpu.memory_space<vmem>>, %arg7: memref<8x72xbf16, #tpu.memory_space<vmem>>, %arg8: memref<8x1xf32, #tpu.memory_space<vmem>>, %arg9: memref<1x8x256xf32, #tpu.memory_space<vmem>>) attributes {dimension_semantics = [#tpu.dimension_semantics<parallel>], iteration_bounds = array<i64: 2>, scalar_prefetch = 0 : i64, scratch_operands = 0 : i64, tpu.core_type = #tpu.core_type<tc>, window_params = [{transform_indices = @transform_0, window_bounds = array<i64: 1, 4, 16, 16>}, {transform_indices = @transform_1, window_bounds = array<i64: 1, 4, 8, 8>}, {pipeline_mode = #tpu.pipeline_mode<synchronous>, transform_indices = @transform_2, window_bounds = array<i64: 16, 8>}, {pipeline_mode = #tpu.pipeline_mode<synchronous>, transform_indices = @transform_3, window_bounds = array<i64: 8, 16>}, {pipeline_mode = #tpu.pipeline_mode<synchronous>, transform_indices = @transform_4, window_bounds = array<i64: 8, 72>}, {pipeline_mode = #tpu.pipeline_mode<synchronous>, transform_indices = @transform_5, window_bounds = array<i64: 8, 1>}, {pipeline_mode = #tpu.pipeline_mode<synchronous>, transform_indices = @transform_6, window_bounds = array<i64: 8, 72>}, {pipeline_mode = #tpu.pipeline_mode<synchronous>, transform_indices = @transform_7, window_bounds = array<i64: 8, 1>}, {transform_indices = @transform_8, window_bounds = array<i64: 1, 8, 256>}]} {
    %c0 = arith.constant 0 : index
    %c0_0 = arith.constant 0 : index
    %c0_1 = arith.constant 0 : index
    %c0_2 = arith.constant 0 : index
    %0 = vector.load %arg2[%c0, %c0_0, %c0_1, %c0_2] : memref<1x4x8x8xf32, #tpu.memory_space<vmem>>, vector<1x4x8x8xf32>
    %1 = vector.shape_cast %0 : vector<1x4x8x8xf32> to vector<4x8x8xf32>
    %2 = vector.shape_cast %1 : vector<4x8x8xf32> to vector<32x8xf32>
    %c0_3 = arith.constant 0 : index
    %c0_4 = arith.constant 0 : index
    %3 = vector.load %arg4[%c0_3, %c0_4] : memref<8x16xf32, #tpu.memory_space<vmem>>, vector<8x16xf32>
    %cst = arith.constant dense<0.000000e+00> : vector<32x16xf32>
    %4 = tpu.matmul %2, %3, %cst {dimension_numbers = #tpu.dot_dimension_numbers<[1], [0], [0], [1], [0, 0, 1, 1], [], []>} : vector<32x8xf32>, vector<8x16xf32>, vector<32x16xf32> -> vector<32x16xf32>
    %5 = vector.shape_cast %4 : vector<32x16xf32> to vector<4x8x16xf32>
    %c0_5 = arith.constant 0 : index
    %c0_6 = arith.constant 0 : index
    %6 = vector.load %arg3[%c0_5, %c0_6] : memref<16x8xf32, #tpu.memory_space<vmem>>, vector<16x8xf32>
    %7 = vector.shape_cast %6 : vector<16x8xf32> to vector<1x16x8xf32>
    %8 = vector.shape_cast %7 : vector<1x16x8xf32> to vector<1x16x8xf32>
    %9 = vector.broadcast %8 : vector<1x16x8xf32> to vector<4x16x8xf32>
    %cst_7 = arith.constant dense<0.000000e+00> : vector<4x16x16xf32>
    %10 = tpu.matmul %9, %5, %cst_7 {dimension_numbers = #tpu.dot_dimension_numbers<[2], [1], [1], [2], [0, 0, 0, 1, 1, 2], [0], [0]>} : vector<4x16x8xf32>, vector<4x8x16xf32>, vector<4x16x16xf32> -> vector<4x16x16xf32>
    %c0_8 = arith.constant 0 : index
    %c0_9 = arith.constant 0 : index
    %c0_10 = arith.constant 0 : index
    %c0_11 = arith.constant 0 : index
    %11 = vector.load %arg1[%c0_8, %c0_9, %c0_10, %c0_11] : memref<1x4x16x16xf32, #tpu.memory_space<vmem>>, vector<1x4x16x16xf32>
    %12 = vector.shape_cast %11 : vector<1x4x16x16xf32> to vector<4x16x16xf32>
    %13 = tpu.concatenate %12, %10 in 0 : vector<4x16x16xf32>, vector<4x16x16xf32> -> vector<8x16x16xf32>
    %14 = arith.truncf %13 : vector<8x16x16xf32> to vector<8x16x16xbf16>
    %c0_12 = arith.constant 0 : index
    %c0_13 = arith.constant 0 : index
    %15 = vector.load %arg5[%c0_12, %c0_13] : memref<8x72xbf16, #tpu.memory_space<vmem>>, vector<8x72xbf16>
    %c0_14 = arith.constant 0 : index
    %c0_15 = arith.constant 0 : index
    %16 = vector.load %arg6[%c0_14, %c0_15] : memref<8x1xf32, #tpu.memory_space<vmem>>, vector<8x1xf32>
    %cst_16 = arith.constant 0.000000e+00 : bf16
    %17 = vector.broadcast %cst_16 : bf16 to vector<8x16x1xbf16>
    %18 = tpu.concatenate %17, %14, %17 in 2 : vector<8x16x1xbf16>, vector<8x16x16xbf16>, vector<8x16x1xbf16> -> vector<8x16x18xbf16>
    %cst_17 = arith.constant 0.000000e+00 : bf16
    %19 = vector.broadcast %cst_17 : bf16 to vector<8x1x18xbf16>
    %20 = tpu.concatenate %19, %18, %19 in 1 : vector<8x1x18xbf16>, vector<8x16x18xbf16>, vector<8x1x18xbf16> -> vector<8x18x18xbf16>
    %21 = vector.extract_strided_slice %20 {offsets = [0, 0, 0], sizes = [8, 16, 16], strides = [1, 1, 1]} : vector<8x18x18xbf16> to vector<8x16x16xbf16>
    %22 = vector.shape_cast %21 : vector<8x16x16xbf16> to vector<8x256xbf16>
    %23 = vector.extract_strided_slice %20 {offsets = [0, 0, 1], sizes = [8, 16, 16], strides = [1, 1, 1]} : vector<8x18x18xbf16> to vector<8x16x16xbf16>
    %24 = vector.shape_cast %23 : vector<8x16x16xbf16> to vector<8x256xbf16>
    %25 = vector.extract_strided_slice %20 {offsets = [0, 0, 2], sizes = [8, 16, 16], strides = [1, 1, 1]} : vector<8x18x18xbf16> to vector<8x16x16xbf16>
    %26 = vector.shape_cast %25 : vector<8x16x16xbf16> to vector<8x256xbf16>
    %27 = vector.extract_strided_slice %20 {offsets = [0, 1, 0], sizes = [8, 16, 16], strides = [1, 1, 1]} : vector<8x18x18xbf16> to vector<8x16x16xbf16>
    %28 = vector.shape_cast %27 : vector<8x16x16xbf16> to vector<8x256xbf16>
    %29 = vector.extract_strided_slice %20 {offsets = [0, 1, 1], sizes = [8, 16, 16], strides = [1, 1, 1]} : vector<8x18x18xbf16> to vector<8x16x16xbf16>
    %30 = vector.shape_cast %29 : vector<8x16x16xbf16> to vector<8x256xbf16>
    %31 = vector.extract_strided_slice %20 {offsets = [0, 1, 2], sizes = [8, 16, 16], strides = [1, 1, 1]} : vector<8x18x18xbf16> to vector<8x16x16xbf16>
    %32 = vector.shape_cast %31 : vector<8x16x16xbf16> to vector<8x256xbf16>
    %33 = vector.extract_strided_slice %20 {offsets = [0, 2, 0], sizes = [8, 16, 16], strides = [1, 1, 1]} : vector<8x18x18xbf16> to vector<8x16x16xbf16>
    %34 = vector.shape_cast %33 : vector<8x16x16xbf16> to vector<8x256xbf16>
    %35 = vector.extract_strided_slice %20 {offsets = [0, 2, 1], sizes = [8, 16, 16], strides = [1, 1, 1]} : vector<8x18x18xbf16> to vector<8x16x16xbf16>
    %36 = vector.shape_cast %35 : vector<8x16x16xbf16> to vector<8x256xbf16>
    %37 = vector.extract_strided_slice %20 {offsets = [0, 2, 2], sizes = [8, 16, 16], strides = [1, 1, 1]} : vector<8x18x18xbf16> to vector<8x16x16xbf16>
    %38 = vector.shape_cast %37 : vector<8x16x16xbf16> to vector<8x256xbf16>
    %39 = tpu.concatenate %22, %24, %26, %28, %30, %32, %34, %36, %38 in 0 : vector<8x256xbf16>, vector<8x256xbf16>, vector<8x256xbf16>, vector<8x256xbf16>, vector<8x256xbf16>, vector<8x256xbf16>, vector<8x256xbf16>, vector<8x256xbf16>, vector<8x256xbf16> -> vector<72x256xbf16>
    %cst_18 = arith.constant dense<0.000000e+00> : vector<8x256xf32>
    %40 = tpu.matmul %15, %39, %cst_18 {dimension_numbers = #tpu.dot_dimension_numbers<[1], [0], [0], [1], [0, 0, 1, 1], [], []>} : vector<8x72xbf16>, vector<72x256xbf16>, vector<8x256xf32> -> vector<8x256xf32>
    %41 = vector.broadcast %16 : vector<8x1xf32> to vector<8x256xf32>
    %42 = arith.addf %40, %41 : vector<8x256xf32>
    %cst_19 = arith.constant 0.000000e+00 : f32
    %43 = vector.broadcast %cst_19 : f32 to vector<8x256xf32>
    %44 = arith.maximumf %42, %43 : vector<8x256xf32>
    %45 = vector.shape_cast %44 : vector<8x256xf32> to vector<8x16x16xf32>
    %46 = arith.truncf %45 : vector<8x16x16xf32> to vector<8x16x16xbf16>
    %c0_20 = arith.constant 0 : index
    %c0_21 = arith.constant 0 : index
    %47 = vector.load %arg7[%c0_20, %c0_21] : memref<8x72xbf16, #tpu.memory_space<vmem>>, vector<8x72xbf16>
    %c0_22 = arith.constant 0 : index
    %c0_23 = arith.constant 0 : index
    %48 = vector.load %arg8[%c0_22, %c0_23] : memref<8x1xf32, #tpu.memory_space<vmem>>, vector<8x1xf32>
    %cst_24 = arith.constant 0.000000e+00 : bf16
    %49 = vector.broadcast %cst_24 : bf16 to vector<8x16x1xbf16>
    %50 = tpu.concatenate %49, %46, %49 in 2 : vector<8x16x1xbf16>, vector<8x16x16xbf16>, vector<8x16x1xbf16> -> vector<8x16x18xbf16>
    %cst_25 = arith.constant 0.000000e+00 : bf16
    %51 = vector.broadcast %cst_25 : bf16 to vector<8x1x18xbf16>
    %52 = tpu.concatenate %51, %50, %51 in 1 : vector<8x1x18xbf16>, vector<8x16x18xbf16>, vector<8x1x18xbf16> -> vector<8x18x18xbf16>
    %53 = vector.extract_strided_slice %52 {offsets = [0, 0, 0], sizes = [8, 16, 16], strides = [1, 1, 1]} : vector<8x18x18xbf16> to vector<8x16x16xbf16>
    %54 = vector.shape_cast %53 : vector<8x16x16xbf16> to vector<8x256xbf16>
    %55 = vector.extract_strided_slice %52 {offsets = [0, 0, 1], sizes = [8, 16, 16], strides = [1, 1, 1]} : vector<8x18x18xbf16> to vector<8x16x16xbf16>
    %56 = vector.shape_cast %55 : vector<8x16x16xbf16> to vector<8x256xbf16>
    %57 = vector.extract_strided_slice %52 {offsets = [0, 0, 2], sizes = [8, 16, 16], strides = [1, 1, 1]} : vector<8x18x18xbf16> to vector<8x16x16xbf16>
    %58 = vector.shape_cast %57 : vector<8x16x16xbf16> to vector<8x256xbf16>
    %59 = vector.extract_strided_slice %52 {offsets = [0, 1, 0], sizes = [8, 16, 16], strides = [1, 1, 1]} : vector<8x18x18xbf16> to vector<8x16x16xbf16>
    %60 = vector.shape_cast %59 : vector<8x16x16xbf16> to vector<8x256xbf16>
    %61 = vector.extract_strided_slice %52 {offsets = [0, 1, 1], sizes = [8, 16, 16], strides = [1, 1, 1]} : vector<8x18x18xbf16> to vector<8x16x16xbf16>
    %62 = vector.shape_cast %61 : vector<8x16x16xbf16> to vector<8x256xbf16>
    %63 = vector.extract_strided_slice %52 {offsets = [0, 1, 2], sizes = [8, 16, 16], strides = [1, 1, 1]} : vector<8x18x18xbf16> to vector<8x16x16xbf16>
    %64 = vector.shape_cast %63 : vector<8x16x16xbf16> to vector<8x256xbf16>
    %65 = vector.extract_strided_slice %52 {offsets = [0, 2, 0], sizes = [8, 16, 16], strides = [1, 1, 1]} : vector<8x18x18xbf16> to vector<8x16x16xbf16>
    %66 = vector.shape_cast %65 : vector<8x16x16xbf16> to vector<8x256xbf16>
    %67 = vector.extract_strided_slice %52 {offsets = [0, 2, 1], sizes = [8, 16, 16], strides = [1, 1, 1]} : vector<8x18x18xbf16> to vector<8x16x16xbf16>
    %68 = vector.shape_cast %67 : vector<8x16x16xbf16> to vector<8x256xbf16>
    %69 = vector.extract_strided_slice %52 {offsets = [0, 2, 2], sizes = [8, 16, 16], strides = [1, 1, 1]} : vector<8x18x18xbf16> to vector<8x16x16xbf16>
    %70 = vector.shape_cast %69 : vector<8x16x16xbf16> to vector<8x256xbf16>
    %71 = tpu.concatenate %54, %56, %58, %60, %62, %64, %66, %68, %70 in 0 : vector<8x256xbf16>, vector<8x256xbf16>, vector<8x256xbf16>, vector<8x256xbf16>, vector<8x256xbf16>, vector<8x256xbf16>, vector<8x256xbf16>, vector<8x256xbf16>, vector<8x256xbf16> -> vector<72x256xbf16>
    %cst_26 = arith.constant dense<0.000000e+00> : vector<8x256xf32>
    %72 = tpu.matmul %47, %71, %cst_26 {dimension_numbers = #tpu.dot_dimension_numbers<[1], [0], [0], [1], [0, 0, 1, 1], [], []>} : vector<8x72xbf16>, vector<72x256xbf16>, vector<8x256xf32> -> vector<8x256xf32>
    %73 = vector.broadcast %48 : vector<8x1xf32> to vector<8x256xf32>
    %74 = arith.addf %72, %73 : vector<8x256xf32>
    %cst_27 = arith.constant 0.000000e+00 : f32
    %75 = vector.broadcast %cst_27 : f32 to vector<8x256xf32>
    %76 = arith.maximumf %74, %75 : vector<8x256xf32>
    %c0_28 = arith.constant 0 : index
    %c0_29 = arith.constant 0 : index
    %c0_30 = arith.constant 0 : index
    %77 = vector.load %arg9[%c0_28, %c0_29, %c0_30] : memref<1x8x256xf32, #tpu.memory_space<vmem>>, vector<1x8x256xf32>
    %78 = vector.shape_cast %77 : vector<1x8x256xf32> to vector<8x256xf32>
    %79 = vector.shape_cast %76 : vector<8x256xf32> to vector<1x8x256xf32>
    tpu.vector_store %arg9[%c0_28, %c0_29, %c0_30], %79 {strides = array<i32>} : memref<1x8x256xf32, #tpu.memory_space<vmem>>, vector<1x8x256xf32>,
    return
  }
  func.func @transform_0(%arg0: i32) -> (i32, i32, i32, i32) {
    %c0_i32 = arith.constant 0 : i32
    %c0_i32_0 = arith.constant 0 : i32
    %c0_i32_1 = arith.constant 0 : i32
    %c0_i32_2 = arith.constant 0 : i32
    return %arg0, %c0_i32, %c0_i32_0, %c0_i32_1 : i32, i32, i32, i32
  }
  func.func @transform_1(%arg0: i32) -> (i32, i32, i32, i32) {
    %c0_i32 = arith.constant 0 : i32
    %c0_i32_0 = arith.constant 0 : i32
    %c0_i32_1 = arith.constant 0 : i32
    %c0_i32_2 = arith.constant 0 : i32
    return %arg0, %c0_i32, %c0_i32_0, %c0_i32_1 : i32, i32, i32, i32
  }
  func.func @transform_2(%arg0: i32) -> (i32, i32) {
    %c0_i32 = arith.constant 0 : i32
    %c0_i32_0 = arith.constant 0 : i32
    %c0_i32_1 = arith.constant 0 : i32
    return %c0_i32, %c0_i32_0 : i32, i32
  }
  func.func @transform_3(%arg0: i32) -> (i32, i32) {
    %c0_i32 = arith.constant 0 : i32
    %c0_i32_0 = arith.constant 0 : i32
    %c0_i32_1 = arith.constant 0 : i32
    return %c0_i32, %c0_i32_0 : i32, i32
  }
  func.func @transform_4(%arg0: i32) -> (i32, i32) {
    %c0_i32 = arith.constant 0 : i32
    %c0_i32_0 = arith.constant 0 : i32
    %c0_i32_1 = arith.constant 0 : i32
    return %c0_i32, %c0_i32_0 : i32, i32
  }
  func.func @transform_5(%arg0: i32) -> (i32, i32) {
    %c0_i32 = arith.constant 0 : i32
    %c0_i32_0 = arith.constant 0 : i32
    %c0_i32_1 = arith.constant 0 : i32
    return %c0_i32, %c0_i32_0 : i32, i32
  }
  func.func @transform_6(%arg0: i32) -> (i32, i32) {
    %c0_i32 = arith.constant 0 : i32
    %c0_i32_0 = arith.constant 0 : i32
    %c0_i32_1 = arith.constant 0 : i32
    return %c0_i32, %c0_i32_0 : i32, i32
  }
  func.func @transform_7(%arg0: i32) -> (i32, i32) {
    %c0_i32 = arith.constant 0 : i32
    %c0_i32_0 = arith.constant 0 : i32
    %c0_i32_1 = arith.constant 0 : i32
    return %c0_i32, %c0_i32_0 : i32, i32
  }
  func.func @transform_8(%arg0: i32) -> (i32, i32, i32) {
    %c0_i32 = arith.constant 0 : i32
    %c0_i32_0 = arith.constant 0 : i32
    %c0_i32_1 = arith.constant 0 : i32
    return %arg0, %c0_i32, %c0_i32_0 : i32, i32, i32
  }
}

</mosaic_0001>

<bundles_post_ra>
// kernel: unet_up_forward.1
= control target key start
LH: loop header
LB: loop body
LE: loop exit
PB: predicated region body
PF: predicated region fallthrough
CT: control target
= control target key end

     0   :  { %s6531_s27 = smov 0   ;;  %s10146_s0 = inlined_call_operand.vmem [shape: f32[2,4,16,16], index: 0, kind: input, shape index: {}]   ;;  %s10147_s1 = inlined_call_operand.vmem [shape: f32[2,4,8,8], index: 1, kind: input, shape index: {}]   ;;  %s10148_s2 = inlined_call_operand.vmem [shape: f32[16,8], index: 2, kind: input, shape index: {}]   ;;  %s10149_s3 = inlined_call_operand.vmem [shape: f32[8,16], index: 3, kind: input, shape index: {}]   ;;  %s10150_s4 = inlined_call_operand.vmem [shape: bf16[8,72], index: 4, kind: input, shape index: {}]   ;;  %s10151_s5 = inlined_call_operand.vmem [shape: f32[8,1], index: 5, kind: input, shape index: {}]   ;;  %s10152_s6 = inlined_call_operand.vmem [shape: bf16[8,72], index: 6, kind: input, shape index: {}]   ;;  %s10153_s7 = inlined_call_operand.vmem [shape: f32[8,1], index: 7, kind: input, shape index: {}]   ;;  %s10154_s8 = inlined_call_operand.vmem [shape: f32[2,8,256], index: 8, kind: output, shape index: {}]  }
   0x1 LB: > { %s6366_s28 = sadd.s32 4294967295, %s6471_s27   ;;  %p6370_p0 = scmp.ge.s32.totalorder %s6471_s27, 1  ;;  %s6471_s27 = sphi %s6531_s27, %s18_s27  }
   0x2   : > { %p272_p1 = scmp.lt.s32.totalorder %s6471_s27, 3 }
   0x4   : > { %p273_p2 = pnand %p6370_p0, %p272_p1 }
   0x6   : > { %276 = sbr.rel (%p273_p2) target bundleno = 2188 (0x88c), region = 52 }
   0xd   : > { %v331_v0 = vld [vmem:[%s10149_s3] sm:$0xff]  ;;  %p311_p3 = scmp.lt.s32.totalorder %s6366_s28, 1  ;;  %vm332_vm0 = vcmask 64512   ;;  %s6473_s19 = smov 1   ;;  %vm780_vm1 = vcmask 7168   ;;  %vm798_vm2 = vcmask 138240  }
   0xe   : > { %6415 = vmatprep.subr.mxu0 %v331_v0  ;;  %v6559_v5 = vld [vmem:[%s10148_s2] sm:$0xff]  ;;  %vm871_vm3 = vcmask 1040384   ;;  %vm872_vm4 = vsmask.f32 256  ;;  %v10194_v27 = vmov 0  ;;  %v6584_v39 = vld [vmem:[%s10148_s2 + $0x8] sm:$0xff] }
   0xf   : > { %6416 = vmatpush3.msra.mxu0 %v331_v0  ;;  %s10369_s28 = smov (!%p311_p3, %s6366_s28), 1  ;;  %6425 = vmatprep.mubr.msk.f32.mxu1 %vm332_vm0, %v6559_v5  ;;  %vm6572_vm5 = vmand %vm871_vm3, %vm872_vm4  ;;  %s6474_s22 = smov 127   ;;  %vm2498_vm6 = vcmask 1046528   ;;  %vm1657_vm7 = vsmask.f32 7424  ;;  %vm1100_vm8 = vcmask 130048  }
  0x10   : > { %s6396_s9 = sshll.u32 %s10369_s28, 5  ;;  %s6395_s13 = sshll.u32 %s10369_s28, 6  ;;  %v10195_v27 = vsel %vm6572_vm5, 4294967295, %v10194_v27  ;;  %vm1104_vm9 = vcmask 261120   ;;  %vm1107_vm10 = vcmask 392192   ;;  %vm1110_vm11 = vcmask 523264  }
  0x11   : > { %s320_s12 = scalar_lea.vmem %s10147_s1, %s6396_s9  ;;  %s315_s16 = scalar_lea.vmem %s10146_s0, %s6395_s13  ;;  %10196 = vst [vmem:[#allocation2_spill] sm:$0xff] %v10195_v27  ;;  %vm1113_vm12 = vcmask 654336   ;;  %vm1116_vm13 = vcmask 785408   ;;  %vm1119_vm14 = vcmask 916480   ;;  %vm3291_vm15 = vcmask 1043456  }
  0x12   : > { %v327_v1 = vld [vmem:[%s320_s12] sm:$0xff]  ;;  %v328_v2 = vld [vmem:[%s320_s12 + $0x8] sm:$0xff]  ;;  %v329_v3 = vld [vmem:[%s320_s12 + $0x10] sm:$0xff]  ;;  %s6475_s23 = smov 126   ;;  %s6479_s24 = smov 64  }
  0x13   : > { %6417 = vmatprep.mubr.msk.f32.mxu0 %vm332_vm0, %v327_v1  ;;  %v330_v4 = vld [vmem:[%s320_s12 + $0x18] sm:$0xff]  ;;  %v738_v6 = vld [vmem:[%s315_s16] sm:$0xff]  ;;  %v739_v7 = vld [vmem:[%s315_s16 + $0x8] sm:$0xff]  ;;  %s6480_s25 = smov 16   ;;  %s6481_s26 = smov 32  }
  0x14   : > { %6418 = vmatmul.mubr.msk.f32.vlgmr.msra.gmra.mrb[0].mxu0 %vm332_vm0, %v328_v2  ;;  %v746_v8 = vpack.c.bf16 %v739_v7, %v738_v6  ;;  %v742_v9 = vld [vmem:[%s315_s16 + $0x20] sm:$0xff]  ;;  %v743_v10 = vld [vmem:[%s315_s16 + $0x28] sm:$0xff]  ;;  %v740_v11 = vld [vmem:[%s315_s16 + $0x10] sm:$0xff]  ;;  %s6482_s29 = smov 80   ;;  %s6483_s30 = smov 96  }
  0x15   : > { %6420 = vmatprep.mubr.msk.f32.mxu0 %vm332_vm0, %v329_v3  ;;  %v748_v12 = vpack.c.bf16 %v743_v10, %v742_v9  ;;  %v741_v13 = vld [vmem:[%s315_s16 + $0x18] sm:$0xff]  ;;  %v744_v15 = vld [vmem:[%s315_s16 + $0x30] sm:$0xff]  ;;  %s6484_s9 = smov 112   ;;  %s6485_s10 = smov 48  }
  0x16   : > { %764 = vrot.lane.b32.xlu0 %v746_v8, %s6473_s19  ;;  %v747_v14 = vpack.c.bf16 %v741_v13, %v740_v11  ;;  %v745_v16 = vld [vmem:[%s315_s16 + $0x38] sm:$0xff] }
  0x17   : > { %768 = vrot.lane.b32.xlu1 %v748_v12, %s6473_s19  ;;  %v749_v17 = vpack.c.bf16 %v745_v16, %v744_v15 }
  0x18   : > { %6421 = vmatmul.mubr.msk.f32.gmra.mrb[2].mxu0 %vm332_vm0, %v330_v4 }
  0x19   : > { %6435 = vmatprep.mubr.msk.f32.mxu0 %vm332_vm0, %v6559_v5 }
  0x1a   : > { %766 = vrot.lane.b32.xlu0 %v747_v14, %s6473_s19 }
  0x1b   : > { %770 = vrot.lane.b32.xlu1 %v749_v17, %s6473_s19 }
  0x88   : > { %v765_v18 = vpop.permute.xlu0 %764 }
  0x89   : > { %v783_v19 = vsel %vm780_vm1, 0, %v765_v18  ;;  %v769_v23 = vpop.permute.xlu1 %768 }
  0x8a   : > { %v799_v20 = vsel %vm798_vm2, %v783_v19, 0  ;;  %v787_v25 = vsel %vm780_vm1, 0, %v769_v23 }
  0x8b   : > { %v807_v21 = vshrl.u32 %v799_v20, 16  ;;  %v810_v22 = vshll.u32 %v799_v20, 16  ;;  %v801_v28 = vsel %vm798_vm2, %v787_v25, 0 }
  0x8c   : > { %v767_v26 = vpop.permute.xlu0 %766  ;;  %v819_v32 = vshrl.u32 %v801_v28, 16  ;;  %v822_v33 = vshll.u32 %v801_v28, 16 }
  0x8d   : > { %v809_v24 = vrot.slane %v807_v21, 7  ;;  %v785_v29 = vsel %vm780_vm1, 0, %v767_v26  ;;  %v771_v37 = vpop.permute.xlu1 %770 }
  0x8e   : > { %v800_v36 = vsel %vm798_vm2, %v785_v29, 0  ;;  %v821_v41 = vrot.slane %v819_v32, 7  ;;  %v789_v45 = vsel %vm780_vm1, 0, %v771_v37 }
  0x8f   : > { %v812_v30 = vor.u32 %v810_v22, %v809_v24  ;;  %v882_v31 = vsel %vm6572_vm5, %v809_v24, 0  ;;  %v813_v42 = vshrl.u32 %v800_v36, 16  ;;  %v816_v43 = vshll.u32 %v800_v36, 16 }
  0x90   : > { %v1664_v35 = vshll.u32 %v882_v31, 16  ;;  %v2500_v44 = vrot.slane %v882_v31, 1  ;;  %v824_v47 = vor.u32 %v822_v33, %v821_v41  ;;  %v6596_v48 = vsel %vm6572_vm5, %v821_v41, 0 }
  0x91   : > { %v6588_v40 = vsel %vm6572_vm5, 0, %v812_v30  ;;  %v815_v49 = vrot.slane %v813_v42, 7  ;;  %v802_v50 = vsel %vm798_vm2, %v789_v45, 0  ;;  %v2506_v57 = vrot.slane %v6596_v48, 1 }
  0x92   : > { %1145 = vrot.lane.b32.xlu0 %v6588_v40, %s6474_s22  ;;  %v2499_v46 = vrot.slane %v6588_v40, 1  ;;  %v6601_v52 = vrot.slane %v1664_v35, 1  ;;  %v825_v53 = vshrl.u32 %v802_v50, 16  ;;  %v828_v54 = vshll.u32 %v802_v50, 16 }
  0x93   : > { %v6607_v56 = vsel %vm6572_vm5, 0, %v824_v47  ;;  %v818_v58 = vor.u32 %v816_v43, %v815_v49  ;;  %v883_v59 = vsel %vm6572_vm5, %v815_v49, 0  ;;  %v1684_v60 = vshll.u32 %v6596_v48, 16 }
  0x94   : > { %v2503_v61 = vrot.slane %v883_v59, 1  ;;  %v827_v62 = vrot.slane %v825_v53, 7  ;;  %v894_v63 = vshrl.u32 %v6588_v40, 16  ;;  %v6621_v1 = vsel %vm2498_vm6, %v2499_v46, %v2500_v44 }
  0x95   : > { %v6616_v0 = vsel %vm6572_vm5, 0, %v818_v58  ;;  %v2505_v2 = vrot.slane %v6607_v56, 1  ;;  %v1659_v3 = vshll.u32 %v6588_v40, 16  ;;  %v1674_v4 = vshll.u32 %v883_v59, 16 }
  0x96   : > { %1149 = vrot.lane.b32.xlu0 %v6607_v56, %s6474_s22  ;;  %v830_v6 = vor.u32 %v828_v54, %v827_v62  ;;  %v885_v7 = vsel %vm6572_vm5, %v827_v62, 0  ;;  %v2502_v8 = vrot.slane %v6616_v0, 1  ;;  %v2527_v10 = vshrl.u32 %v6621_v1, 16  ;;  %1147 = vrot.lane.b32.xlu1 %v6616_v0, %s6474_s22 }
  0x97   : > { %v2509_v9 = vrot.slane %v885_v7, 1  ;;  %v2507_v11 = vsel %vm2498_vm6, %v2505_v2, %v2506_v57  ;;  %v1661_v12 = vrot.slane %v1659_v3, 1  ;;  %v1694_v14 = vshll.u32 %v885_v7, 16 }
  0x98   : > { %v6638_v13 = vsel %vm6572_vm5, 0, %v830_v6  ;;  %v2504_v15 = vsel %vm2498_vm6, %v2502_v8, %v2503_v61  ;;  %v2535_v16 = vshrl.u32 %v2507_v11, 16  ;;  %v895_v19 = vshrl.u32 %v6616_v0, 16 }
  0x99   : > { %v2528_v17 = vshrl.u32 %v2504_v15, 16  ;;  %v2508_v18 = vrot.slane %v6638_v13, 1  ;;  %v1662_v20 = vor.u32 %v1661_v12, %v894_v63  ;;  %v1669_v21 = vshll.u32 %v6616_v0, 16 }
  0x9a   : > { %1401 = vrot.lane.b32.xlu0 %v6588_v40, %s6475_s23  ;;  %v902_v22 = vshrl.u32 %v6607_v56, 16  ;;  %v1679_v23 = vshll.u32 %v6607_v56, 16  ;;  %v903_v26 = vshrl.u32 %v6638_v13, 16  ;;  %v1689_v28 = vshll.u32 %v6638_v13, 16  ;;  %1151 = vrot.lane.b32.xlu1 %v6638_v13, %s6474_s22 }
  0x9b   : > { %v6657_v24 = vpack.i.b16 %v2528_v17, %v2527_v10  ;;  %v2510_v25 = vsel %vm2498_vm6, %v2508_v18, %v2509_v9  ;;  %v1676_v29 = vrot.slane %v1674_v4, 1  ;;  %v1671_v32 = vrot.slane %v1669_v21, 1 }
  0x9c   : > { %v6664_v30 = vpack.i.b16 %v2510_v25, %v2507_v11  ;;  %v2536_v31 = vshrl.u32 %v2510_v25, 16  ;;  %v1686_v33 = vrot.slane %v1684_v60, 1  ;;  %v1681_v35 = vrot.slane %v1679_v23, 1 }
  0x9d   : > { %v1691_v36 = vrot.slane %v1689_v28, 1  ;;  %v6705_v54 = vpack.i.b16 %v6616_v0, %v6588_v40  ;;  %v6715_v57 = vpack.i.b16 %v895_v19, %v894_v63  ;;  %v6717_v58 = vpack.i.b16 %v903_v26, %v902_v22 }
  0x9e   : > { %1405 = vrot.lane.b32.xlu0 %v6607_v56, %s6475_s23  ;;  %v6668_v37 = vpack.i.b16 %v2536_v31, %v2535_v16  ;;  %v1682_v42 = vor.u32 %v1681_v35, %v902_v22  ;;  %1403 = vrot.lane.b32.xlu1 %v6616_v0, %s6475_s23  ;;  %v10155_v6 = vmov 0  }
  0x9f   : > { %v1692_v43 = vor.u32 %v1691_v36, %v903_v26  ;;  %6464 = vset.pattern.permute.xlu0 %v10155_v6 }
  0xa0   : > { %v1687_v47 = vsel %vm1657_vm7, %v1682_v42, %v1686_v33 }
  0xa1   : > { %v1750_v49 = vshrl.u32 %v1687_v47, 16 }
  0xa2   : > { %2763 = vrot.lane.b32.xlu0 %v6621_v1, %s6474_s22  ;;  %1407 = vrot.lane.b32.xlu1 %v6638_v13, %s6475_s23 }
  0xa6   : > { %2767 = vrot.lane.b32.xlu0 %v2507_v11, %s6474_s22  ;;  %2765 = vrot.lane.b32.xlu1 %v2504_v15, %s6474_s22 }
  0xaa   : > { %3019 = vrot.lane.b32.xlu0 %v6621_v1, %s6475_s23  ;;  %2769 = vrot.lane.b32.xlu1 %v2510_v25, %s6474_s22 }
  0xae   : > { %3023 = vrot.lane.b32.xlu0 %v2507_v11, %s6475_s23  ;;  %3021 = vrot.lane.b32.xlu1 %v2504_v15, %s6475_s23 }
  0xb2   : > { %3025 = vrot.lane.b32.xlu1 %v2510_v25, %s6475_s23 }
  0xe7   : > { %v6419_v34 = vpop.f32.mrb[0].mxu0 }
  0xe8   : > { %v411_v38 = vpop.f32.mrb[1].mxu0 }
  0xe9   : > { %6423 = vmatprep.subr.mxu1 %v411_v38 }
  0xea   : > { %6424 = vmatpush3.msra.mxu1 %v411_v38  ;;  %v1667_v38 = vsel %vm1657_vm7, %v1662_v20, %v6601_v52 }
  0xeb   : > { %6426 = vmatmul.mubr.msk.f32.vlgmr.msra.gmra.mrb[0].mxu1 %vm332_vm0, %v6584_v39  ;;  %6428 = vmatprep.subr.mxu1 %v6419_v34  ;;  %v6422_v51 = vpop.f32.mrb[2].mxu0  ;;  %v1742_v41 = vshrl.u32 %v1667_v38, 16 }
  0xec   : > { %6429 = vmatpush3.msra.mxu1 %v6419_v34  ;;  %6430 = vmatprep.mubr.msk.f32.mxu1 %vm332_vm0, %v6559_v5  ;;  %v421_v55 = vpop.f32.mrb[3].mxu0  ;;  %v1696_v34 = vrot.slane %v1694_v14, 1 }
  0xed   : > { %6433 = vmatprep.subr.mxu0 %v421_v55  ;;  %6438 = vmatprep.subr.mxu1 %v6422_v51 }
  0xee   : > { %6434 = vmatpush3.msra.mxu0 %v421_v55  ;;  %v1697_v48 = vsel %vm1657_vm7, %v1692_v43, %v1696_v34  ;;  %2234 = vrot.lane.b32.xlu0 %v1667_v38, %s6475_s23  ;;  %v6710_v55 = vpack.i.b16 %v6638_v13, %v6607_v56 }
  0xef   : > { %6431 = vmatmul.mubr.msk.f32.vlgmr.msra.gmra.mrb[2].mxu1 %vm332_vm0, %v6584_v39  ;;  %6436 = vmatmul.mubr.msk.f32.vlgmr.msra.gmra.mrb[4].mxu0 %vm332_vm0, %v6584_v39  ;;  %v6681_v50 = vpack.i.b16 %v1697_v48, %v1687_v47 }
  0xf0   : > { %6439 = vmatpush3.msra.mxu1 %v6422_v51  ;;  %6440 = vmatprep.mubr.msk.f32.mxu1 %vm332_vm0, %v6559_v5  ;;  %v6646_v5 = vpack.i.b16 %v2504_v15, %v6621_v1  ;;  %v1751_v51 = vshrl.u32 %v1697_v48, 16 }
  0xf1   : > { %3361 = vmatprep.mubr.bf16.mxu0 %v10155_v6 }
  0xf2   : > { %v6687_v53 = vpack.i.b16 %v1751_v51, %v1750_v49  ;;  %2238 = vrot.lane.b32.xlu0 %v1687_v47, %s6475_s23 }
  0xf3   : > { %6441 = vmatmul.mubr.msk.f32.vlgmr.msra.gmra.mrb[4].mxu1 %vm332_vm0, %v6584_v39  ;;  %v1672_v39 = vor.u32 %v1671_v32, %v895_v19  ;;  %vm3321_vm0 = vcmask 588800  }
  0xf4   : > { %6286 = vmatprep.mubr.bf16.mxu1 %v10155_v6 }
  0xf5   : > { %v1677_v44 = vsel %vm1657_vm7, %v1672_v39, %v1676_v29 }
  0xf6   : > { %v6677_v45 = vpack.i.b16 %v1677_v44, %v1667_v38  ;;  %v1743_v46 = vshrl.u32 %v1677_v44, 16  ;;  %2236 = vrot.lane.b32.xlu1 %v1677_v44, %s6475_s23  ;;  %1978 = vrot.lane.b32.xlu0 %v1667_v38, %s6474_s22 }
  0xf8   : > { %v6683_v52 = vpack.i.b16 %v1743_v46, %v1742_v41 }
  0xfa   : > { %2240 = vrot.lane.b32.xlu1 %v1697_v48, %s6475_s23  ;;  %1982 = vrot.lane.b32.xlu0 %v1687_v47, %s6474_s22 }
  0xfe   : > { %1980 = vrot.lane.b32.xlu1 %v1677_v44, %s6474_s22 }
 0x102   : > { %1984 = vrot.lane.b32.xlu1 %v1697_v48, %s6474_s22 }
 0x104   : > { %v6726_v7 = vpop.permute.xlu0 %1145 }
 0x108   : > { %v6728_v8 = vpop.permute.xlu1 %1147  ;;  %v6730_v9 = vpop.permute.xlu0 %1149 }
 0x10c   : > { %v6732_v10 = vpop.permute.xlu1 %1151  ;;  %v6734_v11 = vpop.permute.xlu0 %1401 }
 0x110   : > { %v6736_v12 = vpop.permute.xlu1 %1403  ;;  %v6738_v13 = vpop.permute.xlu0 %1405 }
 0x114   : > { %v6740_v14 = vpop.permute.xlu1 %1407  ;;  %v6742_v15 = vpop.permute.xlu0 %2763 }
 0x118   : > { %v6744_v16 = vpop.permute.xlu1 %2765  ;;  %v6746_v17 = vpop.permute.xlu0 %2767 }
 0x11c   : > { %v6748_v18 = vpop.permute.xlu1 %2769  ;;  %v6750_v19 = vpop.permute.xlu0 %3019 }
 0x120   : > { %v6752_v20 = vpop.permute.xlu1 %3021  ;;  %v6754_v21 = vpop.permute.xlu0 %3023 }
 0x124   : > { %v6756_v22 = vpop.permute.xlu1 %3025 }
 0x160   : > { %v6758_v23 = vpop.permute.xlu0 %2234 }
 0x161   : > { %10197 = vst [vmem:[#allocation3_spill] sm:$0xff] %v6758_v23 }
 0x164   : > { %v6762_v26 = vpop.permute.xlu0 %2238 }
 0x168   : > { %v6760_v25 = vpop.permute.xlu1 %2236  ;;  %v6766_v29 = vpop.permute.xlu0 %1978 }
 0x169   : > { %10198 = vst [vmem:[#allocation4_spill] sm:$0xff] %v6760_v25  ;;  %10200 = vst [vmem:[#allocation6_spill] sm:$0xff] %v6766_v29 }
 0x16c   : > { %v6764_v28 = vpop.permute.xlu1 %2240  ;;  %v6770_v32 = vpop.permute.xlu0 %1982 }
 0x16d   : > { %10199 = vst [vmem:[#allocation5_spill] sm:$0xff] %v6764_v28  ;;  %10202 = vst [vmem:[#allocation8_spill] sm:$0xff] %v6770_v32 }
 0x170   : > { %v6768_v31 = vpop.permute.xlu1 %1980 }
 0x171   : > { %10201 = vst [vmem:[#allocation7_spill] sm:$0xff] %v6768_v31 }
 0x174   : > { %v6772_v33 = vpop.permute.xlu1 %1984 }
 0x175   : > { %10203 = vst [vmem:[#allocation9_spill] sm:$0xff] %v6772_v33 }
 0x1be   : > { %v6427_v59 = vpop.f32.mrb[0].mxu1 }
 0x1bf   : > { %v504_v60 = vpop.f32.mrb[1].mxu1 }
 0x1c0   : > { %v750_v61 = vpack.c.bf16 %v6427_v59, %v504_v60 }
 0x1c2   : > { %v6432_v62 = vpop.f32.mrb[2].mxu1  ;;  %772 = vrot.lane.b32.xlu0 %v750_v61, %s6473_s19  ;;  %v6437_v0 = vpop.f32.mrb[4].mxu0  ;;  %v6477_v61 = vmov 1983009808  }
 0x1c3   : > { %v579_v1 = vpop.f32.mrb[3].mxu1  ;;  %v654_v2 = vpop.f32.mrb[5].mxu0 }
 0x1c4   : > { %v751_v3 = vpack.c.bf16 %v6432_v62, %v579_v1  ;;  %v752_v56 = vpack.c.bf16 %v6437_v0, %v654_v2  ;;  %v925_v62 = vunpack.c.l.s4 %v6477_v61  ;;  %v927_v0 = vlaneseq }
 0x1c6   : > { %v6442_v4 = vpop.f32.mrb[4].mxu1  ;;  %774 = vrot.lane.b32.xlu1 %v751_v3, %s6473_s19  ;;  %776 = vrot.lane.b32.xlu0 %v752_v56, %s6473_s19 }
 0x1c7   : > { %v729_v40 = vpop.f32.mrb[5].mxu1 }
 0x1c8   : > { %v753_v63 = vpack.c.bf16 %v6442_v4, %v729_v40 }
 0x1ca   : > { %778 = vrot.lane.b32.xlu1 %v753_v63, %s6473_s19 }
 0x234   : > { %v773_v34 = vpop.permute.xlu0 %772 }
 0x235   : > { %v791_v35 = vsel %vm780_vm1, 0, %v773_v34 }
 0x236   : > { %v803_v36 = vsel %vm798_vm2, %v791_v35, 0 }
 0x237   : > { %v831_v38 = vshrl.u32 %v803_v36, 16  ;;  %v834_v43 = vshll.u32 %v803_v36, 16 }
 0x238   : > { %v775_v39 = vpop.permute.xlu1 %774  ;;  %v777_v41 = vpop.permute.xlu0 %776 }
 0x239   : > { %v833_v42 = vrot.slane %v831_v38, 7  ;;  %v793_v44 = vsel %vm780_vm1, 0, %v775_v39  ;;  %v795_v46 = vsel %vm780_vm1, 0, %v777_v41  ;;  %v926_v39 = vunpack.c.0.s8 %v925_v62 }
 0x23a   : > { %v804_v47 = vsel %vm798_vm2, %v793_v44, 0  ;;  %v805_v48 = vsel %vm798_vm2, %v795_v46, 0  ;;  %v6790_v41 = vshrl.u32 %v927_v0, 7 }
 0x23b   : > { %v836_v49 = vor.u32 %v834_v43, %v833_v42  ;;  %v837_v51 = vshrl.u32 %v804_v47, 16  ;;  %v843_v60 = vshrl.u32 %v805_v48, 16  ;;  %v840_v3 = vshll.u32 %v804_v47, 16 }
 0x23c   : > { %v779_v59 = vpop.permute.xlu1 %778  ;;  %v846_v63 = vshll.u32 %v805_v48, 16  ;;  %v886_v34 = vsel %vm6572_vm5, %v833_v42, 0 }
 0x23d   : > { %v6782_v1 = vsel %vm6572_vm5, 0, %v836_v49  ;;  %v839_v2 = vrot.slane %v837_v51, 7  ;;  %v797_v56 = vsel %vm780_vm1, 0, %v779_v59  ;;  %v845_v40 = vrot.slane %v843_v60, 7 }
 0x23e   : > { %v806_v4 = vsel %vm798_vm2, %v797_v56, 0  ;;  %1153 = vrot.lane.b32.xlu0 %v6782_v1, %s6474_s22  ;;  %v2511_v47 = vrot.slane %v6782_v1, 1  ;;  %v1704_v48 = vshll.u32 %v886_v34, 16  ;;  %v2512_v42 = vrot.slane %v886_v34, 1 }
 0x23f   : > { %v842_v35 = vor.u32 %v840_v3, %v839_v2  ;;  %v849_v36 = vshrl.u32 %v806_v4, 16  ;;  %v852_v38 = vshll.u32 %v806_v4, 16  ;;  %v887_v44 = vsel %vm6572_vm5, %v839_v2, 0 }
 0x240   : > { %v848_v49 = vor.u32 %v846_v63, %v845_v40  ;;  %v1714_v59 = vshll.u32 %v887_v44, 16  ;;  %v6804_v60 = vsub.s32 %v926_v39, %v6790_v41  ;;  %v888_v61 = vsel %vm6572_vm5, %v845_v40, 0 }
 0x241   : > { %v6794_v43 = vsel %vm6572_vm5, 0, %v842_v35  ;;  %v851_v46 = vrot.slane %v849_v36, 7  ;;  %v6809_v62 = vsel %vm2498_vm6, %v2511_v47, %v2512_v42  ;;  %v1699_v2 = vshll.u32 %v6782_v1, 16 }
 0x242   : > { %1155 = vrot.lane.b32.xlu1 %v6794_v43, %s6474_s22  ;;  %1409 = vrot.lane.b32.xlu0 %v6782_v1, %s6475_s23  ;;  %v2514_v0 = vrot.slane %v6794_v43, 1  ;;  %v1706_v3 = vrot.slane %v1704_v48, 1  ;;  %v2515_v56 = vrot.slane %v887_v44, 1  ;;  %v880_v4 = vsel %vm6572_vm5, 0, %v848_v49 }
 0x243   : > { %v854_v51 = vor.u32 %v852_v38, %v851_v46  ;;  %v1709_v40 = vshll.u32 %v6794_v43, 16  ;;  %v889_v34 = vsel %vm6572_vm5, %v851_v46, 0  ;;  %v910_v35 = vshrl.u32 %v6782_v1, 16 }
 0x244   : > { %v1701_v36 = vrot.slane %v1699_v2, 1  ;;  %v1724_v38 = vshll.u32 %v888_v61, 16  ;;  %v2518_v39 = vrot.slane %v888_v61, 1  ;;  %v911_v44 = vshrl.u32 %v6794_v43, 16 }
 0x245   : > { %v6822_v63 = vsel %vm6572_vm5, 0, %v854_v51  ;;  %v1711_v47 = vrot.slane %v1709_v40, 1  ;;  %v1716_v48 = vrot.slane %v1714_v59, 1  ;;  %v6829_v49 = vsel %vm2498_vm6, %v2514_v0, %v2515_v56 }
 0x246   : > { %1411 = vrot.lane.b32.xlu1 %v6794_v43, %s6475_s23  ;;  %2771 = vrot.lane.b32.xlu0 %v6809_v62, %s6474_s22  ;;  %v1702_v42 = vor.u32 %v1701_v36, %v910_v35  ;;  %v1719_v6 = vshll.u32 %v880_v4, 16  ;;  %v1734_v31 = vshll.u32 %v889_v34, 16  ;;  %v2521_v51 = vrot.slane %v889_v34, 1 }
 0x247   : > { %v1712_v46 = vor.u32 %v1711_v47, %v911_v44  ;;  %v1729_v61 = vshll.u32 %v6822_v63, 16  ;;  %v2517_v59 = vrot.slane %v880_v4, 1  ;;  %v908_v0 = vpack.i.b16 %v6794_v43, %v6782_v1 }
 0x248   : > { %v6837_v2 = vsel %vm1657_vm7, %v1702_v42, %v1706_v3  ;;  %v1721_v40 = vrot.slane %v1719_v6, 1  ;;  %v2520_v34 = vrot.slane %v6822_v63, 1  ;;  %v916_v27 = vpack.i.b16 %v6822_v63, %v880_v4 }
 0x249   : > { %v6842_v56 = vsel %vm1657_vm7, %v1712_v46, %v1716_v48  ;;  %v1731_v36 = vrot.slane %v1729_v61, 1  ;;  %v6848_v47 = vpack.i.b16 %v6829_v49, %v6809_v62  ;;  %v1758_v3 = vshrl.u32 %v6837_v2, 16 }
 0x24a   : > { %2773 = vrot.lane.b32.xlu1 %v6829_v49, %s6474_s22  ;;  %3027 = vrot.lane.b32.xlu0 %v6809_v62, %s6475_s23  ;;  %v1759_v42 = vshrl.u32 %v6842_v56, 16  ;;  %v918_v6 = vshrl.u32 %v880_v4, 16  ;;  %v1736_v29 = vrot.slane %v1734_v31, 1  ;;  %v1726_v33 = vrot.slane %v1724_v38, 1 }
 0x24b   : > { %v919_v1 = vshrl.u32 %v6822_v63, 16  ;;  %v6859_v48 = vsel %vm2498_vm6, %v2517_v59, %v2518_v39  ;;  %v923_v61 = vcombine.high %v6705_v54, %v908_v0  ;;  %v6863_v32 = vsel %vm2498_vm6, %v2520_v34, %v2521_v51 }
 0x24c   : > { %v6856_v43 = vpack.i.b16 %v1759_v42, %v1758_v3  ;;  %v1722_v46 = vor.u32 %v1721_v40, %v918_v6  ;;  %v939_v38 = vcombine.high %v6710_v55, %v916_v27  ;;  %v912_v25 = vpack.i.b16 %v911_v44, %v910_v35 }
 0x24d   : > { %v1732_v31 = vor.u32 %v1731_v36, %v919_v1  ;;  %v2543_v23 = vshrl.u32 %v6809_v62, 16  ;;  %v2555_v28 = vcombine.low %v6646_v5, %v6848_v47  ;;  %v2556_v3 = vcombine.high %v6646_v5, %v6848_v47 }
 0x24e   : > { %3029 = vrot.lane.b32.xlu1 %v6829_v49, %s6475_s23  ;;  %1157 = vrot.lane.b32.xlu0 %v880_v4, %s6474_s22  ;;  %v6872_v39 = vrot.slane %v923_v61, %v6804_v60  ;;  %v2544_v59 = vshrl.u32 %v6829_v49, 16  ;;  %v6879_v35 = vrot.slane %v939_v38, %v6804_v60  ;;  %v920_v62 = vpack.i.b16 %v919_v1, %v918_v6 }
 0x24f   : > { %v990_v44 = vcombine.low %v6715_v57, %v912_v25  ;;  %v2551_v51 = vshrl.u32 %v6859_v48, 16  ;;  %v2549_v5 = vpack.i.b16 %v6863_v32, %v6859_v48  ;;  %v6886_v40 = vsel %vm1657_vm7, %v1722_v46, %v1726_v33 }
 0x250   : > { %v922_v49 = vcombine.low %v6705_v54, %v908_v0  ;;  %v6890_v34 = vsel %vm1657_vm7, %v1732_v31, %v1736_v29  ;;  %v1006_v36 = vcombine.low %v6717_v58, %v920_v62  ;;  %v938_v47 = vcombine.low %v6710_v55, %v916_v27 }
 0x251   : > { %v6897_v42 = vrot.slane %v990_v44, %v6804_v60  ;;  %v991_v6 = vcombine.high %v6715_v57, %v912_v25  ;;  %v1007_v33 = vcombine.high %v6717_v58, %v920_v62  ;;  %v2552_v29 = vshrl.u32 %v6863_v32, 16 }
 0x252   : > { %1159 = vrot.lane.b32.xlu1 %v6822_v63, %s6474_s22  ;;  %1413 = vrot.lane.b32.xlu0 %v880_v4, %s6475_s23  ;;  %v971_v4 = vcombine.high %v6872_v39, %v6879_v35  ;;  %v6909_v27 = vrot.slane %v1006_v36, %v6804_v60  ;;  %v6912_v55 = vrot.slane %v922_v49, %v6804_v60 }
 0x253   : > { %v6915_v57 = vrot.slane %v938_v47, %v6804_v60  ;;  %v1756_v58 = vpack.i.b16 %v6842_v56, %v6837_v2  ;;  %v2571_v25 = vcombine.low %v6664_v30, %v2549_v5  ;;  %v6924_v0 = vrot.slane %v1007_v33, %v6804_v60 }
 0x254   : > { %v2572_v1 = vcombine.high %v6664_v30, %v2549_v5  ;;  %v1022_v46 = vcombine.low %v6897_v42, %v6909_v27  ;;  %v1764_v38 = vpack.i.b16 %v6890_v34, %v6886_v40  ;;  %v2545_v5 = vpack.i.b16 %v2544_v59, %v2543_v23 }
 0x255   : > { %v955_v61 = vcombine.high %v6912_v55, %v6915_v57  ;;  %v954_v31 = vcombine.low %v6912_v55, %v6915_v57  ;;  %v2553_v49 = vpack.i.b16 %v2552_v29, %v2551_v51  ;;  %v6946_v36 = vrot.slane %v2555_v28, %v6804_v60 }
 0x256   : > { %1415 = vrot.lane.b32.xlu1 %v6822_v63, %s6475_s23  ;;  %2242 = vrot.lane.b32.xlu0 %v6837_v2, %s6475_s23  ;;  %v6921_v63 = vrot.slane %v991_v6, %v6804_v60  ;;  %v6949_v47 = vrot.slane %v2571_v25, %v6804_v60  ;;  %v6952_v6 = vrot.slane %v2556_v3, %v6804_v60  ;;  %v1766_v28 = vshrl.u32 %v6886_v40, 16 }
 0x257   : > { %v6955_v33 = vrot.slane %v2572_v1, %v6804_v60  ;;  %v1771_v30 = vcombine.high %v6677_v45, %v1756_v58  ;;  %v1787_v44 = vcombine.high %v6681_v50, %v1764_v38  ;;  %v1767_v29 = vshrl.u32 %v6890_v34, 16 }
 0x258   : > { %v1038_v62 = vcombine.low %v6921_v63, %v6924_v0  ;;  %v2624_v25 = vcombine.high %v6657_v24, %v2545_v5  ;;  %v2640_v1 = vcombine.high %v6668_v37, %v2553_v49  ;;  %v2639_v23 = vcombine.low %v6668_v37, %v2553_v49 }
 0x259   : > { %v6982_v59 = vrot.slane %v1771_v30, %v6804_v60  ;;  %v6985_v51 = vrot.slane %v1787_v44, %v6804_v60  ;;  %v1768_v49 = vpack.i.b16 %v1767_v29, %v1766_v28  ;;  %v1839_v28 = vcombine.high %v6683_v52, %v6856_v43 }
 0x25a   : > { %2244 = vrot.lane.b32.xlu1 %v6842_v56, %s6475_s23  ;;  %1986 = vrot.lane.b32.xlu0 %v6837_v2, %s6474_s22  ;;  %v6478_v2 = vmov 1934713408   ;;  %v6976_v54 = vrot.slane %v2624_v25, %v6804_v60  ;;  %v1838_v30 = vcombine.low %v6683_v52, %v6856_v43 }
 0x25b   : > { %v957_v3 = vunpack.c.l.s4 %v6478_v2  ;;  %v6979_v2 = vrot.slane %v2640_v1, %v6804_v60  ;;  %v1819_v25 = vcombine.high %v6982_v59, %v6985_v51  ;;  %v1786_v1 = vcombine.low %v6681_v50, %v1764_v38 }
 0x25c   : > { %v1855_v29 = vcombine.high %v6687_v53, %v1768_v49  ;;  %v1818_v38 = vcombine.low %v6982_v59, %v6985_v51 }
 0x25d   : > { %v2671_v44 = vcombine.low %v6976_v54, %v6979_v2 }
 0x25e   : > { %1988 = vrot.lane.b32.xlu1 %v6842_v56, %s6474_s22  ;;  %2775 = vrot.lane.b32.xlu0 %v6859_v48, %s6474_s22  ;;  %v2623_v56 = vcombine.low %v6657_v24, %v2545_v5  ;;  %v958_v24 = vunpack.c.0.s8 %v957_v3  ;;  %v6995_v5 = vrot.slane %v2639_v23, %v6804_v60  ;;  %v1770_v3 = vcombine.low %v6677_v45, %v1756_v58 }
 0x25f   : > { %v7025_v58 = vrot.slane %v1786_v1, %v6804_v60 }
 0x260   : > { %v6992_v37 = vrot.slane %v2623_v56, %v6804_v60  ;;  %v7019_v45 = vsub.s32 %v958_v24, %v6790_v41  ;;  %v7022_v50 = vrot.slane %v1770_v3, %v6804_v60  ;;  %v1854_v41 = vcombine.low %v6687_v53, %v1768_v49 }
 0x262   : > { %2777 = vrot.lane.b32.xlu1 %v6863_v32, %s6474_s22  ;;  %3031 = vrot.lane.b32.xlu0 %v6859_v48, %s6475_s23  ;;  %v2656_v23 = vcombine.high %v6992_v37, %v6995_v5  ;;  %v2655_v56 = vcombine.low %v6992_v37, %v6995_v5  ;;  %v7030_v48 = vrot.slane %v1839_v28, %v6804_v60 }
 0x263   : > { %v1803_v24 = vcombine.high %v7022_v50, %v7025_v58  ;;  %v1802_v3 = vcombine.low %v7022_v50, %v7025_v58  ;;  %v7049_v28 = vrot.slane %v1838_v30, %v6804_v60  ;;  %v7052_v52 = vrot.slane %v1854_v41, %v6804_v60 }
 0x264   : > { %v985_v43 = vrot.slane %v971_v4, %v7019_v45  ;;  %v1030_v30 = vrot.slane %v1022_v46, %v7019_v45  ;;  %v969_v4 = vrot.slane %v955_v61, %v7019_v45  ;;  %v10205_v46 = vmov 0  }
 0x265   : > { %v1871_v49 = vcombine.high %v7049_v28, %v7052_v52  ;;  %v10206_v61 = vcombine.low %v6872_v39, %v6879_v35  ;;  %v10208_v35 = vcombine.high %v6897_v42, %v6909_v27  ;;  %v10210_v42 = vcombine.high %v6952_v6, %v6955_v33 }
 0x266   : > { %3033 = vrot.lane.b32.xlu1 %v6863_v32, %s6475_s23  ;;  %2246 = vrot.lane.b32.xlu0 %v6886_v40, %s6475_s23  ;;  %v7033_v32 = vrot.slane %v1855_v29, %v6804_v60  ;;  %v7079_v29 = vrot.slane %v954_v31, %v7019_v45  ;;  %v10207_v31 = vcombine.high %v6921_v63, %v6924_v0 }
 0x267   : > { %v7093_v55 = vrot.slane %v10206_v61, %v7019_v45  ;;  %v989_v39 = vcombine.high %v985_v43, %v10205_v46  ;;  %v987_v63 = vcombine.high %v969_v4, %v10205_v46  ;;  %v10209_v0 = vcombine.high %v6946_v36, %v6949_v47 }
 0x268   : > { %v1886_v1 = vcombine.low %v7030_v48, %v7033_v32  ;;  %v1887_v53 = vcombine.high %v7030_v48, %v7033_v32  ;;  %10204 = vst [vmem:[#allocation10_spill] sm:$0xff] %v7079_v29  ;;  %v986_v41 = vcombine.high %v7079_v29, %v10205_v46  ;;  %v2618_v27 = vrot.slane %v10210_v42, %v7019_v45 }
 0x269   : > { %v988_v57 = vcombine.high %v7093_v55, %v10205_v46  ;;  %v2602_v61 = vrot.slane %v10209_v0, %v7019_v45  ;;  %v10215_v5 = vcombine.high %v6976_v54, %v6979_v2  ;;  %v7192_v2 = vrot.slane %v1818_v38, %v7019_v45 }
 0x26a   : > { %2248 = vrot.lane.b32.xlu1 %v6890_v34, %s6475_s23  ;;  %1990 = vrot.lane.b32.xlu0 %v6886_v40, %s6474_s22  ;;  %v1870_v40 = vcombine.low %v7049_v28, %v7052_v52  ;;  %v1894_v54 = vrot.slane %v1886_v1, %v7019_v45  ;;  %v1817_v0 = vrot.slane %v1803_v24, %v7019_v45 }
 0x26b   : > { %v7206_v1 = vrot.slane %v1802_v3, %v7019_v45  ;;  %v1901_v58 = vrot.slane %v1887_v53, %v7019_v45  ;;  %v1885_v42 = vrot.slane %v1871_v49, %v7019_v45 }
 0x26c   : > { %v1878_v50 = vrot.slane %v1870_v40, %v7019_v45  ;;  %v1835_v53 = vcombine.high %v1817_v0, %v10205_v46  ;;  %v1904_v49 = vcombine.high %v1894_v54, %v10205_v46 }
 0x26d   : > { %10216 = vst [vmem:[#allocation13_spill] sm:$0xff] %v7206_v1  ;;  %v1834_v51 = vcombine.high %v7206_v1, %v10205_v46  ;;  %v1905_v40 = vcombine.high %v1901_v58, %v10205_v46 }
 0x26e   : > { %1992 = vrot.lane.b32.xlu1 %v6890_v34, %s6474_s22  ;;  %1089 = vrot.lane.b32.xlu0 %v985_v43, %s6479_s24  ;;  %v1046_v34 = vrot.slane %v1038_v62, %v7019_v45  ;;  %v1053_v62 = vrot.slane %v10207_v31, %v7019_v45  ;;  %v10211_v31 = vcombine.low %v6952_v6, %v6955_v33 }
 0x26f   : > { %v2679_v6 = vrot.slane %v2671_v44, %v7019_v45  ;;  %v2670_v33 = vrot.slane %v2656_v23, %v7019_v45  ;;  %v10213_v44 = vcombine.low %v6946_v36, %v6949_v47  ;;  %v2686_v36 = vrot.slane %v10215_v5, %v7019_v45 }
 0x270   : > { %v1057_v43 = vcombine.high %v1053_v62, %v10205_v46  ;;  %v1174_v5 = vshrl.u32 %v6732_v10, 16 }
 0x271   : > { %v2689_v37 = vcombine.high %v2679_v6, %v10205_v46  ;;  %v2688_v59 = vcombine.high %v2670_v33, %v10205_v46 }
 0x272   : > { %1059 = vrot.lane.b32.xlu0 %v1030_v30, %s6480_s25  ;;  %1068 = vrot.lane.b32.xlu1 %v969_v4, %s6479_s24  ;;  %v1056_v4 = vcombine.high %v1046_v34, %v10205_v46 }
 0x276   : > { %1080 = vrot.lane.b32.xlu1 %v1046_v34, %s6480_s25  ;;  %1062 = vrot.lane.b32.xlu0 %v986_v41, %s6481_s26  ;;  %v1037_v41 = vrot.slane %v10208_v35, %v7019_v45  ;;  %v1833_v34 = vrot.slane %v1819_v25, %v7019_v45  ;;  %v2622_v25 = vcombine.high %v2618_v27, %v10205_v46 }
 0x27a   : > { %1083 = vrot.lane.b32.xlu1 %v988_v57, %s6481_s26  ;;  %1092 = vrot.lane.b32.xlu0 %v1053_v62, %s6482_s29  ;;  %v1055_v57 = vcombine.high %v1037_v41, %v10205_v46  ;;  %v1054_v62 = vcombine.high %v1030_v30, %v10205_v46  ;;  %v2663_v30 = vrot.slane %v2655_v56, %v7019_v45 }
 0x27b   : > { %v2690_v56 = vcombine.high %v2686_v36, %v10205_v46 }
 0x27c   : > { %v2687_v47 = vcombine.high %v2663_v30, %v10205_v46 }
 0x27e   : > { %1095 = vrot.lane.b32.xlu1 %v989_v39, %s6483_s30  ;;  %1071 = vrot.lane.b32.xlu0 %v1037_v41, %s6482_s29  ;;  %v7132_v39 = vrot.slane %v10211_v31, %v7019_v45  ;;  %v7163_v41 = vrot.slane %v10213_v44, %v7019_v45  ;;  %v1902_v31 = vcombine.high %v1878_v50, %v10205_v46  ;;  %v1173_v44 = vshrl.u32 %v6730_v9, 16 }
 0x280   : > { %10212 = vst [vmem:[#allocation11_spill] sm:$0xff] %v7132_v39  ;;  %v2621_v35 = vcombine.high %v7132_v39, %v10205_v46  ;;  %10214 = vst [vmem:[#allocation12_spill] sm:$0xff] %v7163_v41  ;;  %v2619_v23 = vcombine.high %v7163_v41, %v10205_v46  ;;  %v1422_v41 = vshrl.u32 %v6736_v12, 16  ;;  %v1421_v39 = vshrl.u32 %v6734_v11, 16 }
 0x282   : > { %1074 = vrot.lane.b32.xlu1 %v987_v63, %s6483_s30  ;;  %2701 = vrot.lane.b32.xlu0 %v2602_v61, %s6479_s24  ;;  %v2620_v63 = vcombine.high %v2602_v61, %v10205_v46  ;;  %v1836_v61 = vcombine.high %v7192_v2, %v10205_v46 }
 0x286   : > { %2722 = vrot.lane.b32.xlu1 %v2618_v27, %s6479_s24  ;;  %1098 = vrot.lane.b32.xlu0 %v1057_v43, %s6484_s9  ;;  %v1837_v27 = vcombine.high %v1833_v34, %v10205_v46  ;;  %v1903_v43 = vcombine.high %v1885_v42, %v10205_v46 }
 0x28a   : > { %1086 = vrot.lane.b32.xlu1 %v1056_v4, %s6485_s10  ;;  %1077 = vrot.lane.b32.xlu0 %v1055_v57, %s6484_s9 }
 0x28e   : > { %1065 = vrot.lane.b32.xlu1 %v1054_v62, %s6485_s10  ;;  %2716 = vrot.lane.b32.xlu0 %v2621_v35, %s6481_s26  ;;  %v1163_v35 = vpack.i.b16 %v6728_v8, %v6726_v7 }
 0x292   : > { %2713 = vrot.lane.b32.xlu1 %v2679_v6, %s6480_s25  ;;  %2704 = vrot.lane.b32.xlu0 %v2670_v33, %s6482_s29 }
 0x296   : > { %2692 = vrot.lane.b32.xlu1 %v2663_v30, %s6480_s25  ;;  %1937 = vrot.lane.b32.xlu0 %v1833_v34, %s6479_s24  ;;  %v1171_v30 = vpack.i.b16 %v6732_v10, %v6730_v9  ;;  %v1427_v9 = vpack.i.b16 %v6740_v14, %v6738_v13 }
 0x29a   : > { %2695 = vrot.lane.b32.xlu1 %v2619_v23, %s6481_s26  ;;  %2719 = vrot.lane.b32.xlu0 %v2689_v37, %s6485_s10 }
 0x29e   : > { %2725 = vrot.lane.b32.xlu1 %v2686_v36, %s6482_s29  ;;  %2698 = vrot.lane.b32.xlu0 %v2687_v47, %s6485_s10 }
 0x2a2   : > { %2728 = vrot.lane.b32.xlu1 %v2622_v25, %s6483_s30  ;;  %2731 = vrot.lane.b32.xlu0 %v2690_v56, %s6484_s9  ;;  %v1166_v56 = vshrl.u32 %v6728_v8, 16 }
 0x2a6   : > { %2707 = vrot.lane.b32.xlu1 %v2620_v63, %s6483_s30  ;;  %1928 = vrot.lane.b32.xlu0 %v1894_v54, %s6480_s25  ;;  %v1165_v63 = vshrl.u32 %v6726_v7, 16 }
 0x2aa   : > { %1916 = vrot.lane.b32.xlu1 %v1817_v0, %s6479_s24  ;;  %1931 = vrot.lane.b32.xlu0 %v1836_v61, %s6481_s26 }
 0x2ae   : > { %2710 = vrot.lane.b32.xlu1 %v2688_v59, %s6484_s9  ;;  %1910 = vrot.lane.b32.xlu0 %v1834_v51, %s6481_s26 }
 0x2b0   : > { %v1154_v38 = vpop.permute.xlu0 %1153 }
 0x2b1   : > { %v1181_v51 = vshrl.u32 %v1154_v38, 16 }
 0x2b2   : > { %1907 = vrot.lane.b32.xlu1 %v1878_v50, %s6480_s25  ;;  %1940 = vrot.lane.b32.xlu0 %v1901_v58, %s6482_s29 }
 0x2b4   : > { %v1156_v24 = vpop.permute.xlu1 %1155  ;;  %v7225_v3 = vpop.permute.xlu0 %1409 }
 0x2b5   : > { %v1179_v62 = vpack.i.b16 %v1156_v24, %v1154_v38  ;;  %v1182_v36 = vshrl.u32 %v1156_v24, 16  ;;  %v1419_v38 = vpack.i.b16 %v6736_v12, %v6734_v11 }
 0x2b6   : > { %1919 = vrot.lane.b32.xlu1 %v1885_v42, %s6482_s29  ;;  %1943 = vrot.lane.b32.xlu0 %v1837_v27, %s6483_s30  ;;  %v1175_v42 = vpack.i.b16 %v1174_v5, %v1173_v44 }
 0x2b7   : > { %v1194_v23 = vcombine.high %v1163_v35, %v1179_v62  ;;  %v1193_v54 = vcombine.low %v1163_v35, %v1179_v62  ;;  %v1183_v27 = vpack.i.b16 %v1182_v36, %v1181_v51 }
 0x2b8   : > { %v7234_v48 = vpop.permute.xlu1 %1411  ;;  %v7236_v32 = vpop.permute.xlu0 %2771 }
 0x2b9   : > { %v1435_v10 = vpack.i.b16 %v7234_v48, %v7225_v3  ;;  %v7276_v8 = vrot.slane %v1194_v23, %v6804_v60 }
 0x2ba   : > { %1922 = vrot.lane.b32.xlu1 %v1835_v53, %s6483_s30  ;;  %1946 = vrot.lane.b32.xlu0 %v1905_v40, %s6484_s9  ;;  %v7286_v53 = vrot.slane %v1193_v54, %v6804_v60 }
 0x2bb   : > { %v1449_v62 = vcombine.low %v1419_v38, %v1435_v10  ;;  %v1450_v35 = vcombine.high %v1419_v38, %v1435_v10 }
 0x2bc   : > { %v7242_v28 = vpop.permute.xlu1 %2773  ;;  %v7244_v52 = vpop.permute.xlu0 %3027 }
 0x2be   : > { %1934 = vrot.lane.b32.xlu1 %v1904_v49, %s6485_s10  ;;  %1925 = vrot.lane.b32.xlu0 %v1903_v43, %s6484_s9 }
 0x2c0   : > { %v7250_v4 = vpop.permute.xlu1 %3029  ;;  %v1158_v57 = vpop.permute.xlu0 %1157 }
 0x2c1   : > { %v1189_v0 = vshrl.u32 %v1158_v57, 16 }
 0x2c2   : > { %1913 = vrot.lane.b32.xlu1 %v1902_v31, %s6485_s10 }
 0x2c4   : > { %v1160_v6 = vpop.permute.xlu1 %1159  ;;  %v7256_v33 = vpop.permute.xlu0 %1413 }
 0x2c5   : > { %v1187_v34 = vpack.i.b16 %v1160_v6, %v1158_v57  ;;  %v1190_v37 = vshrl.u32 %v1160_v6, 16  ;;  %v1167_v6 = vpack.i.b16 %v1166_v56, %v1165_v63  ;;  %v7310_v56 = vrot.slane %v1449_v62, %v6804_v60 }
 0x2c6   : > { %v7313_v63 = vrot.slane %v1450_v35, %v6804_v60 }
 0x2c7   : > { %v1209_v47 = vcombine.low %v1171_v30, %v1187_v34  ;;  %v1210_v25 = vcombine.high %v1171_v30, %v1187_v34  ;;  %v1191_v7 = vpack.i.b16 %v1190_v37, %v1189_v0  ;;  %v1262_v5 = vcombine.high %v1167_v6, %v1183_v27 }
 0x2c8   : > { %v7264_v61 = vpop.permute.xlu1 %1415  ;;  %v7266_v59 = vpop.permute.xlu0 %2242  ;;  %v1261_v54 = vcombine.low %v1167_v6, %v1183_v27 }
 0x2c9   : > { %v7273_v50 = vrot.slane %v1210_v25, %v6804_v60  ;;  %v7279_v58 = vrot.slane %v1209_v47, %v6804_v60  ;;  %v1443_v24 = vpack.i.b16 %v7264_v61, %v7256_v33  ;;  %v1278_v30 = vcombine.high %v1175_v42, %v1191_v7 }
 0x2ca   : > { %v1277_v36 = vcombine.low %v1175_v42, %v1191_v7  ;;  %v1276_v7 = vrot.slane %v1262_v5, %v6804_v60  ;;  %v1446_v62 = vshrl.u32 %v7264_v61, 16  ;;  %v1429_v5 = vshrl.u32 %v6738_v13, 16 }
 0x2cb   : > { %v1465_v40 = vcombine.low %v1427_v9, %v1443_v24  ;;  %v1466_v49 = vcombine.high %v1427_v9, %v1443_v24  ;;  %v1242_v31 = vcombine.high %v7276_v8, %v7273_v50  ;;  %v1226_v34 = vcombine.high %v7286_v53, %v7279_v58 }
 0x2cc   : > { %v7288_v43 = vpop.permute.xlu1 %2244  ;;  %v7290_v57 = vpop.permute.xlu0 %1986  ;;  %v1292_v0 = vrot.slane %v1278_v30, %v6804_v60  ;;  %v1285_v24 = vrot.slane %v1277_v36, %v6804_v60  ;;  %v1241_v36 = vcombine.low %v7276_v8, %v7273_v50  ;;  %v1225_v11 = vcombine.low %v7286_v53, %v7279_v58 }
 0x2cd   : > { %v7297_v44 = vrot.slane %v1465_v40, %v6804_v60  ;;  %v7300_v23 = vrot.slane %v1466_v49, %v6804_v60  ;;  %v7303_v37 = vrot.slane %v1242_v31, %v7019_v45  ;;  %v7319_v9 = vrot.slane %v1226_v34, %v7019_v45 }
 0x2ce   : > { %v1269_v49 = vrot.slane %v1261_v54, %v6804_v60  ;;  %v1309_v31 = vcombine.low %v1276_v7, %v1292_v0  ;;  %v1430_v34 = vshrl.u32 %v6740_v14, 16  ;;  %v1438_v54 = vshrl.u32 %v7234_v48, 16 }
 0x2cf   : > { %1360 = vrot.lane.b32.xlu1 %v7303_v37, %s6479_s24  ;;  %v1498_v51 = vcombine.high %v7313_v63, %v7300_v23  ;;  %v1482_v10 = vcombine.high %v7310_v56, %v7297_v44  ;;  %1339 = vrot.lane.b32.xlu0 %v7319_v9, %s6479_s24  ;;  %v1437_v14 = vshrl.u32 %v7225_v3, 16  ;;  %v7373_v50 = vrot.slane %v1241_v36, %v7019_v45 }
 0x2d0   : > { %v7305_v47 = vpop.permute.xlu1 %1988  ;;  %v7307_v25 = vpop.permute.xlu0 %2775  ;;  %v1293_v35 = vcombine.low %v1269_v49, %v1285_v24  ;;  %v7356_v61 = vrot.slane %v1309_v31, %v7019_v45  ;;  %v1310_v8 = vcombine.high %v1276_v7, %v1292_v0  ;;  %v1431_v12 = vpack.i.b16 %v1430_v34, %v1429_v5 }
 0x2d1   : > { %v7334_v27 = vrot.slane %v1498_v51, %v7019_v45  ;;  %v7337_v40 = vrot.slane %v1482_v10, %v7019_v45  ;;  %v1445_v51 = vshrl.u32 %v7256_v33, 16  ;;  %10217 = vst [vmem:[#allocation14_spill] sm:$0xff] %v7373_v50  ;;  %v1439_v31 = vpack.i.b16 %v1438_v54, %v1437_v14 }
 0x2d2   : > { %v7359_v10 = vrot.slane %v1293_v35, %v7019_v45  ;;  %v1259_v3 = vcombine.high %v7373_v50, %v10205_v46  ;;  %v1423_v35 = vpack.i.b16 %v1422_v41, %v1421_v39  ;;  %v7390_v58 = vrot.slane %v1225_v11, %v7019_v45 }
 0x2d3   : > { %1595 = vrot.lane.b32.xlu1 %v7337_v40, %s6479_s24  ;;  %1616 = vrot.lane.b32.xlu0 %v7334_v27, %s6479_s24  ;;  %v1447_v13 = vpack.i.b16 %v1446_v62, %v1445_v51  ;;  %v7380_v62 = vrot.slane %v1310_v8, %v7019_v45  ;;  %v1294_v53 = vcombine.high %v1269_v49, %v1285_v24 }
 0x2d4   : > { %v7329_v42 = vpop.permute.xlu1 %2777  ;;  %v7331_v38 = vpop.permute.xlu0 %3031  ;;  %v1518_v0 = vcombine.high %v1423_v35, %v1439_v31  ;;  %10219 = vst [vmem:[#allocation16_spill] sm:$0xff] %v7390_v58  ;;  %v1497_v34 = vcombine.low %v7313_v63, %v7300_v23  ;;  %v1257_v41 = vcombine.high %v7390_v58, %v10205_v46  ;;  %v1517_v14 = vcombine.low %v1423_v35, %v1439_v31 }
 0x2d5   : > { %v1534_v51 = vcombine.high %v1431_v12, %v1447_v13  ;;  %v1533_v7 = vcombine.low %v1431_v12, %v1447_v13  ;;  %v7398_v5 = vrot.slane %v1294_v53, %v7019_v45  ;;  %v2805_v63 = vpack.i.b16 %v7329_v42, %v7307_v25 }
 0x2d6   : > { %v1532_v8 = vrot.slane %v1518_v0, %v6804_v60  ;;  %v1260_v24 = vcombine.high %v7303_v37, %v10205_v46  ;;  %v1258_v49 = vcombine.high %v7319_v9, %v10205_v46  ;;  %v7416_v13 = vrot.slane %v1497_v34, %v7019_v45 }
 0x2d7   : > { %1351 = vrot.lane.b32.xlu0 %v7356_v61, %s6480_s25  ;;  %1330 = vrot.lane.b32.xlu1 %v7359_v10, %s6480_s25  ;;  %v1548_v39 = vrot.slane %v1534_v51, %v6804_v60  ;;  %v1541_v23 = vrot.slane %v1533_v7, %v6804_v60  ;;  %v1525_v35 = vrot.slane %v1517_v14, %v6804_v60 }
 0x2d8   : > { %v7345_v6 = vpop.permute.xlu1 %3033  ;;  %v7347_v30 = vpop.permute.xlu0 %2246  ;;  %10221 = vst [vmem:[#allocation18_spill] sm:$0xff] %v7416_v13  ;;  %v2797_v51 = vpack.i.b16 %v7242_v28, %v7236_v32  ;;  %v2781_v37 = vpack.i.b16 %v6744_v16, %v6742_v15  ;;  %v1481_v9 = vcombine.low %v7310_v56, %v7297_v44  ;;  %v1515_v7 = vcombine.high %v7416_v13, %v10205_v46 }
 0x2d9   : > { %v1565_v12 = vcombine.low %v1532_v8, %v1548_v39  ;;  %v3061_v53 = vpack.i.b16 %v7345_v6, %v7331_v38  ;;  %v1549_v14 = vcombine.low %v1525_v35, %v1541_v23  ;;  %v3045_v50 = vpack.i.b16 %v6756_v22, %v6754_v21 }
 0x2da   : > { %v2812_v44 = vcombine.high %v2781_v37, %v2797_v51  ;;  %v3053_v56 = vpack.i.b16 %v7250_v4, %v7244_v52 }
 0x2db   : > { %1354 = vrot.lane.b32.xlu0 %v1259_v3, %s6481_s26  ;;  %1363 = vrot.lane.b32.xlu1 %v7380_v62, %s6482_s29  ;;  %v2789_v3 = vpack.i.b16 %v6748_v18, %v6746_v17  ;;  %v7438_v34 = vrot.slane %v1565_v12, %v7019_v45  ;;  %v3083_v12 = vcombine.low %v3045_v50, %v3061_v53 }
 0x2dc   : > { %v7368_v48 = vpop.permute.xlu1 %2248  ;;  %v7370_v33 = vpop.permute.xlu0 %1990  ;;  %v7470_v58 = vrot.slane %v2812_v44, %v6804_v60 }
 0x2dd   : > { %v2828_v0 = vcombine.high %v2789_v3, %v2805_v63 }
 0x2df   : > { %1333 = vrot.lane.b32.xlu0 %v1257_v41, %s6481_s26  ;;  %1342 = vrot.lane.b32.xlu1 %v7398_v5, %s6482_s29  ;;  %v1566_v41 = vcombine.high %v1532_v8, %v1548_v39  ;;  %v3037_v39 = vpack.i.b16 %v6752_v20, %v6750_v19  ;;  %v7454_v8 = vrot.slane %v2828_v0, %v6804_v60 }
 0x2e0   : > { %v7382_v1 = vpop.permute.xlu1 %1992  ;;  %v7384_v29 = vpop.permute.xlu0 %1089 }
 0x2e1   : > { %10218 = vst [vmem:[#allocation15_spill] sm:$0xff] %v7384_v29  ;;  %v7457_v13 = vrot.slane %v1566_v41, %v7019_v45  ;;  %v7463_v29 = vrot.slane %v1481_v9, %v7019_v45  ;;  %v3067_v0 = vcombine.low %v3037_v39, %v3053_v56  ;;  %v2827_v41 = vcombine.low %v2789_v3, %v2805_v63 }
 0x2e2   : > { %v3064_v3 = vshrl.u32 %v7345_v6, 16 }
 0x2e3   : > { %1366 = vrot.lane.b32.xlu0 %v1260_v24, %s6483_s30  ;;  %1345 = vrot.lane.b32.xlu1 %v1258_v49, %s6483_s30  ;;  %10225 = vst [vmem:[#allocation22_spill] sm:$0xff] %v7463_v29  ;;  %v1513_v9 = vcombine.high %v7463_v29, %v10205_v46  ;;  %v7492_v63 = vrot.slane %v3067_v0, %v6804_v60 }
 0x2e4   : > { %v7400_v36 = vpop.permute.xlu1 %1068  ;;  %v7402_v54 = vpop.permute.xlu0 %1059 }
 0x2e5   : > { %10220 = vst [vmem:[#allocation17_spill] sm:$0xff] %v7400_v36  ;;  %v1550_v36 = vcombine.high %v1525_v35, %v1541_v23  ;;  %v7477_v23 = vrot.slane %v3083_v12, %v6804_v60  ;;  %v3056_v12 = vshrl.u32 %v7250_v4, 16  ;;  %v3040_v4 = vshrl.u32 %v6752_v20, 16 }
 0x2e7   : > { %1610 = vrot.lane.b32.xlu0 %v1515_v7, %s6481_s26  ;;  %1607 = vrot.lane.b32.xlu1 %v7438_v34, %s6480_s25  ;;  %v7480_v35 = vrot.slane %v1550_v36, %v7019_v45  ;;  %v3048_v36 = vshrl.u32 %v6756_v22, 16  ;;  %v3100_v0 = vcombine.high %v7492_v63, %v7477_v23 }
 0x2e8   : > { %v7418_v31 = vpop.permute.xlu1 %1080  ;;  %v7420_v11 = vpop.permute.xlu0 %1062 }
 0x2e9   : > { %10222 = vst [vmem:[#allocation19_spill] sm:$0xff] %v7420_v11 }
 0x2eb   : > { %1619 = vrot.lane.b32.xlu0 %v7457_v13, %s6482_s29 }
 0x2ec   : > { %v7440_v24 = vpop.permute.xlu1 %1083  ;;  %v7442_v49 = vpop.permute.xlu0 %1092 }
 0x2ed   : > { %10223 = vst [vmem:[#allocation20_spill] sm:$0xff] %v7440_v24  ;;  %10224 = vst [vmem:[#allocation21_spill] sm:$0xff] %v7442_v49  ;;  %v7460_v49 = vrot.slane %v1549_v14, %v7019_v45  ;;  %v2860_v14 = vcombine.high %v7470_v58, %v7454_v8  ;;  %v2811_v24 = vcombine.low %v2781_v37, %v2797_v51 }
 0x2ee   : > { %v3084_v51 = vcombine.high %v3045_v50, %v3061_v53  ;;  %v1516_v37 = vcombine.high %v7334_v27, %v10205_v46  ;;  %v3068_v27 = vcombine.high %v3037_v39, %v3053_v56 }
 0x2ef   : > { %1586 = vrot.lane.b32.xlu1 %v7460_v49, %s6480_s25  ;;  %1598 = vrot.lane.b32.xlu0 %v7480_v35, %s6482_s29  ;;  %v7507_v6 = vrot.slane %v2860_v14, %v7019_v45  ;;  %v7519_v50 = vrot.slane %v2811_v24, %v6804_v60 }
 0x2f0   : > { %v7465_v7 = vpop.permute.xlu1 %1095  ;;  %v7467_v11 = vpop.permute.xlu0 %1071  ;;  %v7526_v20 = vrot.slane %v3084_v51, %v6804_v60 }
 0x2f1   : > { %10226 = vst [vmem:[#allocation23_spill] sm:$0xff] %v7465_v7  ;;  %10227 = vst [vmem:[#allocation24_spill] sm:$0xff] %v7467_v11  ;;  %v3047_v11 = vshrl.u32 %v6754_v21, 16  ;;  %v3063_v21 = vshrl.u32 %v7331_v38, 16  ;;  %v3055_v38 = vshrl.u32 %v7244_v52, 16  ;;  %v7531_v52 = vrot.slane %v3100_v0, %v7019_v45 }
 0x2f3   : > { %1589 = vrot.lane.b32.xlu1 %v1513_v9, %s6481_s26  ;;  %v3065_v53 = vpack.i.b16 %v3064_v3, %v3063_v21  ;;  %2978 = vrot.lane.b32.xlu0 %v7507_v6, %s6479_s24  ;;  %v3049_v14 = vpack.i.b16 %v3048_v36, %v3047_v11  ;;  %v2783_v11 = vshrl.u32 %v6742_v15, 16  ;;  %v2791_v3 = vshrl.u32 %v6746_v17, 16 }
 0x2f4   : > { %v7486_v44 = vpop.permute.xlu1 %1074  ;;  %v7488_v7 = vpop.permute.xlu0 %2701  ;;  %v2807_v21 = vshrl.u32 %v7307_v25, 16  ;;  %v2784_v15 = vshrl.u32 %v6744_v16, 16 }
 0x2f5   : > { %10228 = vst [vmem:[#allocation25_spill] sm:$0xff] %v7486_v44  ;;  %10229 = vst [vmem:[#allocation26_spill] sm:$0xff] %v7488_v7  ;;  %v7501_v44 = vrot.slane %v2827_v41, %v6804_v60  ;;  %v3039_v41 = vshrl.u32 %v6750_v19, 16  ;;  %v3057_v7 = vpack.i.b16 %v3056_v12, %v3055_v38  ;;  %v1514_v19 = vcombine.high %v7337_v40, %v10205_v46 }
 0x2f6   : > { %v2800_v12 = vshrl.u32 %v7242_v28, 16  ;;  %v7544_v40 = vrot.slane %v3068_v27, %v6804_v60  ;;  %v3152_v51 = vcombine.high %v3049_v14, %v3065_v53  ;;  %v3151_v17 = vcombine.low %v3049_v14, %v3065_v53 }
 0x2f7   : > { %1622 = vrot.lane.b32.xlu1 %v1516_v37, %s6483_s30  ;;  %v2844_v24 = vcombine.high %v7519_v50, %v7501_v44  ;;  %v3041_v36 = vpack.i.b16 %v3040_v4, %v3039_v41  ;;  %3213 = vrot.lane.b32.xlu0 %v7531_v52, %s6479_s24  ;;  %v1325_v4 = vcombine.high %v7359_v10, %v10205_v46 }
 0x2f8   : > { %v7511_v9 = vpop.permute.xlu1 %2722  ;;  %v7513_v22 = vpop.permute.xlu0 %1098  ;;  %v3116_v25 = vcombine.high %v7544_v40, %v7526_v20  ;;  %v7570_v10 = vrot.slane %v3151_v17, %v6804_v60 }
 0x2f9   : > { %10230 = vst [vmem:[#allocation27_spill] sm:$0xff] %v7511_v9  ;;  %10231 = vst [vmem:[#allocation28_spill] sm:$0xff] %v7513_v22  ;;  %v2808_v9 = vshrl.u32 %v7329_v42, 16  ;;  %v2792_v42 = vshrl.u32 %v6748_v18, 16  ;;  %v2799_v18 = vshrl.u32 %v7236_v32, 16  ;;  %v3136_v37 = vcombine.high %v3041_v36, %v3057_v7 }
 0x2fa   : > { %v7553_v28 = vrot.slane %v2844_v24, %v7019_v45  ;;  %v3135_v27 = vcombine.low %v3041_v36, %v3057_v7  ;;  %v7564_v32 = vrot.slane %v3152_v51, %v6804_v60  ;;  %v7576_v7 = vrot.slane %v3116_v25, %v7019_v45 }
 0x2fb   : > { %1601 = vrot.lane.b32.xlu1 %v1514_v19, %s6483_s30  ;;  %v2809_v0 = vpack.i.b16 %v2808_v9, %v2807_v21  ;;  %v2793_v16 = vpack.i.b16 %v2792_v42, %v2791_v3  ;;  %v2801_v19 = vpack.i.b16 %v2800_v12, %v2799_v18  ;;  %1336 = vrot.lane.b32.xlu0 %v1325_v4, %s6485_s10 }
 0x2fc   : > { %v7535_v56 = vpop.permute.xlu1 %1086  ;;  %v7537_v39 = vpop.permute.xlu0 %1077  ;;  %v2785_v9 = vpack.i.b16 %v2784_v15, %v2783_v11  ;;  %v7573_v53 = vrot.slane %v3136_v37, %v6804_v60  ;;  %v1328_v24 = vcombine.high %v7380_v62, %v10205_v46  ;;  %v7585_v36 = vrot.slane %v3135_v27, %v6804_v60 }
 0x2fd   : > { %10232 = vst [vmem:[#allocation29_spill] sm:$0xff] %v7537_v39  ;;  %v2896_v14 = vcombine.high %v2793_v16, %v2809_v0  ;;  %v2895_v62 = vcombine.low %v2793_v16, %v2809_v0  ;;  %v1327_v15 = vcombine.high %v7356_v61, %v10205_v46  ;;  %v1326_v18 = vcombine.high %v7398_v5, %v10205_v46 }
 0x2fe   : > { %v2880_v11 = vcombine.high %v2785_v9, %v2801_v19  ;;  %v2879_v4 = vcombine.low %v2785_v9, %v2801_v19  ;;  %v1581_v61 = vcombine.high %v7460_v49, %v10205_v46  ;;  %v1583_v5 = vcombine.high %v7438_v34, %v10205_v46 }
 0x2ff   : > { %2957 = vrot.lane.b32.xlu1 %v7553_v28, %s6479_s24  ;;  %1369 = vrot.lane.b32.xlu0 %v1328_v24, %s6484_s9  ;;  %v7595_v51 = vrot.slane %v2896_v14, %v6804_v60  ;;  %v7609_v0 = vrot.slane %v2895_v62, %v6804_v60  ;;  %v2859_v14 = vcombine.low %v7470_v58, %v7454_v8 }
 0x300   : > { %v7559_v41 = vpop.permute.xlu1 %1065  ;;  %v7561_v38 = vpop.permute.xlu0 %2716  ;;  %v2894_v25 = vrot.slane %v2880_v11, %v6804_v60  ;;  %v2887_v9 = vrot.slane %v2879_v4, %v6804_v60  ;;  %v1584_v34 = vcombine.high %v7457_v13, %v10205_v46  ;;  %v7640_v58 = vpack.i.b16 %v7368_v48, %v7347_v30 }
 0x301   : > { %10233 = vst [vmem:[#allocation30_spill] sm:$0xff] %v7561_v38  ;;  %v2843_v8 = vcombine.low %v7519_v50, %v7501_v44  ;;  %v10245_v44 = vld [vmem:[#allocation3_spill] sm:$0xff]  ;;  %v2878_v21 = vcombine.high %v7507_v6, %v10205_v46  ;;  %v3183_v29 = vcombine.low %v7573_v53, %v7564_v32 }
 0x302   : > { %v2927_v27 = vcombine.low %v2894_v25, %v7595_v51  ;;  %v2911_v24 = vcombine.low %v2887_v9, %v7609_v0 }
 0x303   : > { %3234 = vrot.lane.b32.xlu1 %v7576_v7, %s6479_s24  ;;  %1348 = vrot.lane.b32.xlu0 %v1326_v18, %s6484_s9  ;;  %v7650_v18 = vrot.slane %v2859_v14, %v7019_v45  ;;  %v3099_v14 = vcombine.low %v7492_v63, %v7477_v23  ;;  %v7686_v23 = vrot.slane %v2843_v8, %v7019_v45  ;;  %v10253_v8 = vld [vmem:[#allocation7_spill] sm:$0xff] }
 0x304   : > { %v7580_v42 = vpop.permute.xlu1 %2713  ;;  %v7582_v3 = vpop.permute.xlu0 %2704  ;;  %v7626_v49 = vrot.slane %v2927_v27, %v7019_v45  ;;  %v7645_v13 = vrot.slane %v2911_v24, %v7019_v45  ;;  %v7660_v27 = vpack.i.b16 %v7288_v43, %v7266_v59  ;;  %v7675_v24 = vpack.i.b16 %v7382_v1, %v7370_v33 }
 0x305   : > { %10234 = vst [vmem:[#allocation31_spill] sm:$0xff] %v7580_v42  ;;  %10235 = vst [vmem:[#allocation32_spill] sm:$0xff] %v7582_v3  ;;  %v3167_v3 = vcombine.low %v7585_v36, %v7570_v10  ;;  %v2875_v42 = vcombine.high %v7686_v23, %v10205_v46 }
 0x306   : > { %10242 = vst [vmem:[#allocation39_spill] sm:$0xff] %v7650_v18  ;;  %10248 = vst [vmem:[#allocation3_spill] sm:$0xff] %v7686_v23 }
 0x307   : > { %1357 = vrot.lane.b32.xlu1 %v1327_v15, %s6485_s10  ;;  %1613 = vrot.lane.b32.xlu0 %v1583_v5, %s6485_s10  ;;  %v1582_v15 = vcombine.high %v7480_v35, %v10205_v46  ;;  %v10246_v35 = vld [vmem:[#allocation4_spill] sm:$0xff]  ;;  %v7712_v38 = vrot.slane %v3167_v3, %v7019_v45 }
 0x308   : > { %v7601_v37 = vpop.permute.xlu1 %2692  ;;  %v7603_v17 = vpop.permute.xlu0 %1937  ;;  %v7667_v50 = vpack.i.b16 %v10246_v35, %v10245_v44 }
 0x309   : > { %10236 = vst [vmem:[#allocation33_spill] sm:$0xff] %v7601_v37  ;;  %10237 = vst [vmem:[#allocation34_spill] sm:$0xff] %v7603_v17  ;;  %v2271_v17 = vshrl.u32 %v7288_v43, 16 }
 0x30a   : > { %v2282_v6 = vcombine.low %v7667_v50, %v7660_v27 }
 0x30b   : > { %1592 = vrot.lane.b32.xlu1 %v1581_v61, %s6485_s10  ;;  %1625 = vrot.lane.b32.xlu0 %v1584_v34, %s6484_s9  ;;  %v10244_v61 = vld [vmem:[#allocation5_spill] sm:$0xff] }
 0x30c   : > { %v7616_v16 = vpop.permute.xlu1 %2695  ;;  %v7618_v19 = vpop.permute.xlu0 %2719  ;;  %v7656_v5 = vpack.i.b16 %v10244_v61, %v6762_v26  ;;  %v7723_v39 = vrot.slane %v2282_v6, %v6804_v60  ;;  %v2912_v6 = vcombine.high %v2887_v9, %v7609_v0 }
 0x30d   : > { %10238 = vst [vmem:[#allocation35_spill] sm:$0xff] %v7616_v16  ;;  %10239 = vst [vmem:[#allocation36_spill] sm:$0xff] %v7618_v19  ;;  %v7698_v16 = vpack.i.b16 %v7305_v47, %v7290_v57 }
 0x30e   : > { %v2298_v34 = vcombine.low %v7656_v5, %v7640_v58 }
 0x30f   : > { %2969 = vrot.lane.b32.xlu1 %v7626_v49, %s6480_s25  ;;  %1604 = vrot.lane.b32.xlu0 %v1582_v15, %s6484_s9  ;;  %v2877_v15 = vcombine.high %v7650_v18, %v10205_v46 }
 0x310   : > { %v7631_v11 = vpop.permute.xlu1 %2725  ;;  %v7636_v62 = vpop.permute.xlu0 %2698 }
 0x311   : > { %10240 = vst [vmem:[#allocation37_spill] sm:$0xff] %v7631_v11  ;;  %10241 = vst [vmem:[#allocation38_spill] sm:$0xff] %v7636_v62  ;;  %v10251_v62 = vld [vmem:[#allocation9_spill] sm:$0xff] }
 0x313   : > { %2948 = vrot.lane.b32.xlu1 %v7645_v13, %s6480_s25  ;;  %2972 = vrot.lane.b32.xlu0 %v2877_v15, %s6481_s26  ;;  %v7718_v15 = vrot.slane %v3099_v14, %v7019_v45 }
 0x314   : > { %v7652_v4 = vpop.permute.xlu1 %2728  ;;  %v7681_v12 = vpop.permute.xlu0 %2731 }
 0x315   : > { %10243 = vst [vmem:[#allocation40_spill] sm:$0xff] %v7652_v4  ;;  %10247 = vst [vmem:[#allocation5_spill] sm:$0xff] %v7681_v12  ;;  %v10250_v4 = vld [vmem:[#allocation8_spill] sm:$0xff]  ;;  %v10252_v12 = vld [vmem:[#allocation6_spill] sm:$0xff]  ;;  %v3131_v14 = vcombine.high %v7718_v15, %v10205_v46 }
 0x316   : > { %v7692_v11 = vpack.i.b16 %v10251_v62, %v10250_v4  ;;  %v7704_v37 = vpack.i.b16 %v10253_v8, %v10252_v12  ;;  %10254 = vst [vmem:[#allocation8_spill] sm:$0xff] %v7718_v15 }
 0x317   : > { %2984 = vrot.lane.b32.xlu1 %v2878_v21, %s6483_s30  ;;  %v2928_v21 = vcombine.high %v2894_v25, %v7595_v51  ;;  %2951 = vrot.lane.b32.xlu0 %v2875_v42, %s6481_s26 }
 0x318   : > { %v7688_v63 = vpop.permute.xlu1 %2707  ;;  %v2042_v19 = vcombine.low %v7692_v11, %v7675_v24  ;;  %v7730_v3 = vpop.permute.xlu0 %1928  ;;  %v2043_v43 = vcombine.high %v7692_v11, %v7675_v24 }
 0x319   : > { %10249 = vst [vmem:[#allocation4_spill] sm:$0xff] %v7688_v63  ;;  %v7707_v63 = vrot.slane %v2298_v34, %v6804_v60  ;;  %v2026_v34 = vcombine.low %v7704_v37, %v7698_v16  ;;  %v7736_v25 = vrot.slane %v2928_v21, %v7019_v45  ;;  %v7754_v21 = vrot.slane %v2912_v6, %v7019_v45 }
 0x31a   : > { %v7733_v51 = vrot.slane %v2042_v19, %v6804_v60  ;;  %v2876_v6 = vcombine.high %v7553_v28, %v10205_v46  ;;  %v2255_v28 = vshrl.u32 %v10246_v35, 16  ;;  %v7815_v24 = vrot.slane %v2043_v43, %v6804_v60 }
 0x31b   : > { %3204 = vrot.lane.b32.xlu1 %v7712_v38, %s6480_s25  ;;  %v2315_v23 = vcombine.high %v7723_v39, %v7707_v63  ;;  %v7746_v42 = vrot.slane %v2026_v34, %v6804_v60  ;;  %2981 = vrot.lane.b32.xlu0 %v7736_v25, %s6482_s29  ;;  %v2279_v34 = vshrl.u32 %v7368_v48, 16  ;;  %v2262_v48 = vshrl.u32 %v6762_v26, 16 }
 0x31c   : > { %v7720_v18 = vpop.permute.xlu1 %1916  ;;  %v7751_v19 = vpop.permute.xlu0 %1931  ;;  %v2270_v26 = vshrl.u32 %v7266_v59, 16 }
 0x31d   : > { %10255 = vst [vmem:[#allocation9_spill] sm:$0xff] %v7720_v18  ;;  %v7757_v0 = vrot.slane %v2315_v23, %v7019_v45  ;;  %v2059_v9 = vcombine.high %v7746_v42, %v7733_v51  ;;  %v3115_v23 = vcombine.low %v7544_v40, %v7526_v20  ;;  %v2263_v18 = vshrl.u32 %v10244_v61, 16 }
 0x31e   : > { %v2283_v20 = vcombine.high %v7667_v50, %v7660_v27  ;;  %v3191_v27 = vrot.slane %v3183_v29, %v7019_v45  ;;  %v2272_v35 = vpack.i.b16 %v2271_v17, %v2270_v26 }
 0x31f   : > { %3207 = vrot.lane.b32.xlu1 %v3131_v14, %s6481_s26  ;;  %2960 = vrot.lane.b32.xlu0 %v7754_v21, %s6482_s29  ;;  %v2299_v14 = vcombine.high %v7656_v5, %v7640_v58  ;;  %v7775_v15 = vrot.slane %v2059_v9, %v7019_v45  ;;  %v2278_v58 = vshrl.u32 %v7347_v30, 16  ;;  %v2254_v5 = vshrl.u32 %v10245_v44, 16 }
 0x320   : > { %v7743_v22 = vpop.permute.xlu1 %2710  ;;  %v7786_v40 = vpop.permute.xlu0 %1910  ;;  %v2945_v44 = vcombine.high %v7626_v49, %v10205_v46  ;;  %v7802_v50 = vrot.slane %v3115_v23, %v7019_v45  ;;  %v2264_v9 = vpack.i.b16 %v2263_v18, %v2262_v48  ;;  %v7807_v59 = vrot.slane %v2283_v20, %v6804_v60 }
 0x321   : > { %10256 = vst [vmem:[#allocation6_spill] sm:$0xff] %v7743_v22  ;;  %v2280_v61 = vpack.i.b16 %v2279_v34, %v2278_v58  ;;  %v7794_v30 = vrot.slane %v2299_v14, %v6804_v60  ;;  %v2027_v34 = vcombine.high %v7704_v37, %v7698_v16  ;;  %v2256_v29 = vpack.i.b16 %v2255_v28, %v2254_v5 }
 0x322   : > { %v2023_v49 = vshrl.u32 %v7382_v1, 16  ;;  %v3133_v17 = vcombine.high %v7802_v50, %v10205_v46  ;;  %v2943_v14 = vcombine.high %v7645_v13, %v10205_v46  ;;  %v1998_v16 = vshrl.u32 %v10252_v12, 16 }
 0x323   : > { %2428 = vrot.lane.b32.xlu1 %v7757_v0, %s6479_s24  ;;  %2963 = vrot.lane.b32.xlu0 %v2876_v6, %s6483_s30  ;;  %v2367_v11 = vcombine.high %v2264_v9, %v2280_v61  ;;  %v2331_v37 = vcombine.high %v7807_v59, %v7794_v30  ;;  %v2007_v23 = vshrl.u32 %v10251_v62, 16  ;;  %v2006_v1 = vshrl.u32 %v10250_v4, 16 }
 0x324   : > { %v7768_v22 = vpop.permute.xlu1 %1907  ;;  %v7817_v18 = vpop.permute.xlu0 %1940  ;;  %v2351_v48 = vcombine.high %v2256_v29, %v2272_v35  ;;  %v2015_v58 = vshrl.u32 %v7305_v47, 16  ;;  %v7830_v5 = vrot.slane %v2027_v34, %v6804_v60  ;;  %v2022_v20 = vshrl.u32 %v7370_v33, 16 }
 0x325   : > { %v1999_v13 = vshrl.u32 %v10253_v8, 16  ;;  %v2014_v12 = vshrl.u32 %v7290_v57, 16  ;;  %v2366_v28 = vcombine.low %v2264_v9, %v2280_v61  ;;  %v7838_v62 = vrot.slane %v2367_v11, %v6804_v60 }
 0x326   : > { %v2024_v47 = vpack.i.b16 %v2023_v49, %v2022_v20  ;;  %v7843_v26 = vrot.slane %v2331_v37, %v7019_v45  ;;  %v2946_v33 = vcombine.high %v7736_v25, %v10205_v46  ;;  %v2075_v43 = vcombine.high %v7830_v5, %v7815_v24 }
 0x327   : > { %2172 = vrot.lane.b32.xlu1 %v7775_v15, %s6479_s24  ;;  %3225 = vrot.lane.b32.xlu0 %v3191_v27, %s6480_s25  ;;  %v2350_v8 = vcombine.low %v2256_v29, %v2272_v35  ;;  %v7850_v57 = vrot.slane %v2351_v48, %v6804_v60  ;;  %v2016_v61 = vpack.i.b16 %v2015_v58, %v2014_v12 }
 0x328   : > { %v7804_v6 = vpop.permute.xlu1 %1919  ;;  %v7852_v9 = vpop.permute.xlu0 %1943  ;;  %v2000_v34 = vpack.i.b16 %v1999_v13, %v1998_v16  ;;  %v2374_v11 = vrot.slane %v2366_v28, %v6804_v60  ;;  %v7859_v49 = vrot.slane %v2075_v43, %v7019_v45  ;;  %v3201_v35 = vcombine.high %v3191_v27, %v10205_v46 }
 0x329   : > { %v2398_v29 = vcombine.low %v7850_v57, %v7838_v62  ;;  %v2330_v16 = vcombine.low %v7807_v59, %v7794_v30  ;;  %v2944_v48 = vcombine.high %v7754_v21, %v10205_v46  ;;  %v2314_v30 = vcombine.low %v7723_v39, %v7707_v63 }
 0x32a   : > { %v2095_v37 = vcombine.high %v2000_v34, %v2016_v61  ;;  %v2094_v13 = vcombine.low %v2000_v34, %v2016_v61  ;;  %v3199_v21 = vcombine.high %v7712_v38, %v10205_v46  ;;  %v2058_v39 = vcombine.low %v7746_v42, %v7733_v51 }
 0x32b   : > { %2975 = vrot.lane.b32.xlu1 %v2945_v44, %s6485_s10  ;;  %3228 = vrot.lane.b32.xlu0 %v3133_v17, %s6481_s26  ;;  %v2008_v44 = vpack.i.b16 %v2007_v23, %v2006_v1  ;;  %v7878_v58 = vrot.slane %v2398_v29, %v7019_v45  ;;  %v7895_v43 = vrot.slane %v2330_v16, %v7019_v45 }
 0x32c   : > { %v7840_v4 = vpop.permute.xlu1 %1922  ;;  %v7873_v27 = vpop.permute.xlu0 %1946  ;;  %v2109_v12 = vrot.slane %v2095_v37, %v6804_v60  ;;  %v2074_v38 = vcombine.low %v7830_v5, %v7815_v24  ;;  %v7923_v24 = vrot.slane %v2058_v39, %v7019_v45 }
 0x32d   : > { %v2111_v25 = vcombine.high %v2008_v44, %v2024_v47  ;;  %v2110_v23 = vcombine.low %v2008_v44, %v2024_v47  ;;  %v2102_v44 = vrot.slane %v2094_v13, %v6804_v60  ;;  %v2348_v34 = vcombine.high %v7895_v43, %v10205_v46 }
 0x32e   : > { %v7926_v5 = vrot.slane %v2074_v38, %v7019_v45  ;;  %v2399_v13 = vcombine.high %v7850_v57, %v7838_v62  ;;  %v2347_v62 = vcombine.high %v7757_v0, %v10205_v46  ;;  %v2349_v57 = vcombine.high %v7843_v26, %v10205_v46 }
 0x32f   : > { %2954 = vrot.lane.b32.xlu1 %v2943_v14, %s6485_s10  ;;  %2449 = vrot.lane.b32.xlu0 %v7843_v26, %s6479_s24  ;;  %v2358_v14 = vrot.slane %v2350_v8, %v6804_v60  ;;  %v2125_v1 = vrot.slane %v2111_v25, %v6804_v60  ;;  %v2118_v59 = vrot.slane %v2110_v23, %v6804_v60 }
 0x330   : > { %v7864_v17 = vpop.permute.xlu1 %1934  ;;  %v7898_v8 = vpop.permute.xlu0 %1925  ;;  %v2090_v23 = vcombine.high %v7923_v24, %v10205_v46  ;;  %v2413_v39 = vrot.slane %v2399_v13, %v7019_v45 }
 0x331   : > { %v2382_v20 = vcombine.low %v2358_v14, %v2374_v11  ;;  %v2126_v25 = vcombine.low %v2102_v44, %v2118_v59  ;;  %v2143_v38 = vcombine.high %v2109_v12, %v2125_v1 }
 0x333   : > { %2987 = vrot.lane.b32.xlu1 %v2946_v33, %s6484_s9  ;;  %2193 = vrot.lane.b32.xlu0 %v7859_v49, %s6479_s24  ;;  %v7892_v47 = vrot.slane %v2382_v20, %v7019_v45  ;;  %v2142_v33 = vcombine.low %v2109_v12, %v2125_v1  ;;  %v2134_v51 = vrot.slane %v2126_v25, %v7019_v45 }
 0x334   : > { %v7887_v28 = vpop.permute.xlu1 %1913  ;;  %v2383_v20 = vcombine.high %v2358_v14, %v2374_v11  ;;  %v2091_v1 = vcombine.high %v7775_v15, %v10205_v46 }
 0x335   : > { %v2150_v61 = vrot.slane %v2142_v33, %v7019_v45 }
 0x336   : > { %v2397_v33 = vrot.slane %v2383_v20, %v7019_v45 }
 0x337   : > { %3231 = vrot.lane.b32.xlu1 %v3201_v35, %s6485_s10  ;;  %2966 = vrot.lane.b32.xlu0 %v2944_v48, %s6484_s9  ;;  %v7913_v35 = vrot.slane %v2314_v30, %v7019_v45  ;;  %v2092_v48 = vcombine.high %v7926_v5, %v10205_v46  ;;  %v2160_v20 = vcombine.high %v2150_v61, %v10205_v46 }
 0x339   : > { %v2346_v42 = vcombine.high %v7913_v35, %v10205_v46 }
 0x33b   : > { %2440 = vrot.lane.b32.xlu1 %v7878_v58, %s6480_s25  ;;  %3210 = vrot.lane.b32.xlu0 %v3199_v21, %s6485_s10 }
 0x33f   : > { %2419 = vrot.lane.b32.xlu1 %v7892_v47, %s6480_s25  ;;  %2443 = vrot.lane.b32.xlu0 %v2348_v34, %s6481_s26 }
 0x341   : > { %v7907_v63 = vpop.permute.xlu1 %1360  ;;  %v7917_v29 = vpop.permute.xlu0 %1339 }
 0x343   : > { %2184 = vrot.lane.b32.xlu1 %v2150_v61, %s6480_s25  ;;  %2422 = vrot.lane.b32.xlu0 %v2346_v42, %s6481_s26  ;;  %v2093_v42 = vcombine.high %v7859_v49, %v10205_v46 }
 0x345   : > { %v7928_v37 = vpop.permute.xlu1 %1595  ;;  %v7932_v16 = vpop.permute.xlu0 %1616 }
 0x347   : > { %2163 = vrot.lane.b32.xlu1 %v2134_v51, %s6480_s25  ;;  %2187 = vrot.lane.b32.xlu0 %v2092_v48, %s6481_s26  ;;  %v2127_v48 = vcombine.high %v2102_v44, %v2118_v59  ;;  %v2416_v44 = vcombine.high %v7878_v58, %v10205_v46 }
 0x349   : > { %v7942_v30 = vpop.permute.xlu1 %1330  ;;  %v7944_v21 = vpop.permute.xlu0 %1351  ;;  %v2141_v12 = vrot.slane %v2127_v48, %v7019_v45 }
 0x34b   : > { %2166 = vrot.lane.b32.xlu1 %v2090_v23, %s6481_s26  ;;  %2452 = vrot.lane.b32.xlu0 %v2413_v39, %s6482_s29  ;;  %v2157_v23 = vrot.slane %v2143_v38, %v7019_v45  ;;  %v2158_v38 = vcombine.high %v2134_v51, %v10205_v46 }
 0x34d   : > { %v7950_v11 = vpop.permute.xlu1 %1363  ;;  %v7952_v14 = vpop.permute.xlu0 %1354 }
 0x34f   : > { %2431 = vrot.lane.b32.xlu1 %v2397_v33, %s6482_s29  ;;  %2455 = vrot.lane.b32.xlu0 %v2349_v57, %s6483_s30  ;;  %v2417_v57 = vcombine.high %v2413_v39, %v10205_v46  ;;  %v10257_v39 = vcombine.high %v7573_v53, %v7564_v32  ;;  %v1124_v32 = vsel %vm1100_vm8, %v7093_v55, %v7418_v31  ;;  %v10261_v31 = vld [vmem:[#allocation16_spill] sm:$0xff] }
 0x350   : > { %v1965_v53 = vsel %vm1100_vm8, %v7192_v2, %v7730_v3 }
 0x351   : > { %v7960_v34 = vpop.permute.xlu1 %1342  ;;  %v1334_v25 = vpop.permute.xlu0 %1333  ;;  %v1967_v55 = vsel %vm1104_vm9, %v1965_v53, %v7751_v19  ;;  %v10265_v53 = vld [vmem:[#allocation15_spill] sm:$0xff] }
 0x352   : > { %v1969_v2 = vsel %vm1107_vm10, %v1967_v55, %v7864_v17  ;;  %v10266_v55 = vld [vmem:[#allocation17_spill] sm:$0xff] }
 0x353   : > { %2434 = vrot.lane.b32.xlu1 %v2347_v62, %s6483_s30  ;;  %2196 = vrot.lane.b32.xlu0 %v2157_v23, %s6482_s29  ;;  %v2414_v62 = vcombine.high %v7892_v47, %v10205_v46 }
 0x355   : > { %v7967_v0 = vpop.permute.xlu1 %1345  ;;  %v7969_v26 = vpop.permute.xlu0 %1366 }
 0x357   : > { %2199 = vrot.lane.b32.xlu1 %v2093_v42, %s6483_s30  ;;  %2175 = vrot.lane.b32.xlu0 %v2141_v12, %s6482_s29  ;;  %v2415_v42 = vcombine.high %v2397_v33, %v10205_v46 }
 0x359   : > { %v7976_v49 = vpop.permute.xlu1 %1607  ;;  %v7978_v59 = vpop.permute.xlu0 %1610 }
 0x35b   : > { %2178 = vrot.lane.b32.xlu1 %v2091_v1, %s6483_s30  ;;  %2190 = vrot.lane.b32.xlu0 %v2160_v20, %s6485_s10  ;;  %v3198_v1 = vrot.slane %v10257_v39, %v7019_v45  ;;  %v2159_v20 = vcombine.high %v2141_v12, %v10205_v46 }
 0x35d   : > { %v7987_v13 = vpop.permute.xlu0 %1619 }
 0x35f   : > { %2446 = vrot.lane.b32.xlu1 %v2416_v44, %s6485_s10  ;;  %2458 = vrot.lane.b32.xlu0 %v2417_v57, %s6484_s9  ;;  %v2161_v44 = vcombine.high %v2157_v23, %v10205_v46  ;;  %v10259_v23 = vld [vmem:[#allocation10_spill] sm:$0xff] }
 0x361   : > { %v7985_v15 = vpop.permute.xlu1 %1586  ;;  %v7996_v61 = vpop.permute.xlu0 %1598 }
 0x363   : > { %2425 = vrot.lane.b32.xlu1 %v2414_v62, %s6485_s10  ;;  %2437 = vrot.lane.b32.xlu0 %v2415_v42, %s6484_s9  ;;  %v10258_v62 = vcombine.high %v7585_v36, %v7570_v10  ;;  %v1103_v10 = vsel %vm1100_vm8, %v10259_v23, %v7402_v54  ;;  %v10260_v36 = vld [vmem:[#allocation20_spill] sm:$0xff]  ;;  %v3134_v54 = vcombine.high %v7576_v7, %v10205_v46 }
 0x364   : > { %v1126_v12 = vsel %vm1104_vm9, %v1124_v32, %v10260_v36  ;;  %v3202_v36 = vcombine.high %v3198_v1, %v10205_v46 }
 0x365   : > { %v7994_v58 = vpop.permute.xlu1 %1589  ;;  %v8004_v47 = vpop.permute.xlu0 %2978  ;;  %v3182_v57 = vrot.slane %v10258_v62, %v7019_v45  ;;  %v10263_v62 = vld [vmem:[#allocation13_spill] sm:$0xff] }
 0x366   : > { %v1950_v17 = vsel %vm1100_vm8, %v10263_v62, %v7768_v22 }
 0x367   : > { %2169 = vrot.lane.b32.xlu1 %v2158_v38, %s6485_s10  ;;  %2202 = vrot.lane.b32.xlu0 %v2161_v44, %s6484_s9  ;;  %v1373_v38 = vsel %vm1100_vm8, %v10261_v31, %v7942_v30  ;;  %v3132_v44 = vcombine.high %v7531_v52, %v10205_v46  ;;  %v1128_v30 = vsel %vm1107_vm10, %v1126_v12, %v7535_v56  ;;  %v10264_v52 = vld [vmem:[#allocation34_spill] sm:$0xff] }
 0x368   : > { %v1375_v3 = vsel %vm1104_vm9, %v1373_v38, %v1334_v25  ;;  %v1971_v7 = vsel %vm1110_vm11, %v1969_v2, %v10264_v52  ;;  %v1130_v23 = vsel %vm1110_vm11, %v1128_v30, %v10265_v53  ;;  %v1952_v22 = vsel %vm1104_vm9, %v1950_v17, %v7786_v40  ;;  %v10267_v2 = vld [vmem:[#allocation21_spill] sm:$0xff] }
 0x369   : > { %v8002_v48 = vpop.permute.xlu1 %1622  ;;  %v8015_v33 = vpop.permute.xlu0 %3213  ;;  %v3200_v12 = vcombine.high %v3182_v57, %v10205_v46  ;;  %v1954_v38 = vsel %vm1107_vm10, %v1952_v22, %v7887_v28  ;;  %v755_v28 = vld [vmem:[%s10151_s5] sm:$0xff]  ;;  %v10274_v53 = vld [vmem:[#allocation25_spill] sm:$0xff] }
 0x36b   : > { %3237 = vrot.lane.b32.xlu1 %v3198_v1, %s6482_s29  ;;  %3216 = vrot.lane.b32.xlu0 %v3182_v57, %s6482_s29  ;;  %v1132_v1 = vsel %vm1113_vm12, %v1130_v23, %v10267_v2  ;;  %v10268_v57 = vld [vmem:[#allocation14_spill] sm:$0xff] }
 0x36d   : > { %v8013_v51 = vpop.permute.xlu1 %1601  ;;  %v1337_v39 = vpop.permute.xlu0 %1336 }
 0x36e   : > { %v1377_v25 = vsel %vm1107_vm10, %v1375_v3, %v1337_v39  ;;  %v1388_v3 = vsel %vm1100_vm8, %v10268_v57, %v7944_v21  ;;  %v10271_v21 = vld [vmem:[#allocation18_spill] sm:$0xff] }
 0x36f   : > { %2181 = vrot.lane.b32.xlu1 %v2159_v20, %s6484_s9  ;;  %v10262_v20 = vld [vmem:[#allocation19_spill] sm:$0xff]  ;;  %3219 = vrot.lane.b32.xlu0 %v3132_v44, %s6483_s30  ;;  %v1379_v56 = vsel %vm1110_vm11, %v1377_v25, %v7917_v29  ;;  %v1973_v29 = vsel %vm1113_vm12, %v1971_v7, %v7817_v18  ;;  %v10269_v18 = vld [vmem:[#allocation24_spill] sm:$0xff]  ;;  %v1644_v62 = vsel %vm1100_vm8, %v10271_v21, %v7976_v49  ;;  %v10273_v49 = vld [vmem:[#allocation22_spill] sm:$0xff] }
 0x370   : > { %v1106_v19 = vsel %vm1104_vm9, %v1103_v10, %v10262_v20  ;;  %v1381_v40 = vsel %vm1113_vm12, %v1379_v56, %v7960_v34  ;;  %v1390_v34 = vsel %vm1104_vm9, %v1388_v3, %v7952_v14  ;;  %v1975_v30 = vsel %vm1116_vm13, %v1973_v29, %v7852_v9  ;;  %v10272_v14 = vld [vmem:[#allocation23_spill] sm:$0xff]  ;;  %v10276_v3 = vld [vmem:[#allocation29_spill] sm:$0xff] }
 0x371   : > { %v8043_v42 = vpop.permute.xlu1 %2957  ;;  %v1109_v32 = vsel %vm1107_vm10, %v1106_v19, %v7559_v41  ;;  %v1370_v41 = vpop.permute.xlu0 %1369  ;;  %v1383_v25 = vsel %vm1116_vm13, %v1381_v40, %v7967_v0  ;;  %v1134_v7 = vsel %vm1116_vm13, %v1132_v1, %v10272_v14  ;;  %v1629_v56 = vsel %vm1100_vm8, %v10273_v49, %v7985_v15  ;;  %v10275_v40 = vld [vmem:[#allocation28_spill] sm:$0xff] }
 0x372   : > { %v1112_v31 = vsel %vm1110_vm11, %v1109_v32, %v10266_v55  ;;  %v1646_v23 = vsel %vm1104_vm9, %v1644_v62, %v7978_v59  ;;  %v1631_v22 = vsel %vm1104_vm9, %v1629_v56, %v7994_v58  ;;  %v1977_v15 = vsel %vm1119_vm14, %v1975_v30, %v7873_v27 }
 0x373   : > { %3240 = vrot.lane.b32.xlu1 %v3134_v54, %s6483_s30  ;;  %3222 = vrot.lane.b32.xlu0 %v3200_v12, %s6484_s9  ;;  %v1115_v39 = vsel %vm1113_vm12, %v1112_v31, %v10269_v18  ;;  %v10270_v54 = vld [vmem:[#allocation9_spill] sm:$0xff]  ;;  %v1136_v2 = vsel %vm1119_vm14, %v1134_v7, %v10275_v40 }
 0x374   : > { %v1956_v44 = vsel %vm1110_vm11, %v1954_v38, %v10270_v54 }
 0x375   : > { %v8069_v10 = vpop.permute.xlu1 %3234  ;;  %v1349_v19 = vpop.permute.xlu0 %1348  ;;  %v1958_v9 = vsel %vm1113_vm12, %v1956_v44, %v7804_v6 }
 0x376   : > { %v1385_v52 = vsel %vm1119_vm14, %v1383_v25, %v1349_v19  ;;  %v1960_v59 = vsel %vm1116_vm13, %v1958_v9, %v7840_v4 }
 0x377   : > { %3243 = vrot.lane.b32.xlu1 %v3202_v36, %s6484_s9  ;;  %3318 = vperm.xlu0 %6464, %v755_v28   ;;  %v3277_v55 = vrot.slane %v1385_v52, 4  ;;  %v3282_v28 = vrot.slane %v1977_v15, 4 }
 0x379   : > { %v1358_v20 = vpop.permute.xlu1 %1357  ;;  %v1614_v12 = vpop.permute.xlu0 %1613 }
 0x37a   : > { %v1392_v17 = vsel %vm1107_vm10, %v1390_v34, %v1358_v20  ;;  %v1648_v31 = vsel %vm1107_vm10, %v1646_v23, %v1614_v12 }
 0x37b   : > { %v1394_v32 = vsel %vm1110_vm11, %v1392_v17, %v7907_v63  ;;  %v1118_v63 = vsel %vm1116_vm13, %v1115_v39, %v10274_v53  ;;  %v1962_v39 = vsel %vm1119_vm14, %v1960_v59, %v7898_v8 }
 0x37c   : > { %v1396_v0 = vsel %vm1113_vm12, %v1394_v32, %v7950_v11  ;;  %v3281_v20 = vrot.slane %v1962_v39, 4 }
 0x37d   : > { %v1398_v36 = vsel %vm1116_vm13, %v1396_v0, %v7969_v26  ;;  %v1593_v6 = vpop.permute.xlu1 %1592  ;;  %v1650_v26 = vsel %vm1110_vm11, %v1648_v31, %v7932_v16  ;;  %v1626_v57 = vpop.permute.xlu0 %1625 }
 0x37e   : > { %v1633_v11 = vsel %vm1107_vm10, %v1631_v22, %v1593_v6  ;;  %v1400_v38 = vsel %vm1119_vm14, %v1398_v36, %v1370_v41  ;;  %v1652_v27 = vsel %vm1113_vm12, %v1650_v26, %v7987_v13 }
 0x37f   : > { %v1635_v58 = vsel %vm1110_vm11, %v1633_v11, %v7928_v37  ;;  %v3278_v29 = vrot.slane %v1400_v38, 4  ;;  %v1654_v41 = vsel %vm1116_vm13, %v1652_v27, %v8002_v48  ;;  %v1121_v37 = vsel %vm1119_vm14, %v1118_v63, %v10276_v3  ;;  %v10277_v3 = vld [vmem:[#allocation39_spill] sm:$0xff] }
 0x380   : > { %v1656_v16 = vsel %vm1119_vm14, %v1654_v41, %v1626_v57  ;;  %v3293_v18 = vsel %vm3291_vm15, %v1121_v37, %v3277_v55  ;;  %v1637_v13 = vsel %vm1113_vm12, %v1635_v58, %v7996_v61 }
 0x381   : > { %v2970_v1 = vpop.permute.xlu1 %2969  ;;  %v3296_v4 = vsel %vm3291_vm15, %v1136_v2, %v3278_v29  ;;  %v3302_v48 = vsel %vm3291_vm15, %v1656_v16, %v3282_v28  ;;  %v1639_v44 = vsel %vm1116_vm13, %v1637_v13, %v8013_v51  ;;  %v1605_v34 = vpop.permute.xlu0 %1604 }
 0x382   : > { %3329 = vmatprep.subr.bf16.mxu0 %v3296_v4  ;;  %v1641_v19 = vsel %vm1119_vm14, %v1639_v44, %v1605_v34  ;;  %v3006_v37 = vsel %vm1100_vm8, %v10277_v3, %v2970_v1 }
 0x383   : > { %3330 = vmatpush1.bf16.msra.mxu0 %v3293_v18  ;;  %v3299_v30 = vsel %vm3291_vm15, %v1641_v19, %v3281_v20  ;;  %v10278_v20 = vld [vmem:[#allocation3_spill] sm:$0xff] }
 0x384   : > { %3331 = vmatprep.subr.bf16.mxu0 %v3302_v48 }
 0x385   : > { %v2949_v54 = vpop.permute.xlu1 %2948  ;;  %v2973_v61 = vpop.permute.xlu0 %2972 }
 0x386   : > { %v3008_v13 = vsel %vm1104_vm9, %v3006_v37, %v2973_v61  ;;  %v2991_v1 = vsel %vm1100_vm8, %v10278_v20, %v2949_v54  ;;  %v10281_v37 = vld [vmem:[#allocation30_spill] sm:$0xff] }
 0x387   : > { %3332 = vmatpush1.bf16.msra.mxu0 %v3299_v30 }
 0x389   : > { %v8156_v21 = vpop.permute.xlu1 %2984  ;;  %v2952_v8 = vpop.permute.xlu0 %2951 }
 0x38d   : > { %v8158_v62 = vpop.permute.xlu1 %3204  ;;  %v8162_v25 = vpop.permute.xlu0 %2981 }
 0x391   : > { %v8160_v17 = vpop.permute.xlu1 %3207  ;;  %v8164_v52 = vpop.permute.xlu0 %2960 }
 0x395   : > { %v2429_v32 = vpop.permute.xlu1 %2428  ;;  %v8168_v14 = vpop.permute.xlu0 %2963 }
 0x399   : > { %v8166_v51 = vpop.permute.xlu1 %2172  ;;  %v8170_v9 = vpop.permute.xlu0 %3225 }
 0x39d   : > { %v2976_v7 = vpop.permute.xlu1 %2975  ;;  %v8172_v56 = vpop.permute.xlu0 %3228 }
 0x39e   : > { %v3010_v44 = vsel %vm1107_vm10, %v3008_v13, %v2976_v7  ;;  %v2993_v7 = vsel %vm1104_vm9, %v2991_v1, %v2952_v8  ;;  %v10287_v1 = vld [vmem:[#allocation37_spill] sm:$0xff] }
 0x39f   : > { %v3012_v54 = vsel %vm1110_vm11, %v3010_v44, %v8004_v47 }
 0x3a1   : > { %v2955_v49 = vpop.permute.xlu1 %2954  ;;  %v2450_v53 = vpop.permute.xlu0 %2449 }
 0x3a5   : > { %v8174_v0 = vpop.permute.xlu1 %2987  ;;  %v2194_v23 = vpop.permute.xlu0 %2193 }
 0x3a9   : > { %v8176_v63 = vpop.permute.xlu1 %3231  ;;  %v8178_v36 = vpop.permute.xlu0 %2966 }
 0x3ad   : > { %v2441_v22 = vpop.permute.xlu1 %2440  ;;  %v8180_v12 = vpop.permute.xlu0 %3210 }
 0x3ae   : > { %v2477_v4 = vsel %vm1100_vm8, %v7895_v43, %v2441_v22  ;;  %v10279_v22 = vld [vmem:[#allocation31_spill] sm:$0xff] }
 0x3b1   : > { %v2420_v6 = vpop.permute.xlu1 %2419  ;;  %v2444_v55 = vpop.permute.xlu0 %2443 }
 0x3b2   : > { %v2479_v28 = vsel %vm1104_vm9, %v2477_v4, %v2444_v55  ;;  %v2462_v19 = vsel %vm1100_vm8, %v7913_v35, %v2420_v6  ;;  %v2995_v4 = vsel %vm1107_vm10, %v2993_v7, %v2955_v49 }
 0x3b3   : > { %v2997_v49 = vsel %vm1110_vm11, %v2995_v4, %v8043_v42  ;;  %v10290_v4 = vld [vmem:[#allocation26_spill] sm:$0xff] }
 0x3b5   : > { %v2185_v15 = vpop.permute.xlu1 %2184  ;;  %v2423_v31 = vpop.permute.xlu0 %2422 }
 0x3b6   : > { %v2221_v39 = vsel %vm1100_vm8, %v7926_v5, %v2185_v15  ;;  %v10280_v5 = vld [vmem:[#allocation11_spill] sm:$0xff]  ;;  %v2464_v55 = vsel %vm1104_vm9, %v2462_v19, %v2423_v31 }
 0x3b7   : > { %v2750_v15 = vsel %vm1100_vm8, %v10280_v5, %v10279_v22  ;;  %v10288_v5 = vld [vmem:[#allocation38_spill] sm:$0xff] }
 0x3b8   : > { %v2752_v8 = vsel %vm1104_vm9, %v2750_v15, %v10281_v37  ;;  %v10291_v37 = vld [vmem:[#allocation5_spill] sm:$0xff] }
 0x3b9   : > { %v2164_v11 = vpop.permute.xlu1 %2163  ;;  %v2188_v59 = vpop.permute.xlu0 %2187 }
 0x3ba   : > { %v2223_v34 = vsel %vm1104_vm9, %v2221_v39, %v2188_v59  ;;  %v2206_v31 = vsel %vm1100_vm8, %v7923_v24, %v2164_v11  ;;  %v10283_v11 = vld [vmem:[#allocation33_spill] sm:$0xff] }
 0x3bd   : > { %v2167_v38 = vpop.permute.xlu1 %2166  ;;  %v2453_v26 = vpop.permute.xlu0 %2452 }
 0x3c1   : > { %v2432_v58 = vpop.permute.xlu1 %2431  ;;  %v2456_v27 = vpop.permute.xlu0 %2455 }
 0x3c5   : > { %v2435_v29 = vpop.permute.xlu1 %2434  ;;  %v2197_v2 = vpop.permute.xlu0 %2196 }
 0x3c9   : > { %v2200_v40 = vpop.permute.xlu1 %2199  ;;  %v2176_v57 = vpop.permute.xlu0 %2175 }
 0x3cd   : > { %v8182_v41 = vpop.permute.xlu1 %2178  ;;  %v2191_v18 = vpop.permute.xlu0 %2190 }
 0x3ce   : > { %v2225_v30 = vsel %vm1107_vm10, %v2223_v34, %v2191_v18  ;;  %v10286_v34 = vld [vmem:[#allocation27_spill] sm:$0xff] }
 0x3cf   : > { %v2227_v6 = vsel %vm1110_vm11, %v2225_v30, %v2194_v23  ;;  %v3014_v23 = vsel %vm1113_vm12, %v3012_v54, %v8162_v25  ;;  %v10285_v25 = vld [vmem:[#allocation35_spill] sm:$0xff] }
 0x3d0   : > { %v2229_v24 = vsel %vm1113_vm12, %v2227_v6, %v2197_v2  ;;  %v3016_v20 = vsel %vm1116_vm13, %v3014_v23, %v8156_v21  ;;  %v2999_v2 = vsel %vm1113_vm12, %v2997_v49, %v8164_v52  ;;  %v10293_v23 = vld [vmem:[#allocation32_spill] sm:$0xff] }
 0x3d1   : > { %v2447_v16 = vpop.permute.xlu1 %2446 }
 0x3d2   : > { %v2481_v48 = vsel %vm1107_vm10, %v2479_v28, %v2447_v16  ;;  %v10282_v16 = vld [vmem:[#allocation36_spill] sm:$0xff] }
 0x3d3   : > { %v2483_v43 = vsel %vm1110_vm11, %v2481_v48, %v2450_v53  ;;  %v2459_v53 = vpop.permute.xlu0 %2458  ;;  %v2754_v47 = vsel %vm1107_vm10, %v2752_v8, %v10282_v16 }
 0x3d4   : > { %v2485_v61 = vsel %vm1113_vm12, %v2483_v43, %v2453_v26  ;;  %v2756_v43 = vsel %vm1110_vm11, %v2754_v47, %v10286_v34 }
 0x3d5   : > { %v2426_v59 = vpop.permute.xlu1 %2425  ;;  %v2487_v3 = vsel %vm1116_vm13, %v2485_v61, %v2456_v27  ;;  %v2758_v19 = vsel %vm1113_vm12, %v2756_v43, %v10287_v1  ;;  %v2231_v61 = vsel %vm1116_vm13, %v2229_v24, %v2200_v40 }
 0x3d6   : > { %v2466_v35 = vsel %vm1107_vm10, %v2464_v55, %v2426_v59  ;;  %v2489_v13 = vsel %vm1119_vm14, %v2487_v3, %v2459_v53  ;;  %v10289_v55 = vld [vmem:[#allocation40_spill] sm:$0xff] }
 0x3d7   : > { %v2468_v26 = vsel %vm1110_vm11, %v2466_v35, %v2429_v32  ;;  %v2208_v32 = vsel %vm1104_vm9, %v2206_v31, %v2167_v38  ;;  %v2438_v18 = vpop.permute.xlu0 %2437  ;;  %v3286_v30 = vrot.slane %v2489_v13, 4  ;;  %v2760_v59 = vsel %vm1116_vm13, %v2758_v19, %v10289_v55  ;;  %v10295_v13 = vld [vmem:[#allocation6_spill] sm:$0xff] }
 0x3d8   : > { %v2470_v28 = vsel %vm1113_vm12, %v2468_v26, %v2432_v58  ;;  %v10284_v58 = vld [vmem:[#allocation12_spill] sm:$0xff]  ;;  %v2762_v8 = vsel %vm1119_vm14, %v2760_v59, %v10291_v37 }
 0x3d9   : > { %v2170_v27 = vpop.permute.xlu1 %2169  ;;  %v2735_v48 = vsel %vm1100_vm8, %v10284_v58, %v10283_v11  ;;  %v2472_v44 = vsel %vm1116_vm13, %v2470_v28, %v2435_v29 }
 0x3da   : > { %v2210_v39 = vsel %vm1107_vm10, %v2208_v32, %v2170_v27  ;;  %v2737_v38 = vsel %vm1104_vm9, %v2735_v48, %v10285_v25  ;;  %v2474_v7 = vsel %vm1119_vm14, %v2472_v44, %v2438_v18  ;;  %v10294_v27 = vld [vmem:[#allocation4_spill] sm:$0xff] }
 0x3db   : > { %v2212_v42 = vsel %vm1110_vm11, %v2210_v39, %v8166_v51  ;;  %v3018_v51 = vsel %vm1119_vm14, %v3016_v20, %v8174_v0  ;;  %v2203_v22 = vpop.permute.xlu0 %2202  ;;  %v2739_v15 = vsel %vm1107_vm10, %v2737_v38, %v10288_v5  ;;  %v3001_v0 = vsel %vm1116_vm13, %v2999_v2, %v8168_v14  ;;  %v10292_v14 = vld [vmem:[#allocation8_spill] sm:$0xff] }
 0x3dc   : > { %v2233_v21 = vsel %vm1119_vm14, %v2231_v61, %v2203_v22  ;;  %v2214_v52 = vsel %vm1113_vm12, %v2212_v42, %v2176_v57  ;;  %v3290_v54 = vrot.slane %v3018_v51, 4  ;;  %v3003_v40 = vsel %vm1119_vm14, %v3001_v0, %v8178_v36 }
 0x3dd   : > { %v3238_v29 = vpop.permute.xlu1 %3237  ;;  %v3308_v53 = vsel %vm3291_vm15, %v2233_v21, %v3286_v30  ;;  %v2741_v35 = vsel %vm1110_vm11, %v2739_v15, %v10290_v4  ;;  %v3285_v6 = vrot.slane %v2474_v7, 4  ;;  %v2216_v57 = vsel %vm1116_vm13, %v2214_v52, %v8182_v41 }
 0x3de   : > { %3333 = vmatprep.subr.bf16.mxu0 %v3308_v53  ;;  %v3247_v31 = vsel %vm1100_vm8, %v10292_v14, %v8158_v62  ;;  %v3262_v36 = vsel %vm1100_vm8, %v7802_v50, %v8170_v9  ;;  %v3289_v47 = vrot.slane %v3003_v40, 4  ;;  %v2743_v32 = vsel %vm1113_vm12, %v2741_v35, %v10293_v23 }
 0x3df   : > { %v3217_v3 = vpop.permute.xlu0 %3216  ;;  %v3249_v16 = vsel %vm1104_vm9, %v3247_v31, %v8160_v17  ;;  %v3264_v41 = vsel %vm1104_vm9, %v3262_v36, %v8172_v56  ;;  %v3314_v9 = vsel %vm3291_vm15, %v2762_v8, %v3290_v54  ;;  %v2745_v17 = vsel %vm1116_vm13, %v2743_v32, %v10294_v27 }
 0x3e0   : > { %v3266_v62 = vsel %vm1107_vm10, %v3264_v41, %v8176_v63  ;;  %v3251_v50 = vsel %vm1107_vm10, %v3249_v16, %v8180_v12  ;;  %v2747_v39 = vsel %vm1119_vm14, %v2745_v17, %v10295_v13 }
 0x3e1   : > { %v2182_v26 = vpop.permute.xlu1 %2181  ;;  %v3268_v24 = vsel %vm1110_vm11, %v3266_v62, %v8069_v10  ;;  %v3253_v63 = vsel %vm1110_vm11, %v3251_v50, %v8015_v33  ;;  %v3311_v12 = vsel %vm3291_vm15, %v2747_v39, %v3289_v47  ;;  %v754_v33 = vld [vmem:[%s10150_s4] sm:$0xf] }
 0x3e2   : > { %v2218_v28 = vsel %vm1119_vm14, %v2216_v57, %v2182_v26  ;;  %v3270_v11 = vsel %vm1113_vm12, %v3268_v24, %v3238_v29  ;;  %v3255_v58 = vsel %vm1113_vm12, %v3253_v63, %v3217_v3 }
 0x3e3   : > { %v3305_v49 = vsel %vm3291_vm15, %v2218_v28, %v3285_v6  ;;  %v3220_v56 = vpop.permute.xlu0 %3219 }
 0x3e4   : > { %3334 = vmatpush1.bf16.msra.mxu0 %v3305_v49  ;;  %v3257_v42 = vsel %vm1116_vm13, %v3255_v58, %v3220_v56 }
 0x3e5   : > { %v3241_v18 = vpop.permute.xlu1 %3240  ;;  %3335 = vmatprep.subr.bf16.mxu0 %v3314_v9 }
 0x3e6   : > { %v3272_v48 = vsel %vm1116_vm13, %v3270_v11, %v3241_v18 }
 0x3e7   : > { %v3223_v25 = vpop.permute.xlu0 %3222 }
 0x3e8   : > { %3336 = vmatpush1.bf16.msra.mxu0 %v3311_v12  ;;  %v3259_v10 = vsel %vm1119_vm14, %v3257_v42, %v3223_v25 }
 0x3e9   : > { %v3244_v44 = vpop.permute.xlu1 %3243  ;;  %v3325_v34 = vsel %vm3291_vm15, %v3259_v10, 0 }
 0x3ea   : > { %v3274_v38 = vsel %vm1119_vm14, %v3272_v48, %v3244_v44 }
 0x3eb   : > { %6389 = vmatprep.subr.msk.bf16.mxu0 %vm3291_vm15, %v3274_v38 }
 0x3ec   : > { %3338 = vmatpush1.bf16.msra.mxu0 %v3325_v34 }
 0x3ef   : > { %6390 = vmatmul.mubr.msk.bf16.vlgmr.msra.gmra.mrb[8].mxu0 %vm3321_vm0, %v754_v33 }
 0x3f6   : > { %v3319_v43 = vpop.permute.xlu0 %3318 }
 0x4c2   : > { %v3363_v20 = vpop.f32.mrb[8].mxu0 }
 0x4c3   : > { %v3364_v2 = vadd.f32 %v3363_v20, %v3319_v43  ;;  %v3365_v1 = vpop.f32.mrb[9].mxu0 }
 0x4c4   : > { %v3367_v19 = vpop.f32.mrb[10].mxu0  ;;  %v3366_v29 = vadd.f32 %v3365_v1, %v3319_v43 }
 0x4c5   : > { %v3370_v51 = vmax.f32 %v3364_v2, 0.0  ;;  %v3368_v30 = vpop.f32.mrb[11].mxu0 }
 0x4c6   : > { %v8312_v61 = vmax.f32 %v3366_v29, 0.0 }
 0x4c7   : > { %3379 = vrot.lane.b32.xlu0 %v3370_v51, %s6482_s29  ;;  %3373 = vrot.lane.b32.xlu1 %v3370_v51, %s6484_s9 }
 0x4cb   : > { %3385 = vrot.lane.b32.xlu0 %v3370_v51, %s6485_s10  ;;  %3376 = vrot.lane.b32.xlu1 %v3370_v51, %s6483_s30 }
 0x4cf   : > { %3391 = vrot.lane.b32.xlu0 %v3370_v51, %s6480_s25  ;;  %3382 = vrot.lane.b32.xlu1 %v3370_v51, %s6479_s24 }
 0x4d3   : > { %3398 = vrot.lane.b32.xlu0 %v8312_v61, %s6483_s30  ;;  %3388 = vrot.lane.b32.xlu1 %v3370_v51, %s6481_s26 }
 0x4d7   : > { %3404 = vrot.lane.b32.xlu0 %v8312_v61, %s6479_s24  ;;  %3395 = vrot.lane.b32.xlu1 %v8312_v61, %s6484_s9 }
 0x4db   : > { %3410 = vrot.lane.b32.xlu0 %v8312_v61, %s6481_s26  ;;  %3401 = vrot.lane.b32.xlu1 %v8312_v61, %s6482_s29 }
 0x4df   : > { %3407 = vrot.lane.b32.xlu1 %v8312_v61, %s6485_s10 }
 0x4e3   : > { %3413 = vrot.lane.b32.xlu1 %v8312_v61, %s6480_s25 }
 0x539   : > { %v3380_v22 = vpop.permute.xlu0 %3379  ;;  %v3374_v5 = vpop.permute.xlu1 %3373 }
 0x53a   : > { %v3432_v6 = vcombine.low %v3374_v5, %v3380_v22  ;;  %v3433_v57 = vcombine.high %v3374_v5, %v3380_v22 }
 0x53c   : > { %v3440_v16 = vrot.slane %v3432_v6, %v6804_v60  ;;  %v8336_v49 = vrot.slane %v3433_v57, %v6804_v60 }
 0x53d   : > { %v3386_v15 = vpop.permute.xlu0 %3385  ;;  %v3377_v7 = vpop.permute.xlu1 %3376 }
 0x53e   : > { %v3416_v4 = vcombine.low %v3370_v51, %v3377_v7  ;;  %v3417_v31 = vcombine.high %v3370_v51, %v3377_v7 }
 0x540   : > { %v3424_v36 = vrot.slane %v3416_v4, %v6804_v60  ;;  %v3431_v56 = vrot.slane %v3417_v31, %v6804_v60 }
 0x541   : > { %v3392_v21 = vpop.permute.xlu0 %3391  ;;  %v3383_v52 = vpop.permute.xlu1 %3382 }
 0x542   : > { %v3464_v35 = vcombine.low %v3386_v15, %v3392_v21  ;;  %v3480_v13 = vcombine.low %v3424_v36, %v3440_v16  ;;  %v3465_v39 = vcombine.high %v3386_v15, %v3392_v21  ;;  %v3481_v43 = vcombine.high %v3424_v36, %v3440_v16 }
 0x543   : > { %v3497_v31 = vcombine.high %v3431_v56, %v8336_v49 }
 0x544   : > { %v3472_v28 = vrot.slane %v3464_v35, %v6804_v60  ;;  %v3488_v20 = vrot.slane %v3480_v13, %v7019_v45  ;;  %v3479_v2 = vrot.slane %v3465_v39, %v6804_v60 }
 0x545   : > { %v3399_v55 = vpop.permute.xlu0 %3398  ;;  %v3389_v59 = vpop.permute.xlu1 %3388 }
 0x546   : > { %v3448_v54 = vcombine.low %v3383_v52, %v3389_v59  ;;  %v3552_v14 = vcombine.low %v8312_v61, %v3399_v55  ;;  %v3449_v23 = vcombine.high %v3383_v52, %v3389_v59  ;;  %v3553_v24 = vcombine.high %v8312_v61, %v3399_v55 }
 0x547   : > { %v3495_v59 = vrot.slane %v3481_v43, %v7019_v45 }
 0x548   : > { %v3456_v3 = vrot.slane %v3448_v54, %v6804_v60  ;;  %v3560_v9 = vrot.slane %v3552_v14, %v6804_v60  ;;  %v3463_v48 = vrot.slane %v3449_v23, %v6804_v60  ;;  %v3567_v19 = vrot.slane %v3553_v24, %v6804_v60 }
 0x549   : > { %v3396_v0 = vpop.permute.xlu1 %3395  ;;  %v3405_v53 = vpop.permute.xlu0 %3404 }
 0x54a   : > { %v3512_v32 = vcombine.low %v3456_v3, %v3472_v28  ;;  %v3513_v42 = vcombine.high %v3456_v3, %v3472_v28  ;;  %v3528_v22 = vcombine.low %v3463_v48, %v3479_v2 }
 0x54c   : > { %v3520_v44 = vrot.slane %v3512_v32, %v7019_v45  ;;  %v3527_v61 = vrot.slane %v3513_v42, %v7019_v45  ;;  %v3536_v57 = vrot.slane %v3528_v22, %v7019_v45 }
 0x54d   : > { %v3402_v40 = vpop.permute.xlu1 %3401  ;;  %v3411_v37 = vpop.permute.xlu0 %3410 }
 0x54e   : > { %v3568_v26 = vcombine.low %v3396_v0, %v3402_v40  ;;  %v3584_v41 = vcombine.low %v3405_v53, %v3411_v37  ;;  %v3585_v62 = vcombine.high %v3405_v53, %v3411_v37  ;;  %v3569_v27 = vcombine.high %v3396_v0, %v3402_v40 }
 0x54f   : > { %v3545_v5 = vcombine.high %v3488_v20, %v3520_v44  ;;  %v3544_v15 = vcombine.low %v3488_v20, %v3520_v44  ;;  %v3496_v0 = vcombine.low %v3431_v56, %v8336_v49  ;;  %v3547_v3 = vcombine.high %v3495_v59, %v3527_v61 }
 0x550   : > { %v3576_v47 = vrot.slane %v3568_v26, %v6804_v60  ;;  %v3592_v63 = vrot.slane %v3584_v41, %v6804_v60  ;;  %v3599_v25 = vrot.slane %v3585_v62, %v6804_v60  ;;  %v3583_v38 = vrot.slane %v3569_v27, %v6804_v60 }
 0x551   : > { %v3408_v8 = vpop.permute.xlu1 %3407  ;;  %v3529_v26 = vcombine.high %v3463_v48, %v3479_v2  ;;  %v3546_v14 = vcombine.low %v3495_v59, %v3527_v61  ;;  %v3504_v36 = vrot.slane %v3496_v0, %v7019_v45  ;;  %v3511_v49 = vrot.slane %v3497_v31, %v7019_v45 }
 0x552   : > { %v3616_v12 = vcombine.low %v3560_v9, %v3576_v47  ;;  %v3617_v10 = vcombine.high %v3560_v9, %v3576_v47  ;;  %v3632_v21 = vcombine.low %v3567_v19, %v3583_v38  ;;  %v3633_v37 = vcombine.high %v3567_v19, %v3583_v38 }
 0x553   : > { %v3543_v32 = vrot.slane %v3529_v26, %v7019_v45  ;;  %v3548_v9 = vcombine.low %v3504_v36, %v3536_v57 }
 0x554   : > { %v3624_v51 = vrot.slane %v3616_v12, %v7019_v45  ;;  %v3631_v7 = vrot.slane %v3617_v10, %v7019_v45  ;;  %v3647_v62 = vrot.slane %v3633_v37, %v7019_v45 }
 0x555   : > { %v3414_v50 = vpop.permute.xlu1 %3413  ;;  %v3551_v13 = vcombine.high %v3511_v49, %v3543_v32  ;;  %v3550_v39 = vcombine.low %v3511_v49, %v3543_v32 }
 0x556   : > { %v3600_v17 = vcombine.low %v3408_v8, %v3414_v50  ;;  %v3601_v18 = vcombine.high %v3408_v8, %v3414_v50  ;;  %v3640_v8 = vrot.slane %v3632_v21, %v7019_v45  ;;  %v3549_v50 = vcombine.high %v3504_v36, %v3536_v57 }
 0x558   : > { %v3608_v11 = vrot.slane %v3600_v17, %v6804_v60  ;;  %v3615_v58 = vrot.slane %v3601_v18, %v6804_v60 }
 0x55a   : > { %v3648_v34 = vcombine.low %v3592_v63, %v3608_v11  ;;  %v3649_v33 = vcombine.high %v3592_v63, %v3608_v11  ;;  %v3664_v1 = vcombine.low %v3599_v25, %v3615_v58  ;;  %v3665_v53 = vcombine.high %v3599_v25, %v3615_v58 }
 0x55c   : > { %v3656_v30 = vrot.slane %v3648_v34, %v7019_v45  ;;  %v3663_v29 = vrot.slane %v3649_v33, %v7019_v45  ;;  %v3672_v54 = vrot.slane %v3664_v1, %v7019_v45  ;;  %v3679_v28 = vrot.slane %v3665_v53, %v7019_v45 }
 0x55e   : > { %v3681_v52 = vcombine.high %v3624_v51, %v3656_v30  ;;  %v3680_v55 = vcombine.low %v3624_v51, %v3656_v30  ;;  %v3683_v35 = vcombine.high %v3631_v7, %v3663_v29  ;;  %v3682_v6 = vcombine.low %v3631_v7, %v3663_v29 }
 0x55f   : > { %v3685_v47 = vcombine.high %v3640_v8, %v3672_v54  ;;  %v3684_v23 = vcombine.low %v3640_v8, %v3672_v54  ;;  %v3687_v18 = vcombine.high %v3647_v62, %v3679_v28  ;;  %v3686_v56 = vcombine.low %v3647_v62, %v3679_v28 }
 0x560   : > { %v3689_v40 = vpack.c.bf16 %v3681_v52, %v3545_v5  ;;  %v3688_v4 = vpack.c.bf16 %v3680_v55, %v3544_v15  ;;  %v3691_v16 = vpack.c.bf16 %v3683_v35, %v3547_v3  ;;  %v3690_v41 = vpack.c.bf16 %v3682_v6, %v3546_v14 }
 0x561   : > { %v3693_v27 = vpack.c.bf16 %v3685_v47, %v3549_v50  ;;  %v3692_v17 = vpack.c.bf16 %v3684_v23, %v3548_v9  ;;  %v3695_v24 = vpack.c.bf16 %v3687_v18, %v3551_v13  ;;  %v3694_v63 = vpack.c.bf16 %v3686_v56, %v3550_v39 }
 0x562   : > { %3708 = vrot.lane.b32.xlu1 %v3689_v40, %s6473_s19  ;;  %3706 = vrot.lane.b32.xlu0 %v3688_v4, %s6473_s19 }
 0x566   : > { %3712 = vrot.lane.b32.xlu1 %v3691_v16, %s6473_s19  ;;  %3710 = vrot.lane.b32.xlu0 %v3690_v41, %s6473_s19 }
 0x56a   : > { %3716 = vrot.lane.b32.xlu1 %v3693_v27, %s6473_s19  ;;  %3714 = vrot.lane.b32.xlu0 %v3692_v17, %s6473_s19 }
 0x56e   : > { %3720 = vrot.lane.b32.xlu1 %v3695_v24, %s6473_s19  ;;  %3718 = vrot.lane.b32.xlu0 %v3694_v63, %s6473_s19  ;;  %s6397_s19 = sshll.u32 %s10369_s28, 4 }
 0x5d4   : > { %v3709_v12 = vpop.permute.xlu1 %3708  ;;  %v3707_v11 = vpop.permute.xlu0 %3706 }
 0x5d5   : > { %v3725_v58 = vsel %vm780_vm1, 0, %v3709_v12  ;;  %v3723_v48 = vsel %vm780_vm1, 0, %v3707_v11 }
 0x5d6   : > { %v3739_v42 = vsel %vm798_vm2, %v3725_v58, 0  ;;  %v3738_v44 = vsel %vm798_vm2, %v3723_v48, 0 }
 0x5d7   : > { %v3752_v25 = vshrl.u32 %v3739_v42, 16  ;;  %v3746_v38 = vshrl.u32 %v3738_v44, 16  ;;  %v3755_v10 = vshll.u32 %v3739_v42, 16  ;;  %v3749_v34 = vshll.u32 %v3738_v44, 16 }
 0x5d8   : > { %v3713_v33 = vpop.permute.xlu1 %3712  ;;  %v3711_v43 = vpop.permute.xlu0 %3710 }
 0x5d9   : > { %v3754_v20 = vrot.slane %v3752_v25, 7  ;;  %v3748_v2 = vrot.slane %v3746_v38, 7  ;;  %v3729_v1 = vsel %vm780_vm1, 0, %v3713_v33  ;;  %v3727_v19 = vsel %vm780_vm1, 0, %v3711_v43 }
 0x5da   : > { %v3741_v51 = vsel %vm798_vm2, %v3729_v1, 0  ;;  %v3740_v61 = vsel %vm798_vm2, %v3727_v19, 0 }
 0x5db   : > { %v3757_v30 = vor.u32 %v3755_v10, %v3754_v20  ;;  %v3751_v29 = vor.u32 %v3749_v34, %v3748_v2  ;;  %v3819_v21 = vsel %vm6572_vm5, %v3754_v20, 0  ;;  %v3764_v55 = vshrl.u32 %v3741_v51, 16 }
 0x5dc   : > { %v3717_v22 = vpop.permute.xlu1 %3716  ;;  %v3715_v5 = vpop.permute.xlu0 %3714  ;;  %v8395_v59 = vsel %vm6572_vm5, %v3748_v2, 0  ;;  %v3758_v0 = vshrl.u32 %v3740_v61, 16  ;;  %v3767_v54 = vshll.u32 %v3741_v51, 16  ;;  %v4602_v35 = vshll.u32 %v3819_v21, 16 }
 0x5dd   : > { %v8385_v7 = vsel %vm6572_vm5, 0, %v3757_v30  ;;  %v8391_v52 = vsel %vm6572_vm5, 0, %v3751_v29  ;;  %v3766_v53 = vrot.slane %v3764_v55, 7  ;;  %v3733_v40 = vsel %vm780_vm1, 0, %v3717_v22 }
 0x5de   : > { %4076 = vrot.lane.b32.xlu1 %v8385_v7, %s6474_s22  ;;  %4074 = vrot.lane.b32.xlu0 %v8391_v52, %s6474_s22  ;;  %v3731_v4 = vsel %vm780_vm1, 0, %v3715_v5  ;;  %v3760_v6 = vrot.slane %v3758_v0, 7  ;;  %v3761_v26 = vshll.u32 %v3740_v61, 16  ;;  %v3743_v57 = vsel %vm798_vm2, %v3733_v40, 0 }
 0x5df   : > { %v3769_v3 = vor.u32 %v3767_v54, %v3766_v53  ;;  %v3776_v37 = vshrl.u32 %v3743_v57, 16  ;;  %v3742_v8 = vsel %vm798_vm2, %v3731_v4, 0  ;;  %v5430_v14 = vrot.slane %v3819_v21, 1 }
 0x5e0   : > { %v4592_v31 = vshll.u32 %v8395_v59, 16  ;;  %v3763_v36 = vor.u32 %v3761_v26, %v3760_v6  ;;  %v3721_v28 = vpop.permute.xlu1 %3720  ;;  %v5427_v16 = vrot.slane %v8395_v59, 1  ;;  %v3779_v23 = vshll.u32 %v3743_v57, 16  ;;  %v3719_v49 = vpop.permute.xlu0 %3718 }
 0x5e1   : > { %v8409_v41 = vsel %vm6572_vm5, 0, %v3769_v3  ;;  %v3778_v47 = vrot.slane %v3776_v37, 7  ;;  %v8411_v32 = vrot.slane %v4602_v35, 1  ;;  %v8415_v62 = vsel %vm6572_vm5, %v3766_v53, 0 }
 0x5e2   : > { %v8419_v50 = vsel %vm6572_vm5, 0, %v3763_v36  ;;  %v3770_v9 = vshrl.u32 %v3742_v8, 16  ;;  %4080 = vrot.lane.b32.xlu1 %v8409_v41, %s6474_s22  ;;  %v8425_v27 = vsel %vm6572_vm5, %v3760_v6, 0  ;;  %v3737_v18 = vsel %vm780_vm1, 0, %v3721_v28 }
 0x5e3   : > { %v3781_v17 = vor.u32 %v3779_v23, %v3778_v47  ;;  %4078 = vrot.lane.b32.xlu0 %v8419_v50, %s6474_s22  ;;  %v5429_v56 = vrot.slane %v8385_v7, 1  ;;  %v3773_v39 = vshll.u32 %v3742_v8, 16  ;;  %v3745_v24 = vsel %vm798_vm2, %v3737_v18, 0 }
 0x5e4   : > { %v3772_v13 = vrot.slane %v3770_v9, 7  ;;  %v5426_v63 = vrot.slane %v8391_v52, 1  ;;  %v4622_v12 = vshll.u32 %v8415_v62, 16  ;;  %v3788_v58 = vshrl.u32 %v3745_v24, 16 }
 0x5e5   : > { %v8436_v11 = vsel %vm6572_vm5, 0, %v3781_v17  ;;  %v3735_v48 = vsel %vm780_vm1, 0, %v3719_v49  ;;  %v5436_v42 = vrot.slane %v8415_v62, 1  ;;  %v4612_v44 = vshll.u32 %v8425_v27, 16 }
 0x5e6   : > { %v3775_v25 = vor.u32 %v3773_v39, %v3772_v13  ;;  %v3744_v38 = vsel %vm798_vm2, %v3735_v48, 0  ;;  %4084 = vrot.lane.b32.xlu1 %v8436_v11, %s6474_s22  ;;  %v3823_v10 = vsel %vm6572_vm5, %v3778_v47, 0  ;;  %v3790_v34 = vrot.slane %v3788_v58, 7 }
 0x5e7   : > { %v3791_v33 = vshll.u32 %v3745_v24, 16  ;;  %v3782_v43 = vshrl.u32 %v3744_v38, 16  ;;  %v8452_v2 = vsel %vm6572_vm5, %v3772_v13, 0  ;;  %v8455_v1 = vsel %vm2498_vm6, %v5429_v56, %v5430_v14 }
 0x5e8   : > { %v8448_v20 = vsel %vm6572_vm5, 0, %v3775_v25  ;;  %v8458_v19 = vsel %vm2498_vm6, %v5426_v63, %v5427_v16  ;;  %v8462_v30 = vsel %vm6572_vm5, %v3790_v34, 0  ;;  %v3785_v61 = vshll.u32 %v3744_v38, 16 }
 0x5e9   : > { %v3793_v51 = vor.u32 %v3791_v33, %v3790_v34  ;;  %v3784_v29 = vrot.slane %v3782_v43, 7  ;;  %4082 = vrot.lane.b32.xlu0 %v8448_v20, %s6474_s22  ;;  %v5433_v22 = vrot.slane %v8425_v27, 1  ;;  %v4642_v5 = vshll.u32 %v3823_v10, 16 }
 0x5ea   : > { %v5455_v21 = vshrl.u32 %v8455_v1, 16  ;;  %v8470_v55 = vpack.i.b16 %v8455_v1, %v8458_v19  ;;  %v5454_v40 = vshrl.u32 %v8458_v19, 16  ;;  %v5442_v4 = vrot.slane %v3823_v10, 1 }
 0x5eb   : > { %v8474_v0 = vsel %vm6572_vm5, 0, %v3793_v51  ;;  %v3787_v53 = vor.u32 %v3785_v61, %v3784_v29  ;;  %v8478_v54 = vsel %vm6572_vm5, %v3784_v29, 0  ;;  %v5439_v35 = vrot.slane %v8452_v2, 1 }
 0x5ec   : > { %v5448_v6 = vrot.slane %v8462_v30, 1  ;;  %4088 = vrot.lane.b32.xlu1 %v8474_v0, %s6474_s22  ;;  %v5435_v26 = vrot.slane %v8409_v41, 1  ;;  %v8490_v3 = vpack.i.b16 %v5455_v21, %v5454_v40  ;;  %v5432_v37 = vrot.slane %v8419_v50, 1 }
 0x5ed   : > { %v8488_v57 = vsel %vm6572_vm5, 0, %v3787_v53  ;;  %v5441_v8 = vrot.slane %v8436_v11, 1  ;;  %v5445_v14 = vrot.slane %v8478_v54, 1  ;;  %v5438_v28 = vrot.slane %v8448_v20, 1 }
 0x5ee   : > { %4086 = vrot.lane.b32.xlu0 %v8488_v57, %s6474_s22  ;;  %v8498_v36 = vsel %vm2498_vm6, %v5435_v26, %v5436_v42  ;;  %v5447_v15 = vrot.slane %v8474_v0, 1  ;;  %v8504_v47 = vsel %vm2498_vm6, %v5432_v37, %v5433_v22  ;;  %v5444_v9 = vrot.slane %v8488_v57, 1 }
 0x5ef   : > { %v5463_v16 = vshrl.u32 %v8498_v36, 16  ;;  %v8507_v23 = vsel %vm2498_vm6, %v5441_v8, %v5442_v4  ;;  %v8514_v49 = vpack.i.b16 %v8498_v36, %v8504_v47  ;;  %v5462_v27 = vshrl.u32 %v8504_v47, 16 }
 0x5f0   : > { %4332 = vrot.lane.b32.xlu1 %v8385_v7, %s6475_s23  ;;  %v5471_v17 = vshrl.u32 %v8507_v23, 16  ;;  %v8519_v18 = vsel %vm2498_vm6, %v5438_v28, %v5439_v35  ;;  %v8527_v39 = vsel %vm2498_vm6, %v5447_v15, %v5448_v6  ;;  %v8530_v24 = vsel %vm2498_vm6, %v5444_v9, %v5445_v14 }
 0x5f1   : > { %v8523_v56 = vpack.i.b16 %v8507_v23, %v8519_v18  ;;  %v5470_v13 = vshrl.u32 %v8519_v18, 16  ;;  %v4594_v63 = vrot.slane %v4592_v31, 1  ;;  %v8536_v58 = vpack.i.b16 %v5463_v16, %v5462_v27 }
 0x5f2   : > { %4330 = vrot.lane.b32.xlu0 %v8391_v52, %s6475_s23  ;;  %v5479_v48 = vshrl.u32 %v8527_v39, 16  ;;  %v5478_v42 = vshrl.u32 %v8530_v24, 16  ;;  %v4632_v25 = vshll.u32 %v8452_v2, 16  ;;  %v4624_v31 = vrot.slane %v4622_v12, 1 }
 0x5f3   : > { %v8541_v38 = vpack.i.b16 %v5471_v17, %v5470_v13  ;;  %v5482_v10 = vcombine.low %v8470_v55, %v8523_v56  ;;  %v5483_v59 = vcombine.high %v8470_v55, %v8523_v56  ;;  %v4614_v34 = vrot.slane %v4612_v44, 1 }
 0x5f4   : > { %4336 = vrot.lane.b32.xlu1 %v8409_v41, %s6475_s23  ;;  %v8551_v33 = vpack.i.b16 %v5479_v48, %v5478_v42  ;;  %v4597_v43 = vshll.u32 %v8385_v7, 16  ;;  %v4644_v2 = vrot.slane %v4642_v5, 1  ;;  %v4587_v61 = vshll.u32 %v8391_v52, 16 }
 0x5f5   : > { %v5550_v51 = vcombine.low %v8490_v3, %v8541_v38  ;;  %v5551_v29 = vcombine.high %v8490_v3, %v8541_v38  ;;  %v10177_v44 = vshrl.u32 %v8385_v7, 16  ;;  %v4634_v5 = vrot.slane %v4632_v25, 1 }
 0x5f6   : > { %4334 = vrot.lane.b32.xlu0 %v8419_v50, %s6475_s23  ;;  %v5566_v62 = vcombine.low %v8536_v58, %v8551_v33  ;;  %v5567_v12 = vcombine.high %v8536_v58, %v8551_v33  ;;  %v4599_v22 = vrot.slane %v4597_v43, 1  ;;  %v10178_v21 = vshrl.u32 %v8391_v52, 16 }
 0x5f7   : > { %v4589_v53 = vrot.slane %v4587_v61, 1  ;;  %v4617_v40 = vshll.u32 %v8409_v41, 16  ;;  %v3839_v35 = vshrl.u32 %v8409_v41, 16  ;;  %v4607_v6 = vshll.u32 %v8419_v50, 16 }
 0x5f8   : > { %4340 = vrot.lane.b32.xlu1 %v8436_v11, %s6475_s23  ;;  %v4600_v4 = vor.u32 %v4599_v22, %v10177_v44  ;;  %v4637_v26 = vshll.u32 %v8436_v11, 16  ;;  %v3838_v14 = vshrl.u32 %v8419_v50, 16  ;;  %v10179_v28 = vshrl.u32 %v8436_v11, 16 }
 0x5f9   : > { %v4590_v37 = vor.u32 %v4589_v53, %v10178_v21  ;;  %v4619_v8 = vrot.slane %v4617_v40, 1  ;;  %v4609_v16 = vrot.slane %v4607_v6, 1  ;;  %v4627_v27 = vshll.u32 %v8448_v20, 16 }
 0x5fa   : > { %4338 = vrot.lane.b32.xlu0 %v8448_v20, %s6475_s23  ;;  %v8583_v15 = vsel %vm1657_vm7, %v4600_v4, %v8411_v32  ;;  %v4639_v9 = vrot.slane %v4637_v26, 1  ;;  %v4662_v17 = vshll.u32 %v8462_v30, 16  ;;  %v10180_v61 = vshrl.u32 %v8448_v20, 16 }
 0x5fb   : > { %v4671_v13 = vshrl.u32 %v8583_v15, 16  ;;  %v8589_v48 = vsel %vm1657_vm7, %v4590_v37, %v4594_v63  ;;  %v4620_v42 = vor.u32 %v4619_v8, %v3839_v35  ;;  %v4610_v30 = vor.u32 %v4609_v16, %v3838_v14 }
 0x5fc   : > { %4344 = vrot.lane.b32.xlu1 %v8474_v0, %s6475_s23  ;;  %v8597_v32 = vpack.i.b16 %v8583_v15, %v8589_v48  ;;  %v4670_v25 = vshrl.u32 %v8589_v48, 16  ;;  %v4640_v43 = vor.u32 %v4639_v9, %v10179_v28  ;;  %v4629_v22 = vrot.slane %v4627_v27, 1 }
 0x5fd   : > { %v8605_v63 = vsel %vm1657_vm7, %v4620_v42, %v4624_v31  ;;  %v4657_v53 = vshll.u32 %v8474_v0, 16  ;;  %v8615_v6 = vsel %vm1657_vm7, %v4610_v30, %v4614_v34  ;;  %v4652_v31 = vshll.u32 %v8478_v54, 16 }
 0x5fe   : > { %4342 = vrot.lane.b32.xlu0 %v8488_v57, %s6475_s23  ;;  %v8611_v40 = vpack.i.b16 %v4671_v13, %v4670_v25  ;;  %v4679_v4 = vshrl.u32 %v8605_v63, 16  ;;  %v8618_v26 = vsel %vm1657_vm7, %v4640_v43, %v4644_v2  ;;  %v4678_v37 = vshrl.u32 %v8615_v6, 16 }
 0x5ff   : > { %v4630_v8 = vor.u32 %v4629_v22, %v10180_v61  ;;  %v3855_v16 = vshrl.u32 %v8474_v0, 16  ;;  %v4687_v9 = vshrl.u32 %v8618_v26, 16  ;;  %v4659_v27 = vrot.slane %v4657_v53, 1 }
 0x600   : > { %5692 = vrot.lane.b32.xlu1 %v8455_v1, %s6474_s22  ;;  %v4647_v34 = vshll.u32 %v8488_v57, 16  ;;  %v3828_v2 = vpack.i.b16 %v8385_v7, %v8391_v52  ;;  %v8631_v13 = vpack.i.b16 %v4679_v4, %v4678_v37  ;;  %v3836_v42 = vpack.i.b16 %v8409_v41, %v8419_v50 }
 0x601   : > { %v8634_v54 = vsel %vm1657_vm7, %v4630_v8, %v4634_v5  ;;  %v3844_v25 = vpack.i.b16 %v8436_v11, %v8448_v20  ;;  %v4664_v30 = vrot.slane %v4662_v17, 1  ;;  %v4660_v22 = vor.u32 %v4659_v27, %v3855_v16 }
 0x602   : > { %5690 = vrot.lane.b32.xlu0 %v8458_v19, %s6474_s22  ;;  %v4686_v43 = vshrl.u32 %v8634_v54, 16  ;;  %v4649_v53 = vrot.slane %v4647_v34, 1  ;;  %v3854_v4 = vshrl.u32 %v8488_v57, 16  ;;  %v3852_v5 = vpack.i.b16 %v8474_v0, %v8488_v57 }
 0x603   : > { %v3859_v37 = vcombine.high %v3828_v2, %v3844_v25  ;;  %v3858_v8 = vcombine.low %v3828_v2, %v3844_v25  ;;  %v8651_v44 = vsel %vm1657_vm7, %v4660_v22, %v4664_v30  ;;  %v4654_v21 = vrot.slane %v4652_v31, 1 }
 0x604   : > { %5696 = vrot.lane.b32.xlu1 %v8498_v36, %s6474_s22  ;;  %v4688_v17 = vpack.i.b16 %v4687_v9, %v4686_v43  ;;  %v4650_v28 = vor.u32 %v4649_v53, %v3854_v4  ;;  %v3875_v27 = vcombine.high %v3836_v42, %v3852_v5  ;;  %v4695_v2 = vshrl.u32 %v8651_v44, 16 }
 0x605   : > { %v3874_v25 = vcombine.low %v3836_v42, %v3852_v5  ;;  %v5476_v9 = vpack.i.b16 %v8527_v39, %v8530_v24  ;;  %v8666_v31 = vrot.slane %v3859_v37, %v6804_v60  ;;  %v8675_v22 = vrot.slane %v3858_v8, %v6804_v60 }
 0x606   : > { %5694 = vrot.lane.b32.xlu0 %v8504_v47, %s6474_s22  ;;  %v4766_v34 = vcombine.low %v8611_v40, %v4688_v17  ;;  %v4767_v61 = vcombine.high %v8611_v40, %v4688_v17  ;;  %v8663_v30 = vsel %vm1657_vm7, %v4650_v28, %v4654_v21  ;;  %v8669_v43 = vrot.slane %v3875_v27, %v6804_v60 }
 0x607   : > { %v4694_v40 = vshrl.u32 %v8663_v30, 16  ;;  %v8678_v42 = vrot.slane %v3874_v25, %v6804_v60  ;;  %v5499_v5 = vcombine.high %v8514_v49, %v5476_v9  ;;  %v5498_v27 = vcombine.low %v8514_v49, %v5476_v9 }
 0x608   : > { %5700 = vrot.lane.b32.xlu1 %v8507_v23, %s6474_s22  ;;  %v3907_v21 = vcombine.high %v8666_v31, %v8669_v43  ;;  %v3906_v17 = vcombine.low %v8666_v31, %v8669_v43  ;;  %v8702_v25 = vrot.slane %v5483_v59, %v6804_v60  ;;  %v8734_v55 = vrot.slane %v5567_v12, %v6804_v60 }
 0x609   : > { %v4696_v28 = vpack.i.b16 %v4695_v2, %v4694_v40  ;;  %v3891_v53 = vcombine.high %v8675_v22, %v8678_v42  ;;  %v3890_v2 = vcombine.low %v8675_v22, %v8678_v42  ;;  %v8705_v40 = vrot.slane %v5499_v5, %v6804_v60 }
 0x60a   : > { %5698 = vrot.lane.b32.xlu0 %v8519_v18, %s6474_s22  ;;  %v8718_v9 = vrot.slane %v5498_v27, %v6804_v60  ;;  %v8769_v38 = vrot.slane %v4767_v61, %v6804_v60  ;;  %v8777_v33 = vrot.slane %v4766_v34, %v6804_v60  ;;  %v3840_v61 = vpack.i.b16 %v3839_v35, %v3838_v14 }
 0x60b   : > { %v4782_v37 = vcombine.low %v8631_v13, %v4696_v28  ;;  %v4783_v8 = vcombine.high %v8631_v13, %v4696_v28  ;;  %v5531_v49 = vcombine.high %v8702_v25, %v8705_v40  ;;  %v8715_v13 = vrot.slane %v5482_v10, %v6804_v60 }
 0x60c   : > { %5704 = vrot.lane.b32.xlu1 %v8527_v39, %s6474_s22  ;;  %v5530_v56 = vcombine.low %v8702_v25, %v8705_v40  ;;  %v8750_v10 = vrot.slane %v5566_v62, %v6804_v60  ;;  %v10297_v34 = vshrl.u32 %v8448_v20, 16  ;;  %v10298_v28 = vshrl.u32 %v8436_v11, 16 }
 0x60d   : > { %v5515_v59 = vcombine.high %v8715_v13, %v8718_v9  ;;  %v10299_v57 = vshrl.u32 %v8391_v52, 16  ;;  %v10300_v0 = vshrl.u32 %v8385_v7, 16  ;;  %v3905_v14 = vrot.slane %v3891_v53, %v7019_v45 }
 0x60e   : > { %5702 = vrot.lane.b32.xlu0 %v8530_v24, %s6474_s22  ;;  %v3848_v5 = vpack.i.b16 %v10298_v28, %v10297_v34  ;;  %v8859_v53 = vrot.slane %v3906_v17, %v7019_v45 }
 0x610   : > { %5948 = vrot.lane.b32.xlu1 %v8455_v1, %s6475_s23  ;;  %v8728_v1 = vrot.slane %v5551_v29, %v6804_v60  ;;  %v5514_v29 = vcombine.low %v8715_v13, %v8718_v9  ;;  %10301 = vst [vmem:[#allocation7_spill] sm:$0xff] %v8859_v53 }
 0x612   : > { %5946 = vrot.lane.b32.xlu0 %v8458_v19, %s6475_s23  ;;  %v8744_v19 = vrot.slane %v5550_v51, %v6804_v60  ;;  %v5598_v12 = vcombine.low %v8728_v1, %v8734_v55  ;;  %v5599_v58 = vcombine.high %v8728_v1, %v8734_v55  ;;  %v8780_v51 = vrot.slane %v4782_v37, %v6804_v60 }
 0x614   : > { %5952 = vrot.lane.b32.xlu1 %v8498_v36, %s6475_s23  ;;  %v5582_v3 = vcombine.low %v8744_v19, %v8750_v10  ;;  %v5583_v36 = vcombine.high %v8744_v19, %v8750_v10  ;;  %v4798_v62 = vcombine.low %v8777_v33, %v8780_v51  ;;  %v5613_v10 = vrot.slane %v5599_v58, %v7019_v45 }
 0x616   : > { %5950 = vrot.lane.b32.xlu0 %v8504_v47, %s6475_s23  ;;  %v8772_v47 = vrot.slane %v4783_v8, %v6804_v60 }
 0x618   : > { %5956 = vrot.lane.b32.xlu1 %v8507_v23, %s6475_s23  ;;  %v4814_v23 = vcombine.low %v8769_v38, %v8772_v47 }
 0x61a   : > { %5954 = vrot.lane.b32.xlu0 %v8519_v18, %s6475_s23  ;;  %v4815_v18 = vcombine.high %v8769_v38, %v8772_v47 }
 0x61c   : > { %5960 = vrot.lane.b32.xlu1 %v8527_v39, %s6475_s23  ;;  %v4799_v39 = vcombine.high %v8777_v33, %v8780_v51 }
 0x61e   : > { %5958 = vrot.lane.b32.xlu0 %v8530_v24, %s6475_s23  ;;  %v3856_v24 = vpack.i.b16 %v3855_v16, %v3854_v4  ;;  %v3921_v4 = vrot.slane %v3907_v21, %v7019_v45  ;;  %v8867_v21 = vrot.slane %v3890_v2, %v7019_v45  ;;  %v3923_v2 = vcombine.high %v3905_v14, %v10205_v46 }
 0x620   : > { %5164 = vrot.lane.b32.xlu1 %v8583_v15, %s6475_s23  ;;  %v3943_v50 = vcombine.high %v3840_v61, %v3856_v24  ;;  %v3942_v41 = vcombine.low %v3840_v61, %v3856_v24  ;;  %10302 = vst [vmem:[#allocation10_spill] sm:$0xff] %v8867_v21  ;;  %v3924_v24 = vcombine.high %v8859_v53, %v10205_v46 }
 0x621   : > { %v3922_v31 = vcombine.high %v8867_v21, %v10205_v46  ;;  %v3925_v17 = vcombine.high %v3921_v4, %v10205_v46 }
 0x622   : > { %5162 = vrot.lane.b32.xlu0 %v8589_v48, %s6475_s23  ;;  %v3957_v35 = vrot.slane %v3943_v50, %v6804_v60  ;;  %v3950_v7 = vrot.slane %v3942_v41, %v6804_v60  ;;  %v4692_v41 = vpack.i.b16 %v8651_v44, %v8663_v30 }
 0x624   : > { %5168 = vrot.lane.b32.xlu1 %v8605_v63, %s6475_s23 }
 0x626   : > { %5166 = vrot.lane.b32.xlu0 %v8615_v6, %s6475_s23 }
 0x628   : > { %5172 = vrot.lane.b32.xlu1 %v8618_v26, %s6475_s23 }
 0x62a   : > { %5170 = vrot.lane.b32.xlu0 %v8634_v54, %s6475_s23 }
 0x62c   : > { %5176 = vrot.lane.b32.xlu1 %v8651_v44, %s6475_s23 }
 0x62e   : > { %5174 = vrot.lane.b32.xlu0 %v8663_v30, %s6475_s23 }
 0x630   : > { %4908 = vrot.lane.b32.xlu1 %v8583_v15, %s6474_s22  ;;  %v3832_v15 = vpack.i.b16 %v10300_v0, %v10299_v57  ;;  %v5529_v57 = vrot.slane %v5515_v59, %v7019_v45  ;;  %v4676_v59 = vpack.i.b16 %v8605_v63, %v8615_v6 }
 0x632   : > { %4906 = vrot.lane.b32.xlu0 %v8589_v48, %s6474_s22  ;;  %v3927_v20 = vcombine.high %v3832_v15, %v3848_v5  ;;  %v3926_v11 = vcombine.low %v3832_v15, %v3848_v5  ;;  %v5545_v5 = vrot.slane %v5531_v49, %v7019_v45  ;;  %v5547_v58 = vcombine.high %v5529_v57, %v10205_v46 }
 0x634   : > { %4912 = vrot.lane.b32.xlu1 %v8605_v63, %s6474_s22  ;;  %v3941_v52 = vrot.slane %v3927_v20, %v6804_v60  ;;  %v3934_v48 = vrot.slane %v3926_v11, %v6804_v60  ;;  %v4684_v11 = vpack.i.b16 %v8618_v26, %v8634_v54 }
 0x636   : > { %4910 = vrot.lane.b32.xlu0 %v8615_v6, %s6474_s22  ;;  %v3974_v16 = vcombine.low %v3941_v52, %v3957_v35  ;;  %v3958_v37 = vcombine.low %v3934_v48, %v3950_v7  ;;  %v3975_v43 = vcombine.high %v3941_v52, %v3957_v35  ;;  %v3959_v42 = vcombine.high %v3934_v48, %v3950_v7 }
 0x637   : > { %v4715_v52 = vcombine.high %v4676_v59, %v4692_v41  ;;  %v4699_v63 = vcombine.high %v8597_v32, %v4684_v11 }
 0x638   : > { %4916 = vrot.lane.b32.xlu1 %v8618_v26, %s6474_s22  ;;  %v3982_v8 = vrot.slane %v3974_v16, %v7019_v45  ;;  %v3966_v27 = vrot.slane %v3958_v37, %v7019_v45  ;;  %v3989_v22 = vrot.slane %v3975_v43, %v7019_v45  ;;  %v3973_v28 = vrot.slane %v3959_v42, %v7019_v45 }
 0x639   : > { %v5606_v26 = vrot.slane %v5598_v12, %v7019_v45  ;;  %v4729_v40 = vrot.slane %v4715_v52, %v6804_v60  ;;  %v8950_v12 = vrot.slane %v5514_v29, %v7019_v45  ;;  %v4713_v48 = vrot.slane %v4699_v63, %v6804_v60 }
 0x63a   : > { %4914 = vrot.lane.b32.xlu0 %v8634_v54, %s6474_s22  ;;  %v3992_v50 = vcombine.high %v3982_v8, %v10205_v46  ;;  %v3993_v49 = vcombine.high %v3989_v22, %v10205_v46  ;;  %v3990_v35 = vcombine.high %v3966_v27, %v10205_v46  ;;  %v5549_v43 = vcombine.high %v5545_v5, %v10205_v46 }
 0x63b   : > { %10304 = vst [vmem:[#allocation16_spill] sm:$0xff] %v8950_v12  ;;  %v4747_v37 = vcombine.high %v4713_v48, %v4729_v40  ;;  %v5546_v13 = vcombine.high %v8950_v12, %v10205_v46 }
 0x63c   : > { %4920 = vrot.lane.b32.xlu1 %v8651_v44, %s6474_s22  ;;  %v3991_v44 = vcombine.high %v3973_v28, %v10205_v46 }
 0x63d   : > { %v8969_v29 = vrot.slane %v4747_v37, %v7019_v45  ;;  %v4813_v37 = vrot.slane %v4799_v39, %v7019_v45 }
 0x63e   : > { %4918 = vrot.lane.b32.xlu0 %v8663_v30, %s6474_s22  ;;  %v8923_v30 = vrot.slane %v5530_v56, %v7019_v45  ;;  %s325_s22 = scalar_lea.vmem %s10154_s8, %s6397_s19 }
 0x640   : > { %4004 = vrot.lane.b32.xlu1 %v3905_v14, %s6479_s24  ;;  %10303 = vst [vmem:[#allocation20_spill] sm:$0xff] %v8923_v30  ;;  %v5548_v25 = vcombine.high %v8923_v30, %v10205_v46  ;;  %v5590_v14 = vrot.slane %v5582_v3, %v7019_v45 }
 0x642   : > { %4025 = vrot.lane.b32.xlu0 %v3921_v4, %s6479_s24  ;;  %v5597_v4 = vrot.slane %v5583_v36, %v7019_v45  ;;  %v4698_v36 = vcombine.low %v8597_v32, %v4684_v11  ;;  %v5614_v32 = vcombine.high %v5590_v14, %v10205_v46 }
 0x644   : > { %4016 = vrot.lane.b32.xlu1 %v3982_v8, %s6480_s25  ;;  %v4714_v8 = vcombine.low %v4676_v59, %v4692_v41  ;;  %v4706_v1 = vrot.slane %v4698_v36, %v6804_v60  ;;  %v5615_v52 = vcombine.high %v5597_v4, %v10205_v46 }
 0x646   : > { %3995 = vrot.lane.b32.xlu0 %v3966_v27, %s6480_s25 }
 0x648   : > { %4019 = vrot.lane.b32.xlu1 %v3924_v24, %s6481_s26  ;;  %v5616_v24 = vcombine.high %v5606_v26, %v10205_v46 }
 0x64a   : > { %3998 = vrot.lane.b32.xlu0 %v3922_v31, %s6481_s26 }
 0x64c   : > { %4031 = vrot.lane.b32.xlu1 %v3925_v17, %s6483_s30  ;;  %v4722_v17 = vrot.slane %v4714_v8, %v6804_v60 }
 0x64e   : > { %4028 = vrot.lane.b32.xlu0 %v3989_v22, %s6482_s29  ;;  %v4731_v42 = vcombine.high %v4706_v1, %v4722_v17  ;;  %v4730_v11 = vcombine.low %v4706_v1, %v4722_v17 }
 0x650   : > { %v8881_v61 = vpop.permute.xlu1 %4076  ;;  %v8883_v34 = vpop.permute.xlu0 %4074  ;;  %4010 = vrot.lane.b32.xlu1 %v3923_v2, %s6483_s30  ;;  %v4745_v41 = vrot.slane %v4731_v42, %v7019_v45 }
 0x652   : > { %4007 = vrot.lane.b32.xlu0 %v3973_v28, %s6482_s29  ;;  %v5617_v28 = vcombine.high %v5613_v10, %v10205_v46  ;;  %v4763_v33 = vcombine.high %v4745_v41, %v10205_v46 }
 0x654   : > { %5649 = vrot.lane.b32.xlu1 %v5545_v5, %s6479_s24  ;;  %v8897_v0 = vpop.permute.xlu1 %4080  ;;  %v4746_v5 = vcombine.low %v4713_v48, %v4729_v40 }
 0x655   : > { %v8899_v15 = vpop.permute.xlu0 %4078 }
 0x656   : > { %5628 = vrot.lane.b32.xlu0 %v5529_v57, %s6479_s24  ;;  %v4822_v57 = vrot.slane %v4814_v23, %v7019_v45  ;;  %v9014_v59 = vrot.slane %v4746_v5, %v7019_v45  ;;  %v4100_v8 = vpack.i.b16 %v8897_v0, %v8899_v15 }
 0x658   : > { %4022 = vrot.lane.b32.xlu1 %v3992_v50, %s6485_s10  ;;  %v8907_v20 = vpop.permute.xlu1 %4084  ;;  %10305 = vst [vmem:[#allocation19_spill] sm:$0xff] %v9014_v59  ;;  %v4764_v63 = vcombine.high %v9014_v59, %v10205_v46 }
 0x659   : > { %v4111_v51 = vshrl.u32 %v8907_v20, 16 }
 0x65a   : > { %4034 = vrot.lane.b32.xlu0 %v3993_v49, %s6484_s9 }
 0x65b   : > { %v8915_v7 = vpop.permute.xlu0 %4082 }
 0x65c   : > { %4001 = vrot.lane.b32.xlu1 %v3990_v35, %s6485_s10  ;;  %v4110_v39 = vshrl.u32 %v8915_v7, 16 }
 0x65e   : > { %4013 = vrot.lane.b32.xlu0 %v3991_v44, %s6484_s9  ;;  %v8927_v6 = vpop.permute.xlu1 %4088  ;;  %v4112_v42 = vpack.i.b16 %v4111_v51, %v4110_v39 }
 0x65f   : > { %v4119_v38 = vshrl.u32 %v8927_v6, 16 }
 0x660   : > { %v8933_v54 = vpop.permute.xlu0 %4086  ;;  %5640 = vrot.lane.b32.xlu1 %v5606_v26, %s6480_s25  ;;  %v9026_v26 = vrot.slane %v4730_v11, %v7019_v45 }
 0x661   : > { %v4116_v48 = vpack.i.b16 %v8927_v6, %v8933_v54  ;;  %v4118_v47 = vshrl.u32 %v8933_v54, 16 }
 0x662   : > { %5643 = vrot.lane.b32.xlu0 %v5548_v25, %s6481_s26  ;;  %v8940_v56 = vpop.permute.xlu1 %4332  ;;  %10306 = vst [vmem:[#allocation13_spill] sm:$0xff] %v9026_v26  ;;  %v4806_v25 = vrot.slane %v4798_v62, %v7019_v45  ;;  %v4829_v62 = vrot.slane %v4815_v18, %v7019_v45  ;;  %v4092_v18 = vpack.i.b16 %v8881_v61, %v8883_v34 }
 0x663   : > { %v4138_v6 = vcombine.low %v4100_v8, %v4116_v48 }
 0x664   : > { %v8953_v16 = vpop.permute.xlu0 %4330  ;;  %5619 = vrot.lane.b32.xlu1 %v5590_v14, %s6480_s25  ;;  %v4762_v14 = vcombine.high %v9026_v26, %v10205_v46  ;;  %v4833_v51 = vcombine.high %v4829_v62, %v10205_v46  ;;  %v4830_v39 = vcombine.high %v4806_v25, %v10205_v46 }
 0x666   : > { %5631 = vrot.lane.b32.xlu0 %v5597_v4, %s6482_s29  ;;  %v8961_v3 = vpop.permute.xlu1 %4336 }
 0x668   : > { %v8965_v9 = vpop.permute.xlu0 %4334  ;;  %5622 = vrot.lane.b32.xlu1 %v5546_v13, %s6481_s26  ;;  %v4095_v13 = vshrl.u32 %v8881_v61, 16 }
 0x669   : > { %v4356_v61 = vpack.i.b16 %v8961_v3, %v8965_v9 }
 0x66a   : > { %4865 = vrot.lane.b32.xlu0 %v8969_v29, %s6479_s24  ;;  %v8973_v19 = vpop.permute.xlu1 %4340 }
 0x66c   : > { %v8980_v27 = vpop.permute.xlu0 %4338  ;;  %5652 = vrot.lane.b32.xlu1 %v5613_v10, %s6482_s29  ;;  %v4108_v10 = vpack.i.b16 %v8907_v20, %v8915_v7  ;;  %v4103_v20 = vshrl.u32 %v8897_v0, 16  ;;  %v4102_v7 = vshrl.u32 %v8899_v15, 16  ;;  %v4120_v0 = vpack.i.b16 %v4119_v38, %v4118_v47 }
 0x66d   : > { %v4364_v54 = vpack.i.b16 %v8973_v19, %v8980_v27  ;;  %v4348_v15 = vpack.i.b16 %v8940_v56, %v8953_v16  ;;  %v4831_v47 = vcombine.high %v4813_v37, %v10205_v46 }
 0x66e   : > { %5646 = vrot.lane.b32.xlu0 %v5616_v24, %s6485_s10  ;;  %v8985_v31 = vpop.permute.xlu1 %4344  ;;  %v4094_v24 = vshrl.u32 %v8883_v34, 16  ;;  %v4123_v1 = vcombine.high %v4092_v18, %v4108_v10 }
 0x670   : > { %v8989_v22 = vpop.permute.xlu0 %4342  ;;  %5655 = vrot.lane.b32.xlu1 %v5549_v43, %s6483_s30  ;;  %v4139_v43 = vcombine.high %v4100_v8, %v4116_v48  ;;  %v4378_v48 = vcombine.low %v4348_v15, %v4364_v54  ;;  %v9098_v8 = vrot.slane %v4123_v1, %v6804_v60 }
 0x671   : > { %v4372_v17 = vpack.i.b16 %v8985_v31, %v8989_v22 }
 0x672   : > { %5625 = vrot.lane.b32.xlu0 %v5614_v32, %s6485_s10  ;;  %v8995_v55 = vpop.permute.xlu1 %5692  ;;  %v9088_v5 = vrot.slane %v4139_v43, %v6804_v60 }
 0x674   : > { %v8998_v2 = vpop.permute.xlu0 %5690  ;;  %5634 = vrot.lane.b32.xlu1 %v5547_v58, %s6483_s30  ;;  %v4765_v58 = vcombine.high %v8969_v29, %v10205_v46  ;;  %v9095_v29 = vrot.slane %v4138_v6, %v6804_v60 }
 0x676   : > { %5658 = vrot.lane.b32.xlu0 %v5617_v28, %s6484_s9  ;;  %v9003_v50 = vpop.permute.xlu1 %5696  ;;  %v4122_v28 = vcombine.low %v4092_v18, %v4108_v10  ;;  %v4395_v10 = vcombine.high %v4356_v61, %v4372_v17 }
 0x678   : > { %v9006_v49 = vpop.permute.xlu0 %5694  ;;  %4844 = vrot.lane.b32.xlu1 %v4745_v41, %s6479_s24  ;;  %v4394_v41 = vcombine.low %v4356_v61, %v4372_v17  ;;  %v9125_v6 = vrot.slane %v4395_v10, %v6804_v60 }
 0x67a   : > { %4856 = vrot.lane.b32.xlu0 %v4822_v57, %s6480_s25  ;;  %v9017_v35 = vpop.permute.xlu1 %5700  ;;  %v9110_v43 = vrot.slane %v4394_v41, %v6804_v60 }
 0x67c   : > { %v9020_v44 = vpop.permute.xlu0 %5698  ;;  %5637 = vrot.lane.b32.xlu1 %v5615_v52, %s6484_s9  ;;  %v4832_v52 = vcombine.high %v4822_v57, %v10205_v46  ;;  %v9106_v57 = vrot.slane %v4122_v28, %v6804_v60 }
 0x67e   : > { %4859 = vrot.lane.b32.xlu0 %v4764_v63, %s6481_s26  ;;  %v9029_v23 = vpop.permute.xlu1 %5704  ;;  %v4096_v63 = vpack.i.b16 %v4095_v13, %v4094_v24  ;;  %v4379_v24 = vcombine.high %v4348_v15, %v4364_v54  ;;  %v4154_v53 = vcombine.low %v9106_v57, %v9095_v29 }
 0x680   : > { %v9035_v40 = vpop.permute.xlu0 %5702  ;;  %4835 = vrot.lane.b32.xlu1 %v4806_v25, %s6480_s25  ;;  %v4190_v13 = vcombine.low %v4096_v63, %v4112_v42  ;;  %v9118_v25 = vrot.slane %v4378_v48, %v6804_v60  ;;  %v4191_v28 = vcombine.high %v4096_v63, %v4112_v42 }
 0x682   : > { %4838 = vrot.lane.b32.xlu0 %v4762_v14, %s6481_s26  ;;  %v9043_v4 = vpop.permute.xlu1 %5948  ;;  %v4104_v14 = vpack.i.b16 %v4103_v20, %v4102_v7  ;;  %v4411_v42 = vcombine.high %v9118_v25, %v9110_v43  ;;  %v4198_v63 = vrot.slane %v4190_v13, %v6804_v60  ;;  %v4205_v13 = vrot.slane %v4191_v28, %v6804_v60 }
 0x683   : > { %v5967_v15 = vshrl.u32 %v9043_v4, 16  ;;  %v4170_v28 = vcombine.low %v9098_v8, %v9088_v5 }
 0x684   : > { %v9058_v36 = vpop.permute.xlu0 %5946  ;;  %4847 = vrot.lane.b32.xlu1 %v4813_v37, %s6482_s29  ;;  %v4206_v38 = vcombine.low %v4104_v14, %v4120_v0  ;;  %v4207_v18 = vcombine.high %v4104_v14, %v4120_v0  ;;  %v4155_v37 = vcombine.high %v9106_v57, %v9095_v29 }
 0x685   : > { %v5966_v41 = vshrl.u32 %v9058_v36, 16 }
 0x686   : > { %4868 = vrot.lane.b32.xlu0 %v4829_v62, %s6482_s29  ;;  %v9072_v32 = vpop.permute.xlu1 %5952  ;;  %v4171_v62 = vcombine.high %v9098_v8, %v9088_v5  ;;  %v9134_v0 = vrot.slane %v4206_v38, %v6804_v60  ;;  %v4350_v8 = vshrl.u32 %v8953_v16, 16 }
 0x687   : > { %v5975_v54 = vshrl.u32 %v9072_v32, 16 }
 0x688   : > { %v9080_v34 = vpop.permute.xlu0 %5950  ;;  %4850 = vrot.lane.b32.xlu1 %v4763_v33, %s6483_s30  ;;  %v9146_v10 = vrot.slane %v4171_v62, %v7019_v45 }
 0x689   : > { %v5974_v1 = vshrl.u32 %v9080_v34, 16 }
 0x68a   : > { %4871 = vrot.lane.b32.xlu0 %v4765_v58, %s6483_s30  ;;  %v9091_v11 = vpop.permute.xlu1 %5956 }
 0x68b   : > { %v5983_v20 = vshrl.u32 %v9091_v11, 16  ;;  %v9154_v38 = vpack.i.b16 %v5975_v54, %v5974_v1  ;;  %v4374_v54 = vshrl.u32 %v8989_v22, 16 }
 0x68c   : > { %v9100_v33 = vpop.permute.xlu0 %5954  ;;  %4862 = vrot.lane.b32.xlu1 %v4832_v52, %s6485_s10  ;;  %v9139_v52 = vrot.slane %v4379_v24, %v6804_v60 }
 0x68d   : > { %v5982_v7 = vshrl.u32 %v9100_v33, 16 }
 0x68e   : > { %4874 = vrot.lane.b32.xlu0 %v4833_v51, %s6484_s9  ;;  %v9113_v17 = vpop.permute.xlu1 %5960  ;;  %v4221_v51 = vrot.slane %v4207_v18, %v6804_v60  ;;  %v4427_v62 = vcombine.high %v9139_v52, %v9125_v6  ;;  %v9168_v18 = vpack.i.b16 %v5967_v15, %v5966_v41  ;;  %v4359_v15 = vshrl.u32 %v8961_v3, 16 }
 0x68f   : > { %v5991_v61 = vshrl.u32 %v9113_v17, 16  ;;  %v4367_v41 = vshrl.u32 %v8973_v19, 16  ;;  %v4351_v3 = vshrl.u32 %v8940_v56, 16 }
 0x690   : > { %v9130_v58 = vpop.permute.xlu0 %5958  ;;  %4841 = vrot.lane.b32.xlu1 %v4830_v39, %s6485_s10  ;;  %v9152_v39 = vpack.i.b16 %v5983_v20, %v5982_v7  ;;  %10307 = vst [vmem:[#allocation34_spill] sm:$0xff] %v9168_v18  ;;  %v4222_v20 = vcombine.low %v4198_v63, %v9134_v0  ;;  %v4375_v7 = vshrl.u32 %v8985_v31, 16  ;;  %v4358_v31 = vshrl.u32 %v8965_v9, 16 }
 0x691   : > { %v5990_v14 = vshrl.u32 %v9130_v58, 16  ;;  %v9193_v21 = vrot.slane %v4427_v62, %v7019_v45  ;;  %v4238_v5 = vcombine.low %v4205_v13, %v4221_v51  ;;  %v4239_v62 = vcombine.high %v4205_v13, %v4221_v51 }
 0x692   : > { %4853 = vrot.lane.b32.xlu0 %v4831_v47, %s6484_s9  ;;  %v9143_v48 = vpop.permute.xlu1 %5164  ;;  %v9163_v47 = vrot.slane %v4155_v37, %v7019_v45  ;;  %v6062_v22 = vcombine.low %v9168_v18, %v9152_v39  ;;  %v4352_v29 = vpack.i.b16 %v4351_v3, %v4350_v8  ;;  %v4426_v8 = vcombine.low %v9139_v52, %v9125_v6 }
 0x693   : > { %v9156_v24 = vpack.i.b16 %v5991_v61, %v5990_v14  ;;  %v9180_v61 = vrot.slane %v4411_v42, %v7019_v45  ;;  %v4366_v14 = vshrl.u32 %v8980_v27, 16  ;;  %v4376_v42 = vpack.i.b16 %v4375_v7, %v4374_v54 }
 0x694   : > { %v9158_v30 = vpop.permute.xlu0 %5162  ;;  %4289 = vrot.lane.b32.xlu1 %v9146_v10, %s6479_s24  ;;  %v9207_v27 = vrot.slane %v4222_v20, %v7019_v45  ;;  %v9212_v56 = vrot.slane %v6062_v22, %v6804_v60  ;;  %v9217_v16 = vrot.slane %v4238_v5, %v7019_v45  ;;  %v9222_v20 = vrot.slane %v4170_v28, %v7019_v45 }
 0x695   : > { %v6078_v1 = vcombine.low %v9154_v38, %v9156_v24  ;;  %v4368_v59 = vpack.i.b16 %v4367_v41, %v4366_v14  ;;  %v9231_v7 = vrot.slane %v4239_v62, %v7019_v45  ;;  %v4223_v54 = vcombine.high %v4198_v63, %v9134_v0 }
 0x696   : > { %4268 = vrot.lane.b32.xlu0 %v9163_v47, %s6479_s24  ;;  %v9177_v37 = vpop.permute.xlu1 %5168  ;;  %10308 = vst [vmem:[#allocation15_spill] sm:$0xff] %v9222_v20  ;;  %v4188_v28 = vcombine.high %v9222_v20, %v10205_v46  ;;  %v9241_v22 = vrot.slane %v4154_v53, %v7019_v45  ;;  %v5732_v52 = vpack.i.b16 %v9029_v23, %v9035_v40 }
 0x697   : > { %v9199_v9 = vrot.slane %v6078_v1, %v6804_v60  ;;  %v4360_v1 = vpack.i.b16 %v4359_v15, %v4358_v31  ;;  %v4447_v15 = vcombine.high %v4352_v29, %v4368_v59  ;;  %v9248_v0 = vrot.slane %v4223_v54, %v7019_v45 }
 0x698   : > { %v9190_v12 = vpop.permute.xlu0 %5166  ;;  %4524 = vrot.lane.b32.xlu1 %v9180_v61, %s6479_s24  ;;  %10309 = vst [vmem:[#allocation17_spill] sm:$0xff] %v9241_v22  ;;  %v4446_v63 = vcombine.low %v4352_v29, %v4368_v59  ;;  %v4186_v53 = vcombine.high %v9241_v22, %v10205_v46  ;;  %v4187_v59 = vcombine.high %v9163_v47, %v10205_v46 }
 0x699   : > { %v4463_v57 = vcombine.high %v4360_v1, %v4376_v42  ;;  %v4462_v41 = vcombine.low %v4360_v1, %v4376_v42  ;;  %v4461_v3 = vrot.slane %v4447_v15, %v6804_v60  ;;  %v4189_v54 = vcombine.high %v9146_v10, %v10205_v46 }
 0x69a   : > { %4545 = vrot.lane.b32.xlu0 %v9193_v21, %s6479_s24  ;;  %v9204_v19 = vpop.permute.xlu1 %5172  ;;  %v4454_v6 = vrot.slane %v4446_v63, %v6804_v60  ;;  %v9274_v15 = vrot.slane %v4426_v8, %v7019_v45  ;;  %v4410_v47 = vcombine.low %v9118_v25, %v9110_v43  ;;  %v5724_v63 = vpack.i.b16 %v9017_v35, %v9020_v44 }
 0x69b   : > { %v4477_v14 = vrot.slane %v4463_v57, %v6804_v60  ;;  %v4470_v42 = vrot.slane %v4462_v41, %v6804_v60  ;;  %v5716_v41 = vpack.i.b16 %v9003_v50, %v9006_v49  ;;  %v5708_v8 = vpack.i.b16 %v8995_v55, %v8998_v2 }
 0x69c   : > { %v9214_v26 = vpop.permute.xlu0 %5170  ;;  %4259 = vrot.lane.b32.xlu1 %v9207_v27, %s6480_s25  ;;  %10310 = vst [vmem:[#allocation21_spill] sm:$0xff] %v9274_v15  ;;  %v5988_v43 = vpack.i.b16 %v9113_v17, %v9130_v58  ;;  %v4444_v20 = vcombine.high %v9274_v15, %v10205_v46  ;;  %v9309_v58 = vrot.slane %v4410_v47, %v7019_v45 }
 0x69d   : > { %v4494_v29 = vcombine.low %v4461_v3, %v4477_v14  ;;  %v5755_v51 = vcombine.high %v5716_v41, %v5732_v52  ;;  %v5964_v22 = vpack.i.b16 %v9043_v4, %v9058_v36  ;;  %v5738_v36 = vcombine.low %v5708_v8, %v5724_v63 }
 0x69e   : > { %4280 = vrot.lane.b32.xlu0 %v9217_v16, %s6480_s25  ;;  %v9228_v13 = vpop.permute.xlu1 %5176  ;;  %10311 = vst [vmem:[#allocation14_spill] sm:$0xff] %v9309_v58  ;;  %v4442_v4 = vcombine.high %v9309_v58, %v10205_v46 }
 0x69f   : > { %v9286_v10 = vrot.slane %v4494_v29, %v7019_v45  ;;  %v5739_v29 = vcombine.high %v5708_v8, %v5724_v63 }
 0x6a0   : > { %v9234_v31 = vpop.permute.xlu0 %5174  ;;  %4292 = vrot.lane.b32.xlu1 %v9231_v7, %s6482_s29 }
 0x6a2   : > { %4283 = vrot.lane.b32.xlu0 %v4188_v28, %s6481_s26  ;;  %v9245_v5 = vpop.permute.xlu1 %4908  ;;  %v4478_v28 = vcombine.low %v4454_v6, %v4470_v42 }
 0x6a4   : > { %v9253_v62 = vpop.permute.xlu0 %4906  ;;  %4271 = vrot.lane.b32.xlu1 %v9248_v0, %s6482_s29 }
 0x6a6   : > { %4262 = vrot.lane.b32.xlu0 %v4186_v53, %s6481_s26  ;;  %v9261_v1 = vpop.permute.xlu1 %4912 }
 0x6a8   : > { %v9268_v57 = vpop.permute.xlu0 %4910  ;;  %4274 = vrot.lane.b32.xlu1 %v4187_v59, %s6483_s30  ;;  %v4495_v59 = vcombine.high %v4461_v3, %v4477_v14  ;;  %v5972_v14 = vpack.i.b16 %v9072_v32, %v9080_v34  ;;  %v5980_v3 = vpack.i.b16 %v9091_v11, %v9100_v33  ;;  %v4479_v11 = vcombine.high %v4454_v6, %v4470_v42 }
 0x6a9   : > { %v9324_v33 = vrot.slane %v5739_v29, %v6804_v60  ;;  %v4445_v29 = vcombine.high %v9193_v21, %v10205_v46  ;;  %v5734_v21 = vshrl.u32 %v9035_v40, 16 }
 0x6aa   : > { %4295 = vrot.lane.b32.xlu0 %v4189_v54, %s6483_s30  ;;  %v9283_v53 = vpop.permute.xlu1 %4916  ;;  %v9299_v54 = vrot.slane %v4478_v28, %v7019_v45  ;;  %v9312_v15 = vrot.slane %v4495_v59, %v7019_v45  ;;  %v9315_v28 = vrot.slane %v5755_v51, %v6804_v60  ;;  %v6010_v32 = vcombine.low %v5972_v14, %v5988_v43 }
 0x6ab   : > { %v5994_v47 = vcombine.low %v5964_v22, %v5980_v3  ;;  %v9338_v42 = vrot.slane %v4479_v11, %v7019_v45  ;;  %v6011_v63 = vcombine.high %v5972_v14, %v5988_v43  ;;  %v5995_v11 = vcombine.high %v5964_v22, %v5980_v3 }
 0x6ac   : > { %v9292_v25 = vpop.permute.xlu0 %4914  ;;  %4536 = vrot.lane.b32.xlu1 %v9286_v10, %s6480_s25  ;;  %v9333_v59 = vrot.slane %v6010_v32, %v6804_v60  ;;  %v5787_v6 = vcombine.high %v9324_v33, %v9315_v28  ;;  %v9356_v32 = vrot.slane %v5738_v36, %v6804_v60  ;;  %v4443_v14 = vcombine.high %v9180_v61, %v10205_v46 }
 0x6ad   : > { %v9371_v36 = vrot.slane %v6011_v63, %v6804_v60  ;;  %v5727_v61 = vshrl.u32 %v9017_v35, 16  ;;  %v9384_v40 = vrot.slane %v5995_v11, %v6804_v60 }
 0x6ae   : > { %4539 = vrot.lane.b32.xlu0 %v4444_v20, %s6481_s26  ;;  %v9306_v17 = vpop.permute.xlu1 %4920  ;;  %v5754_v20 = vcombine.low %v5716_v41, %v5732_v52  ;;  %v9347_v41 = vrot.slane %v5994_v47, %v6804_v60  ;;  %v5735_v47 = vshrl.u32 %v9029_v23, 16  ;;  %v5726_v23 = vshrl.u32 %v9020_v44, 16 }
 0x6af   : > { %v6043_v44 = vcombine.high %v9384_v40, %v9371_v36 }
 0x6b0   : > { %v9319_v34 = vpop.permute.xlu0 %4918  ;;  %4515 = vrot.lane.b32.xlu1 %v9299_v54, %s6480_s25  ;;  %v9344_v52 = vrot.slane %v5754_v20, %v6804_v60  ;;  %v9362_v20 = vrot.slane %v5787_v6, %v7019_v45  ;;  %v6027_v43 = vcombine.high %v9347_v41, %v9333_v59  ;;  %v5719_v6 = vshrl.u32 %v9003_v50, 16 }
 0x6b1   : > { %v5710_v50 = vshrl.u32 %v8998_v2, 16 }
 0x6b2   : > { %4548 = vrot.lane.b32.xlu0 %v9312_v15, %s6482_s29  ;;  %v9328_v51 = vpop.permute.xlu1 %4004  ;;  %v5771_v3 = vcombine.high %v9356_v32, %v9344_v52  ;;  %v9390_v58 = vrot.slane %v6027_v43, %v7019_v45 }
 0x6b3   : > { %10312 = vst [vmem:[#allocation24_spill] sm:$0xff] %v9328_v51  ;;  %v5711_v51 = vshrl.u32 %v8995_v55, 16  ;;  %v4254_v55 = vcombine.high %v9207_v27, %v10205_v46 }
 0x6b4   : > { %v9335_v18 = vpop.permute.xlu0 %4025  ;;  %4518 = vrot.lane.b32.xlu1 %v4442_v4, %s6481_s26  ;;  %v9399_v35 = vrot.slane %v5771_v3, %v7019_v45  ;;  %v9413_v3 = vrot.slane %v6043_v44, %v7019_v45 }
 0x6b5   : > { %10313 = vst [vmem:[#allocation9_spill] sm:$0xff] %v9335_v18  ;;  %v5736_v18 = vpack.i.b16 %v5735_v47, %v5734_v21  ;;  %v5712_v2 = vpack.i.b16 %v5711_v51, %v5710_v50 }
 0x6b6   : > { %4527 = vrot.lane.b32.xlu0 %v9338_v42, %s6482_s29  ;;  %v9351_v8 = vpop.permute.xlu1 %4016 }
 0x6b8   : > { %v9358_v4 = vpop.permute.xlu0 %3995  ;;  %4551 = vrot.lane.b32.xlu1 %v4445_v29, %s6483_s30  ;;  %v5718_v29 = vshrl.u32 %v9006_v49, 16 }
 0x6ba   : > { %5905 = vrot.lane.b32.xlu0 %v9362_v20, %s6479_s24  ;;  %v9375_v22 = vpop.permute.xlu1 %4019  ;;  %v5720_v11 = vpack.i.b16 %v5719_v6, %v5718_v29  ;;  %v4257_v29 = vcombine.high %v9231_v7, %v10205_v46 }
 0x6bc   : > { %v9386_v63 = vpop.permute.xlu0 %3998  ;;  %4530 = vrot.lane.b32.xlu1 %v4443_v14, %s6483_s30  ;;  %v5728_v14 = vpack.i.b16 %v5727_v61, %v5726_v23  ;;  %v5823_v47 = vcombine.high %v5720_v11, %v5736_v18  ;;  %v5822_v61 = vcombine.low %v5720_v11, %v5736_v18  ;;  %v4256_v23 = vcombine.high %v9217_v16, %v10205_v46 }
 0x6bd   : > { %v4255_v18 = vcombine.high %v9248_v0, %v10205_v46  ;;  %v4510_v16 = vcombine.high %v9299_v54, %v10205_v46  ;;  %v4512_v0 = vcombine.high %v9286_v10, %v10205_v46  ;;  %v4513_v10 = vcombine.high %v9312_v15, %v10205_v46 }
 0x6be   : > { %6140 = vrot.lane.b32.xlu0 %v9390_v58, %s6479_s24  ;;  %v9396_v49 = vpop.permute.xlu1 %4031  ;;  %v9422_v27 = vrot.slane %v5823_v47, %v6804_v60  ;;  %v5806_v50 = vcombine.low %v5712_v2, %v5728_v14  ;;  %v9438_v7 = vrot.slane %v5822_v61, %v6804_v60  ;;  %v5786_v61 = vcombine.low %v9324_v33, %v9315_v28 }
 0x6bf   : > { %10314 = vst [vmem:[#allocation18_spill] sm:$0xff] %v9396_v49  ;;  %v5807_v49 = vcombine.high %v5712_v2, %v5728_v14  ;;  %v5770_v28 = vcombine.low %v9356_v32, %v9344_v52  ;;  %v9485_v33 = vpack.i.b16 %v9177_v37, %v9190_v12  ;;  %v9489_v15 = vpack.i.b16 %v9204_v19, %v9214_v26 }
 0x6c0   : > { %v9403_v43 = vpop.permute.xlu0 %4028  ;;  %5884 = vrot.lane.b32.xlu1 %v9399_v35, %s6479_s24  ;;  %v9448_v14 = vrot.slane %v5806_v50, %v6804_v60  ;;  %v9473_v50 = vpack.i.b16 %v9228_v13, %v9234_v31  ;;  %v6026_v52 = vcombine.low %v9347_v41, %v9333_v59  ;;  %v5805_v32 = vcombine.high %v9362_v20, %v10205_v46 }
 0x6c1   : > { %10315 = vst [vmem:[#allocation23_spill] sm:$0xff] %v9403_v43  ;;  %v9430_v44 = vrot.slane %v5807_v49, %v6804_v60  ;;  %v6094_v59 = vcombine.low %v9212_v56, %v9199_v9  ;;  %v9520_v41 = vrot.slane %v5770_v28, %v7019_v45  ;;  %v6079_v43 = vcombine.high %v9154_v38, %v9156_v24 }
 0x6c2   : > { %4265 = vrot.lane.b32.xlu0 %v4254_v55, %s6485_s10  ;;  %v9410_v21 = vpop.permute.xlu1 %4010  ;;  %v5838_v54 = vcombine.low %v9448_v14, %v9438_v7  ;;  %v9538_v28 = vrot.slane %v6026_v52, %v7019_v45 }
 0x6c3   : > { %10316 = vst [vmem:[#allocation22_spill] sm:$0xff] %v9410_v21  ;;  %v5854_v49 = vcombine.low %v9430_v44, %v9422_v27  ;;  %10326 = vst [vmem:[#allocation33_spill] sm:$0xff] %v9520_v41  ;;  %v5802_v21 = vcombine.high %v9520_v41, %v10205_v46 }
 0x6c4   : > { %v9415_v6 = vpop.permute.xlu0 %4007  ;;  %6161 = vrot.lane.b32.xlu1 %v9413_v3, %s6479_s24 }
 0x6c5   : > { %10317 = vst [vmem:[#allocation25_spill] sm:$0xff] %v9415_v6 }
 0x6c6   : > { %4298 = vrot.lane.b32.xlu0 %v4257_v29, %s6484_s9  ;;  %v9425_v51 = vpop.permute.xlu1 %5649  ;;  %v9459_v29 = vrot.slane %v5854_v49, %v7019_v45 }
 0x6c7   : > { %10318 = vst [vmem:[#allocation28_spill] sm:$0xff] %v9425_v51  ;;  %v5226_v51 = vcombine.low %v9485_v33, %v9473_v50 }
 0x6c8   : > { %v9432_v55 = vpop.permute.xlu0 %5628  ;;  %4286 = vrot.lane.b32.xlu1 %v4256_v23, %s6485_s10 }
 0x6c9   : > { %10319 = vst [vmem:[#allocation29_spill] sm:$0xff] %v9432_v55 }
 0x6ca   : > { %4277 = vrot.lane.b32.xlu0 %v4255_v18, %s6484_s9  ;;  %v9441_v11 = vpop.permute.xlu1 %4022 }
 0x6cc   : > { %v9450_v2 = vpop.permute.xlu0 %4034  ;;  %4521 = vrot.lane.b32.xlu1 %v4510_v16, %s6485_s10  ;;  %v9479_v16 = vrot.slane %v5838_v54, %v7019_v45  ;;  %v9498_v54 = vrot.slane %v5786_v61, %v7019_v45  ;;  %v9526_v61 = vpack.i.b16 %v9261_v1, %v9268_v57 }
 0x6cd   : > { %10320 = vst [vmem:[#allocation39_spill] sm:$0xff] %v9450_v2 }
 0x6ce   : > { %4542 = vrot.lane.b32.xlu0 %v4512_v0, %s6485_s10  ;;  %v9456_v47 = vpop.permute.xlu1 %4001  ;;  %v4511_v0 = vcombine.high %v9338_v42, %v10205_v46  ;;  %10324 = vst [vmem:[#allocation30_spill] sm:$0xff] %v9498_v54  ;;  %v5804_v55 = vcombine.high %v9498_v54, %v10205_v46 }
 0x6d0   : > { %v9465_v23 = vpop.permute.xlu0 %4013  ;;  %5896 = vrot.lane.b32.xlu1 %v9459_v29, %s6480_s25 }
 0x6d1   : > { %10321 = vst [vmem:[#allocation3_spill] sm:$0xff] %v9465_v23  ;;  %v9545_v23 = vpack.i.b16 %v9245_v5, %v9253_v62 }
 0x6d2   : > { %4554 = vrot.lane.b32.xlu0 %v4513_v10, %s6484_s9  ;;  %v9476_v18 = vpop.permute.xlu1 %5640  ;;  %v9506_v10 = vpack.i.b16 %v9143_v48, %v9158_v30 }
 0x6d3   : > { %10322 = vst [vmem:[#allocation31_spill] sm:$0xff] %v9476_v18  ;;  %v9530_v18 = vpack.i.b16 %v9283_v53, %v9292_v25 }
 0x6d4   : > { %v9491_v49 = vpop.permute.xlu0 %5643  ;;  %5875 = vrot.lane.b32.xlu1 %v9479_v16, %s6480_s25  ;;  %v5210_v20 = vcombine.low %v9506_v10, %v9489_v15 }
 0x6d5   : > { %10323 = vst [vmem:[#allocation11_spill] sm:$0xff] %v9491_v49  ;;  %v9512_v49 = vpack.i.b16 %v9306_v17, %v9319_v34 }
 0x6d6   : > { %4533 = vrot.lane.b32.xlu0 %v4511_v0, %s6484_s9  ;;  %v9515_v42 = vpop.permute.xlu1 %5619  ;;  %v9556_v52 = vrot.slane %v5210_v20, %v6804_v60 }
 0x6d7   : > { %10325 = vst [vmem:[#allocation36_spill] sm:$0xff] %v9515_v42  ;;  %v9541_v42 = vrot.slane %v5226_v51, %v6804_v60  ;;  %v4970_v2 = vcombine.low %v9526_v61, %v9512_v49  ;;  %v4954_v51 = vcombine.low %v9545_v23, %v9530_v18 }
 0x6d8   : > { %v9532_v0 = vpop.permute.xlu0 %5631  ;;  %5911 = vrot.lane.b32.xlu1 %v5805_v32, %s6483_s30  ;;  %v9553_v32 = vrot.slane %v6094_v59, %v7019_v45 }
 0x6d9   : > { %10327 = vst [vmem:[#allocation12_spill] sm:$0xff] %v9532_v0  ;;  %v9569_v59 = vrot.slane %v4970_v2, %v6804_v60  ;;  %v5243_v6 = vcombine.high %v9556_v52, %v9541_v42  ;;  %v9581_v41 = vrot.slane %v4954_v51, %v6804_v60  ;;  %v10331_v2 = vld [vmem:[#allocation34_spill] sm:$0xff] }
 0x6da   : > { %5899 = vrot.lane.b32.xlu0 %v5804_v55, %s6481_s26  ;;  %v9550_v0 = vpop.permute.xlu1 %5622  ;;  %v5855_v55 = vcombine.high %v9430_v44, %v9422_v27 }
 0x6db   : > { %10328 = vst [vmem:[#allocation35_spill] sm:$0xff] %v9550_v0  ;;  %v6058_v0 = vcombine.high %v9538_v28, %v10205_v46  ;;  %v9598_v24 = vrot.slane %v5243_v6, %v7019_v45  ;;  %v4987_v51 = vcombine.high %v9581_v41, %v9569_v59  ;;  %v5207_v6 = vshrl.u32 %v9228_v13, 16 }
 0x6dc   : > { %v9560_v54 = vpop.permute.xlu0 %4865  ;;  %6131 = vrot.lane.b32.xlu1 %v9553_v32, %s6480_s25  ;;  %v9586_v44 = vrot.slane %v5855_v55, %v7019_v45  ;;  %v9603_v55 = vrot.slane %v6079_v43, %v6804_v60  ;;  %v5803_v13 = vcombine.high %v9399_v35, %v10205_v46  ;;  %v5872_v35 = vcombine.high %v9459_v29, %v10205_v46 }
 0x6de   : > { %5878 = vrot.lane.b32.xlu0 %v5802_v21, %s6481_s26  ;;  %v9572_v20 = vpop.permute.xlu1 %5652  ;;  %v5839_v21 = vcombine.high %v9448_v14, %v9438_v7  ;;  %v5206_v14 = vshrl.u32 %v9234_v31, 16  ;;  %v5191_v31 = vshrl.u32 %v9177_v37, 16  ;;  %v5211_v37 = vcombine.high %v9506_v10, %v9489_v15 }
 0x6df   : > { %10329 = vst [vmem:[#allocation27_spill] sm:$0xff] %v9572_v20  ;;  %v6063_v20 = vcombine.high %v10331_v2, %v9152_v39  ;;  %v9622_v2 = vrot.slane %v4987_v51, %v7019_v45 }
 0x6e0   : > { %v9583_v27 = vpop.permute.xlu0 %5646  ;;  %6134 = vrot.lane.b32.xlu1 %v6058_v0, %s6481_s26  ;;  %v9608_v7 = vrot.slane %v5839_v21, %v7019_v45  ;;  %v6042_v21 = vcombine.low %v9384_v40, %v9371_v36  ;;  %v5182_v36 = vshrl.u32 %v9158_v30, 16  ;;  %v5208_v40 = vpack.i.b16 %v5207_v6, %v5206_v14 }
 0x6e1   : > { %10330 = vst [vmem:[#allocation37_spill] sm:$0xff] %v9583_v27  ;;  %v9613_v39 = vrot.slane %v6063_v20, %v6804_v60  ;;  %v5198_v20 = vshrl.u32 %v9214_v26, 16  ;;  %v5190_v27 = vshrl.u32 %v9190_v12, 16  ;;  %v5183_v26 = vshrl.u32 %v9143_v48, 16 }
 0x6e2   : > { %5908 = vrot.lane.b32.xlu0 %v9586_v44, %s6482_s29  ;;  %v9595_v38 = vpop.permute.xlu1 %5655  ;;  %v4971_v30 = vcombine.high %v9526_v61, %v9512_v49  ;;  %v9662_v29 = vrot.slane %v5211_v37, %v6804_v60  ;;  %v4955_v14 = vcombine.high %v9545_v23, %v9530_v18  ;;  %v4950_v49 = vshrl.u32 %v9319_v34, 16 }
 0x6e3   : > { %10332 = vst [vmem:[#allocation38_spill] sm:$0xff] %v9595_v38  ;;  %v5199_v38 = vshrl.u32 %v9204_v19, 16  ;;  %v6110_v19 = vcombine.low %v9613_v39, %v9603_v55  ;;  %v5192_v51 = vpack.i.b16 %v5191_v31, %v5190_v27  ;;  %v5184_v6 = vpack.i.b16 %v5183_v26, %v5182_v36 }
 0x6e4   : > { %v9605_v0 = vpop.permute.xlu0 %5625  ;;  %5356 = vrot.lane.b32.xlu1 %v9598_v24, %s6479_s24  ;;  %v4943_v31 = vshrl.u32 %v9283_v53, 16  ;;  %v4942_v23 = vshrl.u32 %v9292_v25, 16  ;;  %v9693_v25 = vrot.slane %v4955_v14, %v6804_v60 }
 0x6e5   : > { %10333 = vst [vmem:[#allocation40_spill] sm:$0xff] %v9605_v0  ;;  %v6118_v10 = vrot.slane %v6110_v19, %v7019_v45  ;;  %v5295_v27 = vcombine.high %v5192_v51, %v5208_v40  ;;  %v5873_v19 = vcombine.high %v9586_v44, %v10205_v46  ;;  %v5294_v26 = vcombine.low %v5192_v51, %v5208_v40 }
 0x6e6   : > { %5887 = vrot.lane.b32.xlu0 %v9608_v7, %s6482_s29  ;;  %v9619_v43 = vpop.permute.xlu1 %5634  ;;  %v4944_v44 = vpack.i.b16 %v4943_v31, %v4942_v23 }
 0x6e7   : > { %10334 = vst [vmem:[#allocation26_spill] sm:$0xff] %v9619_v43  ;;  %v5227_v43 = vcombine.high %v9485_v33, %v9473_v50  ;;  %v5200_v50 = vpack.i.b16 %v5199_v38, %v5198_v20  ;;  %v9650_v33 = vrot.slane %v6042_v21, %v7019_v45  ;;  %v5870_v38 = vcombine.high %v9479_v16, %v10205_v46 }
 0x6e8   : > { %v9634_v0 = vpop.permute.xlu0 %5658  ;;  %5100 = vrot.lane.b32.xlu1 %v9622_v2, %s6479_s24  ;;  %v4935_v20 = vshrl.u32 %v9261_v1, 16  ;;  %v4927_v1 = vshrl.u32 %v9245_v5, 16  ;;  %v9690_v53 = vrot.slane %v5295_v27, %v6804_v60  ;;  %v10335_v5 = vld [vmem:[#allocation13_spill] sm:$0xff] }
 0x6e9   : > { %v9653_v48 = vrot.slane %v5227_v43, %v6804_v60  ;;  %v4951_v43 = vshrl.u32 %v9306_v17, 16  ;;  %v5279_v21 = vcombine.high %v5184_v6, %v5200_v50  ;;  %v6060_v16 = vcombine.high %v9650_v33, %v10205_v46 }
 0x6ea   : > { %5890 = vrot.lane.b32.xlu0 %v5803_v13, %s6483_s30  ;;  %v9645_v12 = vpop.permute.xlu1 %4844  ;;  %v4934_v13 = vshrl.u32 %v9268_v57, 16  ;;  %v9680_v17 = vrot.slane %v4971_v30, %v6804_v60  ;;  %v4926_v57 = vshrl.u32 %v9253_v62, 16 }
 0x6eb   : > { %v5259_v18 = vcombine.high %v9662_v29, %v9653_v48  ;;  %v4952_v36 = vpack.i.b16 %v4951_v43, %v4950_v49  ;;  %v9697_v30 = vrot.slane %v5279_v21, %v6804_v60 }
 0x6ec   : > { %v9657_v15 = vpop.permute.xlu0 %4856  ;;  %5902 = vrot.lane.b32.xlu1 %v5872_v35, %s6485_s10  ;;  %v5278_v35 = vcombine.low %v5184_v6, %v5200_v50  ;;  %v5003_v27 = vcombine.high %v9693_v25, %v9680_v17  ;;  %v6128_v50 = vcombine.high %v6118_v10, %v10205_v46  ;;  %v9710_v6 = vrot.slane %v5294_v26, %v6804_v60 }
 0x6ed   : > { %v9702_v51 = vrot.slane %v5259_v18, %v7019_v45  ;;  %v4928_v43 = vpack.i.b16 %v4927_v1, %v4926_v57  ;;  %v5258_v26 = vcombine.low %v9662_v29, %v9653_v48 }
 0x6ee   : > { %6152 = vrot.lane.b32.xlu0 %v6118_v10, %s6480_s25  ;;  %v9671_v61 = vpop.permute.xlu1 %5637  ;;  %v9720_v23 = vrot.slane %v5003_v27, %v7019_v45 }
 0x6f0   : > { %v4860_v34 = vpop.permute.xlu0 %4859  ;;  %5881 = vrot.lane.b32.xlu1 %v5870_v38, %s6485_s10  ;;  %v4936_v38 = vpack.i.b16 %v4935_v20, %v4934_v13  ;;  %v5326_v20 = vcombine.low %v9697_v30, %v9690_v53  ;;  %v9717_v13 = vrot.slane %v5278_v35, %v6804_v60 }
 0x6f2   : > { %6155 = vrot.lane.b32.xlu0 %v6060_v16, %s6481_s26  ;;  %v4836_v37 = vpop.permute.xlu1 %4835  ;;  %v5039_v49 = vcombine.high %v4936_v38, %v4952_v36  ;;  %v5023_v16 = vcombine.high %v4928_v43, %v4944_v44  ;;  %v5038_v10 = vcombine.low %v4936_v38, %v4952_v36  ;;  %v9729_v57 = vrot.slane %v5326_v20, %v7019_v45 }
 0x6f3   : > { %v4878_v62 = vsel %vm1100_vm8, %v10335_v5, %v4836_v37  ;;  %v5022_v37 = vcombine.low %v4928_v43, %v4944_v44  ;;  %v5871_v5 = vcombine.high %v9608_v7, %v10205_v46  ;;  %v9768_v20 = vrot.slane %v5258_v26, %v7019_v45 }
 0x6f4   : > { %v4839_v40 = vpop.permute.xlu0 %4838  ;;  %5914 = vrot.lane.b32.xlu1 %v5873_v19, %s6484_s9  ;;  %v9724_v18 = vrot.slane %v5039_v49, %v6804_v60  ;;  %v5310_v19 = vcombine.low %v9717_v13, %v9710_v6  ;;  %v9736_v35 = vrot.slane %v5023_v16, %v6804_v60 }
 0x6f5   : > { %v4880_v14 = vsel %vm1104_vm9, %v4878_v62, %v4839_v40  ;;  %v10336_v62 = vld [vmem:[#allocation19_spill] sm:$0xff]  ;;  %v9746_v40 = vrot.slane %v5038_v10, %v6804_v60  ;;  %v9761_v43 = vrot.slane %v5022_v37, %v6804_v60  ;;  %v5276_v26 = vcombine.high %v9768_v20, %v10205_v46 }
 0x6f6   : > { %5377 = vrot.lane.b32.xlu0 %v9702_v51, %s6479_s24  ;;  %v4848_v21 = vpop.permute.xlu1 %4847  ;;  %v4893_v38 = vsel %vm1100_vm8, %v10336_v62, %v9657_v15  ;;  %v9751_v44 = vrot.slane %v5310_v19, %v7019_v45  ;;  %v5070_v7 = vcombine.low %v9736_v35, %v9724_v18  ;;  %v5242_v15 = vcombine.low %v9556_v52, %v9541_v42 }
 0x6f7   : > { %v4895_v48 = vsel %vm1104_vm9, %v4893_v38, %v4860_v34 }
 0x6f8   : > { %v4869_v31 = vpop.permute.xlu0 %4868  ;;  %6158 = vrot.lane.b32.xlu1 %v6128_v50, %s6485_s10  ;;  %v6126_v50 = vcombine.high %v9553_v32, %v10205_v46  ;;  %v4986_v32 = vcombine.low %v9581_v41, %v9569_v59  ;;  %v5078_v52 = vrot.slane %v5070_v7, %v7019_v45  ;;  %v9790_v37 = vrot.slane %v5242_v15, %v7019_v45 }
 0x6fa   : > { %5121 = vrot.lane.b32.xlu0 %v9720_v23, %s6479_s24  ;;  %v4851_v1 = vpop.permute.xlu1 %4850 }
 0x6fc   : > { %v4872_v36 = vpop.permute.xlu0 %4871  ;;  %5368 = vrot.lane.b32.xlu1 %v9729_v57, %s6480_s25 }
 0x6fe   : > { %5893 = vrot.lane.b32.xlu0 %v5871_v5, %s6484_s9  ;;  %v4863_v29 = vpop.permute.xlu1 %4862 }
 0x6ff   : > { %v4897_v27 = vsel %vm1107_vm10, %v4895_v48, %v4863_v29  ;;  %v5311_v29 = vcombine.high %v9717_v13, %v9710_v6 }
 0x700   : > { %v4899_v34 = vsel %vm1110_vm11, %v4897_v27, %v9560_v54  ;;  %v4875_v49 = vpop.permute.xlu0 %4874  ;;  %5347 = vrot.lane.b32.xlu1 %v9751_v44, %s6480_s25  ;;  %v5054_v54 = vcombine.low %v9761_v43, %v9746_v40 }
 0x701   : > { %v4901_v16 = vsel %vm1113_vm12, %v4899_v34, %v4869_v31  ;;  %v5002_v31 = vcombine.low %v9693_v25, %v9680_v17  ;;  %v5325_v34 = vrot.slane %v5311_v29, %v7019_v45 }
 0x702   : > { %v4903_v42 = vsel %vm1116_vm13, %v4901_v16, %v4872_v36  ;;  %6137 = vrot.lane.b32.xlu0 %v6126_v50, %s6485_s10  ;;  %v4842_v60 = vpop.permute.xlu1 %4841  ;;  %v5062_v17 = vrot.slane %v5054_v54, %v7019_v45  ;;  %v5327_v50 = vcombine.high %v9697_v30, %v9690_v53  ;;  %v5275_v16 = vcombine.high %v9598_v24, %v10205_v46 }
 0x703   : > { %v9779_v10 = vsel %vm1119_vm14, %v4903_v42, %v4875_v49  ;;  %v4882_v19 = vsel %vm1107_vm10, %v4880_v14, %v4842_v60  ;;  %v5277_v53 = vcombine.high %v9702_v51, %v10205_v46  ;;  %v5071_v30 = vcombine.high %v9736_v35, %v9724_v18 }
 0x704   : > { %v4884_v41 = vsel %vm1110_vm11, %v4882_v19, %v9645_v12  ;;  %v4854_v59 = vpop.permute.xlu0 %4853  ;;  %5112 = vrot.lane.b32.xlu1 %v5078_v52, %s6480_s25  ;;  %v9799_v12 = vrot.slane %v4986_v32, %v7019_v45  ;;  %v5341_v6 = vrot.slane %v5327_v50, %v7019_v45  ;;  %v5021_v60 = vcombine.high %v9720_v23, %v10205_v46 }
 0x705   : > { %v4886_v36 = vsel %vm1113_vm12, %v4884_v41, %v4848_v21  ;;  %v5274_v21 = vcombine.high %v9790_v37, %v10205_v46  ;;  %v5085_v24 = vrot.slane %v5071_v30, %v7019_v45  ;;  %v5055_v19 = vcombine.high %v9761_v43, %v9746_v40  ;;  %v10338_v30 = vld [vmem:[#allocation7_spill] sm:$0xff] }
 0x706   : > { %v4888_v5 = vsel %vm1116_vm13, %v4886_v36, %v4851_v1  ;;  %5371 = vrot.lane.b32.xlu0 %v5276_v26, %s6481_s26  ;;  %v9795_v14 = vpop.permute.xlu1 %4289  ;;  %v9810_v1 = vrot.slane %v5002_v31, %v7019_v45  ;;  %v5018_v48 = vcombine.high %v9799_v12, %v10205_v46  ;;  %v5019_v18 = vcombine.high %v9622_v2, %v10205_v46 }
 0x707   : > { %v9802_v25 = vsel %vm1119_vm14, %v4888_v5, %v4854_v59  ;;  %v5069_v23 = vrot.slane %v5055_v19, %v7019_v45  ;;  %v5344_v40 = vcombine.high %v9729_v57, %v10205_v46  ;;  %v5088_v41 = vcombine.high %v5078_v52, %v10205_v46 }
 0x708   : > { %v9804_v62 = vpop.permute.xlu0 %4268  ;;  %5091 = vrot.lane.b32.xlu1 %v5062_v17, %s6480_s25  ;;  %v5020_v27 = vcombine.high %v9810_v1, %v10205_v46  ;;  %v5342_v59 = vcombine.high %v9751_v44, %v10205_v46  ;;  %v5345_v36 = vcombine.high %v5341_v6, %v10205_v46  ;;  %v5086_v5 = vcombine.high %v5062_v17, %v10205_v46 }
 0x709   : > { %v6111_v52 = vcombine.high %v9613_v39, %v9603_v55  ;;  %v5343_v44 = vcombine.high %v5325_v34, %v10205_v46  ;;  %v5089_v17 = vcombine.high %v5085_v24, %v10205_v46  ;;  %v5087_v39 = vcombine.high %v5069_v23, %v10205_v46 }
 0x70a   : > { %5350 = vrot.lane.b32.xlu0 %v5274_v21, %s6481_s26  ;;  %v9813_v38 = vpop.permute.xlu1 %4524 }
 0x70b   : > { %v6125_v29 = vrot.slane %v6111_v52, %v7019_v45 }
 0x70c   : > { %v9819_v7 = vpop.permute.xlu0 %4545  ;;  %5094 = vrot.lane.b32.xlu1 %v5018_v48, %s6481_s26 }
 0x70e   : > { %5115 = vrot.lane.b32.xlu0 %v5020_v27, %s6481_s26  ;;  %v4260_v15 = vpop.permute.xlu1 %4259 }
 0x710   : > { %v9828_v49 = vpop.permute.xlu0 %4280  ;;  %5359 = vrot.lane.b32.xlu1 %v5325_v34, %s6482_s29  ;;  %v10337_v34 = vcombine.high %v9212_v56, %v9199_v9 }
 0x712   : > { %5380 = vrot.lane.b32.xlu0 %v5341_v6, %s6482_s29  ;;  %v9833_v13 = vpop.permute.xlu1 %4292  ;;  %v6109_v6 = vrot.slane %v10337_v34, %v7019_v45  ;;  %v3697_v34 = vld [vmem:[%s10153_s7] sm:$0xff] }
 0x714   : > { %v9837_v32 = vpop.permute.xlu0 %4283  ;;  %5362 = vrot.lane.b32.xlu1 %v5275_v16, %s6483_s30 }
 0x716   : > { %5383 = vrot.lane.b32.xlu0 %v5277_v53, %s6483_s30  ;;  %v9845_v42 = vpop.permute.xlu1 %4271  ;;  %v6061_v53 = vcombine.high %v9413_v3, %v10205_v46  ;;  %v6059_v3 = vcombine.high %v9390_v58, %v10205_v46  ;;  %v6129_v58 = vcombine.high %v6125_v29, %v10205_v46 }
 0x718   : > { %v4263_v54 = vpop.permute.xlu0 %4262  ;;  %5127 = vrot.lane.b32.xlu1 %v5021_v60, %s6483_s30  ;;  %v4053_v60 = vsel %vm1100_vm8, %v10338_v30, %v9351_v8  ;;  %v10346_v30 = vld [vmem:[#allocation21_spill] sm:$0xff] }
 0x719   : > { %v4055_v45 = vsel %vm1104_vm9, %v4053_v60, %v9375_v22 }
 0x71a   : > { %5124 = vrot.lane.b32.xlu0 %v5085_v24, %s6482_s29  ;;  %v9854_v51 = vpop.permute.xlu1 %4274  ;;  %v10339_v24 = vld [vmem:[#allocation17_spill] sm:$0xff] }
 0x71b   : > { %v4302_v19 = vsel %vm1100_vm8, %v10339_v24, %v4260_v15  ;;  %v4057_v15 = vsel %vm1107_vm10, %v4055_v45, %v9441_v11  ;;  %v6127_v11 = vcombine.high %v6109_v6, %v10205_v46  ;;  %v10347_v24 = vld [vmem:[#allocation14_spill] sm:$0xff] }
 0x71c   : > { %v9858_v35 = vpop.permute.xlu0 %4295  ;;  %5106 = vrot.lane.b32.xlu1 %v5019_v18, %s6483_s30  ;;  %v10340_v18 = vld [vmem:[#allocation10_spill] sm:$0xff]  ;;  %v4304_v9 = vsel %vm1104_vm9, %v4302_v19, %v4263_v54 }
 0x71d   : > { %v10348_v45 = vld [vmem:[#allocation18_spill] sm:$0xff] }
 0x71e   : > { %5103 = vrot.lane.b32.xlu0 %v5069_v23, %s6482_s29  ;;  %v9863_v31 = vpop.permute.xlu1 %4536  ;;  %v4038_v23 = vsel %vm1100_vm8, %v10340_v18, %v9358_v4 }
 0x71f   : > { %v4040_v8 = vsel %vm1104_vm9, %v4038_v23, %v9386_v63  ;;  %v4573_v60 = vsel %vm1100_vm8, %v10346_v30, %v9863_v31 }
 0x720   : > { %v9867_v43 = vpop.permute.xlu0 %4539  ;;  %5374 = vrot.lane.b32.xlu1 %v5344_v40, %s6485_s10  ;;  %v4042_v4 = vsel %vm1107_vm10, %v4040_v8, %v9456_v47 }
 0x722   : > { %5118 = vrot.lane.b32.xlu0 %v5088_v41, %s6485_s10  ;;  %v4516_v2 = vpop.permute.xlu1 %4515  ;;  %v10341_v41 = vld [vmem:[#allocation9_spill] sm:$0xff] }
 0x723   : > { %v4059_v63 = vsel %vm1110_vm11, %v4057_v15, %v10341_v41  ;;  %v4558_v19 = vsel %vm1100_vm8, %v10347_v24, %v4516_v2  ;;  %v4575_v15 = vsel %vm1104_vm9, %v4573_v60, %v9867_v43 }
 0x724   : > { %v9874_v26 = vpop.permute.xlu0 %4548  ;;  %5353 = vrot.lane.b32.xlu1 %v5342_v59, %s6485_s10 }
 0x726   : > { %5386 = vrot.lane.b32.xlu0 %v5345_v36, %s6484_s9  ;;  %v4519_v57 = vpop.permute.xlu1 %4518  ;;  %v10342_v36 = vld [vmem:[#allocation24_spill] sm:$0xff] }
 0x727   : > { %v4044_v47 = vsel %vm1110_vm11, %v4042_v4, %v10342_v36 }
 0x728   : > { %v9882_v21 = vpop.permute.xlu0 %4527  ;;  %5097 = vrot.lane.b32.xlu1 %v5086_v5, %s6485_s10  ;;  %v10343_v5 = vld [vmem:[#allocation15_spill] sm:$0xff] }
 0x72a   : > { %5365 = vrot.lane.b32.xlu0 %v5343_v44, %s6484_s9  ;;  %v9887_v48 = vpop.permute.xlu1 %4551 }
 0x72c   : > { %v9890_v27 = vpop.permute.xlu0 %5905  ;;  %6164 = vrot.lane.b32.xlu1 %v6125_v29, %s6482_s29 }
 0x72e   : > { %5130 = vrot.lane.b32.xlu0 %v5089_v17, %s6484_s9  ;;  %v9895_v55 = vpop.permute.xlu1 %4530  ;;  %v10344_v17 = vld [vmem:[#allocation23_spill] sm:$0xff] }
 0x730   : > { %v9898_v50 = vpop.permute.xlu0 %6140  ;;  %5109 = vrot.lane.b32.xlu1 %v5087_v39, %s6484_s9  ;;  %v4061_v39 = vsel %vm1113_vm12, %v4059_v63, %v10344_v17 }
 0x732   : > { %6143 = vrot.lane.b32.xlu0 %v6109_v6, %s6482_s29  ;;  %v9906_v16 = vpop.permute.xlu1 %5884  ;;  %v10345_v6 = vld [vmem:[#allocation25_spill] sm:$0xff] }
 0x734   : > { %v4266_v56 = vpop.permute.xlu0 %4265  ;;  %6167 = vrot.lane.b32.xlu1 %v6061_v53, %s6483_s30 }
 0x735   : > { %v4306_v40 = vsel %vm1107_vm10, %v4304_v9, %v4266_v56  ;;  %v4063_v9 = vsel %vm1116_vm13, %v4061_v39, %v10348_v45 }
 0x736   : > { %v4308_v22 = vsel %vm1110_vm11, %v4306_v40, %v9804_v62  ;;  %6146 = vrot.lane.b32.xlu0 %v6059_v3, %s6483_s30  ;;  %v9934_v54 = vpop.permute.xlu1 %6161  ;;  %v4317_v62 = vsel %vm1100_vm8, %v10343_v5, %v9828_v49  ;;  %v4046_v49 = vsel %vm1113_vm12, %v4044_v47, %v10345_v6  ;;  %v10349_v3 = vld [vmem:[#allocation22_spill] sm:$0xff]  ;;  %v6209_v5 = vrot.slane %v9779_v10, 4 }
 0x737   : > { %v4310_v52 = vsel %vm1113_vm12, %v4308_v22, %v9845_v42  ;;  %v4319_v44 = vsel %vm1104_vm9, %v4317_v62, %v9837_v32  ;;  %v4048_v31 = vsel %vm1116_vm13, %v4046_v49, %v10349_v3  ;;  %v10350_v22 = vld [vmem:[#allocation39_spill] sm:$0xff] }
 0x738   : > { %v4299_v59 = vpop.permute.xlu0 %4298  ;;  %6170 = vrot.lane.b32.xlu1 %v6129_v58, %s6484_s9  ;;  %v4312_v32 = vsel %vm1116_vm13, %v4310_v52, %v9854_v51  ;;  %v10351_v58 = vld [vmem:[#allocation3_spill] sm:$0xff] }
 0x739   : > { %v4050_v41 = vsel %vm1119_vm14, %v4048_v31, %v10351_v58  ;;  %v10355_v58 = vld [vmem:[#allocation16_spill] sm:$0xff] }
 0x73a   : > { %6149 = vrot.lane.b32.xlu0 %v6127_v11, %s6484_s9  ;;  %v4287_v29 = vpop.permute.xlu1 %4286 }
 0x73b   : > { %v4321_v46 = vsel %vm1107_vm10, %v4319_v44, %v4287_v29 }
 0x73c   : > { %v4323_v42 = vsel %vm1110_vm11, %v4321_v46, %v9795_v14  ;;  %v4278_v53 = vpop.permute.xlu0 %4277  ;;  %v4560_v14 = vsel %vm1104_vm9, %v4558_v19, %v4519_v57  ;;  %v4065_v57 = vsel %vm1119_vm14, %v4063_v9, %v10350_v22 }
 0x73d   : > { %v4325_v18 = vsel %vm1113_vm12, %v4323_v42, %v9833_v13  ;;  %v4314_v23 = vsel %vm1119_vm14, %v4312_v32, %v4278_v53  ;;  %v10353_v32 = vld [vmem:[#allocation33_spill] sm:$0xff] }
 0x73e   : > { %v4327_v51 = vsel %vm1116_vm13, %v4325_v18, %v9858_v35  ;;  %6244 = vperm.xlu0 %6464, %v3697_v34   ;;  %v4522_v56 = vpop.permute.xlu1 %4521  ;;  %v6204_v8 = vrot.slane %v4314_v23, 4  ;;  %v10352_v34 = vld [vmem:[#allocation30_spill] sm:$0xff] }
 0x73f   : > { %v4562_v2 = vsel %vm1107_vm10, %v4560_v14, %v4522_v56  ;;  %v4329_v13 = vsel %vm1119_vm14, %v4327_v51, %v4299_v59 }
 0x740   : > { %v4543_v40 = vpop.permute.xlu0 %4542  ;;  %v6205_v4 = vrot.slane %v4329_v13, 4  ;;  %v4564_v63 = vsel %vm1110_vm11, %v4562_v2, %v9813_v38  ;;  %v6219_v47 = vsel %vm3291_vm15, %v4050_v41, %v6204_v8 }
 0x741   : > { %v4577_v35 = vsel %vm1107_vm10, %v4575_v15, %v4543_v40 }
 0x742   : > { %v4579_v11 = vsel %vm1110_vm11, %v4577_v35, %v9819_v7  ;;  %v5897_v59 = vpop.permute.xlu1 %5896  ;;  %v6222_v36 = vsel %vm3291_vm15, %v4065_v57, %v6205_v4  ;;  %v4566_v7 = vsel %vm1113_vm12, %v4564_v63, %v9882_v21  ;;  %v10354_v35 = vld [vmem:[#allocation36_spill] sm:$0xff]  ;;  %v10356_v63 = vld [vmem:[#allocation35_spill] sm:$0xff] }
 0x743   : > { %v4581_v43 = vsel %vm1113_vm12, %v4579_v11, %v9874_v26  ;;  %6254 = vmatprep.subr.bf16.mxu1 %v6222_v36  ;;  %v6208_v26 = vrot.slane %v9802_v25, 4  ;;  %v4568_v17 = vsel %vm1116_vm13, %v4566_v7, %v9895_v55  ;;  %v5933_v6 = vsel %vm1100_vm8, %v10352_v34, %v5897_v59  ;;  %v10357_v59 = vld [vmem:[#allocation40_spill] sm:$0xff] }
 0x744   : > { %v4583_v62 = vsel %vm1116_vm13, %v4581_v43, %v9887_v48  ;;  %v4555_v52 = vpop.permute.xlu0 %4554  ;;  %6255 = vmatpush1.bf16.msra.mxu1 %v6219_v47  ;;  %v5662_v41 = vsel %vm1100_vm8, %v10355_v58, %v10354_v35  ;;  %v10358_v47 = vld [vmem:[#allocation29_spill] sm:$0xff]  ;;  %v10359_v7 = vld [vmem:[#allocation12_spill] sm:$0xff] }
 0x745   : > { %v4585_v38 = vsel %vm1119_vm14, %v4583_v62, %v4555_v52  ;;  %v5664_v11 = vsel %vm1104_vm9, %v5662_v41, %v10356_v63 }
 0x746   : > { %v6228_v44 = vsel %vm3291_vm15, %v4585_v38, %v6209_v5  ;;  %v5876_v29 = vpop.permute.xlu1 %5875 }
 0x747   : > { %6256 = vmatprep.subr.bf16.mxu1 %v6228_v44  ;;  %v5918_v25 = vsel %vm1100_vm8, %v10353_v32, %v5876_v29 }
 0x748   : > { %v4534_v10 = vpop.permute.xlu0 %4533 }
 0x749   : > { %v4570_v39 = vsel %vm1119_vm14, %v4568_v17, %v4534_v10  ;;  %v10360_v17 = vld [vmem:[#allocation26_spill] sm:$0xff] }
 0x74a   : > { %v6225_v48 = vsel %vm3291_vm15, %v4570_v39, %v6208_v26  ;;  %v5912_v46 = vpop.permute.xlu1 %5911 }
 0x74b   : > { %6257 = vmatpush1.bf16.msra.mxu1 %v6225_v48 }
 0x74c   : > { %v5900_v21 = vpop.permute.xlu0 %5899 }
 0x74d   : > { %v5935_v49 = vsel %vm1104_vm9, %v5933_v6, %v5900_v21 }
 0x74e   : > { %v6132_v42 = vpop.permute.xlu1 %6131 }
 0x74f   : > { %v6174_v30 = vsel %vm1100_vm8, %v9538_v28, %v6132_v42 }
 0x750   : > { %v5879_v53 = vpop.permute.xlu0 %5878 }
 0x751   : > { %v5920_v55 = vsel %vm1104_vm9, %v5918_v25, %v5879_v53 }
 0x752   : > { %v6135_v60 = vpop.permute.xlu1 %6134 }
 0x753   : > { %v10016_v24 = vsel %vm1104_vm9, %v6174_v30, %v6135_v60 }
 0x754   : > { %v5909_v19 = vpop.permute.xlu0 %5908 }
 0x756   : > { %v10018_v18 = vpop.permute.xlu1 %5356 }
 0x758   : > { %v5888_v23 = vpop.permute.xlu0 %5887 }
 0x75a   : > { %v10020_v45 = vpop.permute.xlu1 %5100 }
 0x75c   : > { %v5891_v9 = vpop.permute.xlu0 %5890 }
 0x75e   : > { %v5903_v14 = vpop.permute.xlu1 %5902 }
 0x75f   : > { %v5937_v51 = vsel %vm1107_vm10, %v5935_v49, %v5903_v14 }
 0x760   : > { %v5939_v56 = vsel %vm1110_vm11, %v5937_v51, %v9890_v27  ;;  %v6153_v3 = vpop.permute.xlu0 %6152 }
 0x761   : > { %v5941_v28 = vsel %vm1113_vm12, %v5939_v56, %v5909_v19  ;;  %v6189_v13 = vsel %vm1100_vm8, %v9650_v33, %v6153_v3 }
 0x762   : > { %v5882_v31 = vpop.permute.xlu1 %5881  ;;  %v10027_v8 = vsel %vm1116_vm13, %v5941_v28, %v5912_v46 }
 0x763   : > { %v5922_v2 = vsel %vm1107_vm10, %v5920_v55, %v5882_v31 }
 0x764   : > { %v5924_v15 = vsel %vm1110_vm11, %v5922_v2, %v9906_v16  ;;  %v6156_v40 = vpop.permute.xlu0 %6155  ;;  %v5666_v16 = vsel %vm1107_vm10, %v5664_v11, %v10357_v59 }
 0x765   : > { %v6191_v4 = vsel %vm1104_vm9, %v6189_v13, %v6156_v40  ;;  %v5926_v27 = vsel %vm1113_vm12, %v5924_v15, %v5888_v23  ;;  %v5668_v5 = vsel %vm1110_vm11, %v5666_v16, %v10358_v47  ;;  %v10361_v15 = vld [vmem:[#allocation31_spill] sm:$0xff]  ;;  %v10362_v40 = vld [vmem:[#allocation20_spill] sm:$0xff]  ;;  %v10364_v16 = vld [vmem:[#allocation37_spill] sm:$0xff] }
 0x766   : > { %v10036_v22 = vpop.permute.xlu1 %5914  ;;  %v5928_v57 = vsel %vm1116_vm13, %v5926_v27, %v5891_v9  ;;  %v5670_v44 = vsel %vm1113_vm12, %v5668_v5, %v10359_v7 }
 0x767   : > { %v5672_v10 = vsel %vm1116_vm13, %v5670_v44, %v10360_v17 }
 0x768   : > { %v5378_v33 = vpop.permute.xlu0 %5377  ;;  %v5674_v46 = vsel %vm1119_vm14, %v5672_v10, %v9671_v61 }
 0x76a   : > { %v6159_v36 = vpop.permute.xlu1 %6158 }
 0x76b   : > { %v6193_v43 = vsel %vm1107_vm10, %v6191_v4, %v6159_v36  ;;  %v5677_v4 = vsel %vm1100_vm8, %v10362_v40, %v10361_v15 }
 0x76c   : > { %v5122_v62 = vpop.permute.xlu0 %5121  ;;  %v10051_v52 = vsel %vm1110_vm11, %v6193_v43, %v9934_v54 }
 0x76e   : > { %v5369_v38 = vpop.permute.xlu1 %5368 }
 0x76f   : > { %v5405_v61 = vsel %vm1100_vm8, %v9768_v20, %v5369_v38 }
 0x770   : > { %v5894_v29 = vpop.permute.xlu0 %5893 }
 0x771   : > { %v5930_v26 = vsel %vm1119_vm14, %v5928_v57, %v5894_v29  ;;  %v10365_v29 = vld [vmem:[#allocation28_spill] sm:$0xff] }
 0x772   : > { %v6216_v39 = vrot.slane %v5930_v26, 4  ;;  %v5348_v48 = vpop.permute.xlu1 %5347 }
 0x773   : > { %v5390_v2 = vsel %vm1100_vm8, %v9790_v37, %v5348_v48 }
 0x774   : > { %v10060_v34 = vpop.permute.xlu0 %6137  ;;  %v10063_v54 = vsel %vm3291_vm15, %v5674_v46, %v6216_v39 }
 0x776   : > { %v5113_v6 = vpop.permute.xlu1 %5112 }
 0x777   : > { %v5149_v13 = vsel %vm1100_vm8, %v9810_v1, %v5113_v6  ;;  %v10363_v1 = vld [vmem:[#allocation11_spill] sm:$0xff] }
 0x778   : > { %v5372_v21 = vpop.permute.xlu0 %5371  ;;  %v5679_v11 = vsel %vm1104_vm9, %v5677_v4, %v10363_v1 }
 0x779   : > { %v5407_v51 = vsel %vm1104_vm9, %v5405_v61, %v5372_v21  ;;  %v5681_v36 = vsel %vm1107_vm10, %v5679_v11, %v10364_v16 }
 0x77a   : > { %v5092_v49 = vpop.permute.xlu1 %5091  ;;  %v5683_v26 = vsel %vm1110_vm11, %v5681_v36, %v10365_v29 }
 0x77c   : > { %v5351_v42 = vpop.permute.xlu0 %5350 }
 0x77d   : > { %v5392_v20 = vsel %vm1104_vm9, %v5390_v2, %v5351_v42 }
 0x77e   : > { %v5095_v32 = vpop.permute.xlu1 %5094 }
 0x780   : > { %v5116_v25 = vpop.permute.xlu0 %5115 }
 0x781   : > { %v5151_v27 = vsel %vm1104_vm9, %v5149_v13, %v5116_v25 }
 0x782   : > { %v5360_v53 = vpop.permute.xlu1 %5359 }
 0x784   : > { %v5381_v55 = vpop.permute.xlu0 %5380 }
 0x786   : > { %v5363_v30 = vpop.permute.xlu1 %5362 }
 0x788   : > { %v5384_v60 = vpop.permute.xlu0 %5383 }
 0x78a   : > { %v5128_v19 = vpop.permute.xlu1 %5127 }
 0x78c   : > { %v5125_v23 = vpop.permute.xlu0 %5124 }
 0x78e   : > { %v5107_v9 = vpop.permute.xlu1 %5106 }
 0x790   : > { %v5104_v14 = vpop.permute.xlu0 %5103 }
 0x792   : > { %v5375_v56 = vpop.permute.xlu1 %5374 }
 0x793   : > { %v5409_v3 = vsel %vm1107_vm10, %v5407_v51, %v5375_v56 }
 0x794   : > { %v5411_v28 = vsel %vm1110_vm11, %v5409_v3, %v5378_v33  ;;  %v5119_v31 = vpop.permute.xlu0 %5118  ;;  %v5134_v33 = vsel %vm1100_vm8, %v9799_v12, %v5092_v49 }
 0x795   : > { %v5153_v35 = vsel %vm1107_vm10, %v5151_v27, %v5119_v31  ;;  %v5413_v41 = vsel %vm1113_vm12, %v5411_v28, %v5381_v55  ;;  %v5136_v43 = vsel %vm1104_vm9, %v5134_v33, %v5095_v32 }
 0x796   : > { %v5354_v57 = vpop.permute.xlu1 %5353  ;;  %v5155_v47 = vsel %vm1110_vm11, %v5153_v35, %v5122_v62  ;;  %v5415_v5 = vsel %vm1116_vm13, %v5413_v41, %v5384_v60  ;;  %v5945_v62 = vsel %vm1119_vm14, %v10027_v8, %v10036_v22  ;;  %v10367_v22 = vld [vmem:[#allocation38_spill] sm:$0xff] }
 0x797   : > { %v5394_v58 = vsel %vm1107_vm10, %v5392_v20, %v5354_v57  ;;  %v5157_v10 = vsel %vm1113_vm12, %v5155_v47, %v5125_v23  ;;  %v6217_v32 = vrot.slane %v5945_v62, 4 }
 0x798   : > { %v5396_v37 = vsel %vm1110_vm11, %v5394_v58, %v10018_v18  ;;  %v5387_v63 = vpop.permute.xlu0 %5386  ;;  %v5159_v49 = vsel %vm1116_vm13, %v5157_v10, %v5128_v19 }
 0x799   : > { %v5398_v59 = vsel %vm1113_vm12, %v5396_v37, %v5360_v53  ;;  %v5417_v17 = vsel %vm1119_vm14, %v5415_v5, %v5387_v63 }
 0x79a   : > { %v5098_v38 = vpop.permute.xlu1 %5097  ;;  %v5400_v44 = vsel %vm1116_vm13, %v5398_v59, %v5363_v30  ;;  %v6213_v21 = vrot.slane %v5417_v17, 4 }
 0x79b   : > { %v5138_v18 = vsel %vm1107_vm10, %v5136_v43, %v5098_v38 }
 0x79c   : > { %v5140_v7 = vsel %vm1110_vm11, %v5138_v18, %v10020_v45  ;;  %v5366_v12 = vpop.permute.xlu0 %5365  ;;  %v10366_v45 = vld [vmem:[#allocation27_spill] sm:$0xff] }
 0x79d   : > { %v5402_v48 = vsel %vm1119_vm14, %v5400_v44, %v5366_v12  ;;  %v5142_v46 = vsel %vm1113_vm12, %v5140_v7, %v5104_v14  ;;  %v5685_v6 = vsel %vm1113_vm12, %v5683_v26, %v10366_v45 }
 0x79e   : > { %v6165_v39 = vpop.permute.xlu1 %6164  ;;  %v6212_v53 = vrot.slane %v5402_v48, 4  ;;  %v5144_v8 = vsel %vm1116_vm13, %v5142_v46, %v5107_v9  ;;  %v5687_v60 = vsel %vm1116_vm13, %v5685_v6, %v10367_v22  ;;  %v6178_v9 = vsel %vm1107_vm10, %v10016_v24, %v10060_v34 }
 0x79f   : > { %v5689_v14 = vsel %vm1119_vm14, %v5687_v60, %v9634_v0  ;;  %v6197_v28 = vsel %vm1113_vm12, %v10051_v52, %v6165_v39  ;;  %v6180_v0 = vsel %vm1110_vm11, %v6178_v9, %v9898_v50  ;;  %v3696_v50 = vld [vmem:[%s10152_s6] sm:$0xf] }
 0x7a0   : > { %v5131_v42 = vpop.permute.xlu0 %5130  ;;  %v6240_v51 = vsel %vm3291_vm15, %v5689_v14, %v6217_v32 }
 0x7a1   : > { %v5161_v25 = vsel %vm1119_vm14, %v5159_v49, %v5131_v42 }
 0x7a2   : > { %v6234_v55 = vsel %vm3291_vm15, %v5161_v25, %v6213_v21  ;;  %v5110_v30 = vpop.permute.xlu1 %5109 }
 0x7a3   : > { %6258 = vmatprep.subr.bf16.mxu1 %v6234_v55  ;;  %v5146_v23 = vsel %vm1119_vm14, %v5144_v8, %v5110_v30 }
 0x7a4   : > { %v6144_v19 = vpop.permute.xlu0 %6143  ;;  %v6231_v61 = vsel %vm3291_vm15, %v5146_v23, %v6212_v53 }
 0x7a5   : > { %6259 = vmatpush1.bf16.msra.mxu1 %v6231_v61  ;;  %v6182_v13 = vsel %vm1113_vm12, %v6180_v0, %v6144_v19 }
 0x7a6   : > { %v6168_v56 = vpop.permute.xlu1 %6167  ;;  %6260 = vmatprep.subr.bf16.mxu1 %v6240_v51 }
 0x7a7   : > { %v6199_v31 = vsel %vm1116_vm13, %v6197_v28, %v6168_v56 }
 0x7a8   : > { %v6147_v3 = vpop.permute.xlu0 %6146 }
 0x7a9   : > { %6261 = vmatpush1.bf16.msra.mxu1 %v10063_v54  ;;  %v6184_v40 = vsel %vm1116_vm13, %v6182_v13, %v6147_v3 }
 0x7aa   : > { %v6171_v2 = vpop.permute.xlu1 %6170 }
 0x7ab   : > { %v6201_v15 = vsel %vm1119_vm14, %v6199_v31, %v6171_v2 }
 0x7ac   : > { %v6150_v24 = vpop.permute.xlu0 %6149  ;;  %6391 = vmatprep.subr.msk.bf16.mxu1 %vm3291_vm15, %v6201_v15 }
 0x7ad   : > { %v6186_v34 = vsel %vm1119_vm14, %v6184_v40, %v6150_v24 }
 0x7ae   : > { %v6250_v52 = vsel %vm3291_vm15, %v6186_v34, 0 }
 0x7af   : > { %6263 = vmatpush1.bf16.msra.mxu1 %v6250_v52 }
 0x7b2   : > { %6392 = vmatmul.mubr.msk.bf16.vlgmr.msra.gmra.mrb[8].mxu1 %vm3321_vm0, %v3696_v50 }
 0x7bd   : > { %v6245_v54 = vpop.permute.xlu0 %6244 }
 0x885   : > { %v6288_v4 = vpop.f32.mrb[8].mxu1 }
 0x886   : > { %v6289_v20 = vadd.f32 %v6288_v4, %v6245_v54  ;;  %v6290_v27 = vpop.f32.mrb[9].mxu1 }
 0x887   : > { %v6291_v57 = vadd.f32 %v6290_v27, %v6245_v54  ;;  %v6292_v35 = vpop.f32.mrb[10].mxu1 }
 0x888   : > { %v6295_v58 = vmax.f32 %v6289_v20, 0.0  ;;  %v6293_v41 = vpop.f32.mrb[11].mxu1 }
 0x889   : > { %v6296_v37 = vmax.f32 %v6291_v57, 0.0 }
 0x88a   : > { %6297 = vst [vmem:[%s325_s22] sm:$0xff] %v6295_v58 }
 0x88b   : > { %6298 = vst [vmem:[%s325_s22 + $0x8] sm:$0xff] %v6296_v37 }
 0x88c PF: > { %s18_s27 = sadd.s32 1, %s6471_s27  }
 0x88d   : > { %p15_p4 = scmp.ge.s32.totalorder %s18_s27, 4  }
 0x88f   :  { %17 = sbr.rel (!%p15_p4) target bundleno = 1 (0x1), region = 85 }

</bundles_post_ra>
